<compile_context>
chip_gen: v7x
topology: tpu7x:2x2x1
jax: 0.10.0
libtpu: 0.0.40
codegen_flags: <defaults>
</compile_context>

<pallas_src>
import math
from functools import partial

import jax
import jax.numpy as jnp
from jax.experimental import pallas as pl
from jax.experimental.pallas import tpu as pltpu


# -----------------------------------------------------------------------------
# Kernel: one grid step per batch element; (N, C) tile resident in VMEM.
# -----------------------------------------------------------------------------
def _attention_kernel(x_ref, wqkv_ref, wproj_ref, bproj_ref, o_ref, *, num_heads):
    N, C = x_ref.shape
    H = num_heads
    hd = C // H

    # ---- QKV projection: (N, C) x (C, 3C) MXU matmul, bf16 in / f32 acc. ----
    # (softmax scale is already folded into the Q columns of wqkv)
    x_bf = x_ref[...].astype(jnp.bfloat16)
    qkv = jnp.dot(x_bf, wqkv_ref[...],
                  preferred_element_type=jnp.float32)            # (N, 3C) f32

    q = qkv[:, :C].astype(jnp.bfloat16).reshape(N, H, hd)
    k = qkv[:, C:2 * C].astype(jnp.bfloat16).reshape(N, H, hd)
    v = qkv[:, 2 * C:].astype(jnp.bfloat16).reshape(N, H, hd)

    # ---- fused multi-head attention: one batched matmul + one softmax -------
    logits = jnp.einsum("nhd,mhd->hnm", q, k,
                        preferred_element_type=jnp.float32)      # (H, N, N) f32
    m = jnp.max(logits, axis=-1, keepdims=True)
    e = jnp.exp(logits - m)                                      # f32 (v5e-safe)
    l = jnp.sum(e, axis=-1, keepdims=True)
    attn = e * (1.0 / l)                                         # exact softmax

    ctx = jnp.einsum("hnm,mhd->nhd", attn.astype(jnp.bfloat16), v,
                     preferred_element_type=jnp.float32)         # (N, H, hd)
    ctx = ctx.reshape(N, C).astype(jnp.bfloat16)                 # head merge

    # ---- output projection + bias (K = C, lane-dense) ----------------------
    out = jnp.dot(ctx, wproj_ref[...], preferred_element_type=jnp.float32)
    o_ref[...] = (out + bproj_ref[...]).astype(o_ref.dtype)


# -----------------------------------------------------------------------------
# One-time parameter prep: fold the softmax scale into the Q columns of wqkv
# and cast the matmul weights to bf16 (halves weight DMA, removes in-kernel
# casts).  bproj stays f32 (added after the f32 accumulation).
# -----------------------------------------------------------------------------
def prepare_kernel_params(params, num_heads, qk_scale=None):
    wqkv = params["wqkv"]
    C = wqkv.shape[0]
    hd = C // num_heads
    scale = float(qk_scale) if qk_scale is not None else hd ** (-0.5)
    wqkv = wqkv.at[:, :C].multiply(scale)
    return {
        "wqkv": wqkv.astype(jnp.bfloat16),
        "wproj": params["wproj"].astype(jnp.bfloat16),
        "bproj": params["bproj"],
    }


# -----------------------------------------------------------------------------
# Wrapper: grid over batch, weights resident (constant index_map).
# -----------------------------------------------------------------------------
def attention_pallas(x, kparams, num_heads):
    B, N, C = x.shape
    assert C % num_heads == 0
    kernel = partial(_attention_kernel, num_heads=num_heads)

    grid_spec = pltpu.PrefetchScalarGridSpec(
        num_scalar_prefetch=0,
        grid=(B,),
        in_specs=[
            pl.BlockSpec((None, N, C), lambda b: (b, 0, 0)),    # x  -> (N, C)
            pl.BlockSpec((C, 3 * C), lambda b: (0, 0)),          # wqkv resident
            pl.BlockSpec((C, C), lambda b: (0, 0)),              # wproj resident
            pl.BlockSpec((1, C), lambda b: (0, 0)),              # bproj resident
        ],
        out_specs=pl.BlockSpec((None, N, C), lambda b: (b, 0, 0)),
    )
    return pl.pallas_call(
        kernel,
        out_shape=jax.ShapeDtypeStruct((B, N, C), x.dtype),
        grid_spec=grid_spec,
        compiler_params=pltpu.CompilerParams(
            dimension_semantics=("parallel",)),   # shards batch over TCs on v7x
    )(x, kparams["wqkv"], kparams["wproj"], kparams["bproj"])


# -----------------------------------------------------------------------------
# Deterministic parameter init (f32, PyTorch-layout-equivalent kernels).
#   qkv : Linear(C, 3C, bias=False) -> kernel layout (C, 3C)  (= weight.T)
#   proj: Linear(C, C)              -> kernel (C, C), bias (1, C)
# -----------------------------------------------------------------------------
def init_params(key, dim):
    k1, k2, k3 = jax.random.split(key, 3)
    wqkv = jax.random.normal(k1, (dim, 3 * dim), jnp.float32) / math.sqrt(dim)
    wproj = jax.random.normal(k2, (dim, dim), jnp.float32) / math.sqrt(dim)
    bproj = 0.02 * jax.random.normal(k3, (1, dim), jnp.float32)
    return {"wqkv": wqkv, "wproj": wproj, "bproj": bproj}


# -----------------------------------------------------------------------------
# Pure-JAX reference (HIGHEST precision; mirrors the PyTorch forward).
# -----------------------------------------------------------------------------
def attention_ref(x, params, num_heads, qk_scale=None):
    B, N, C = x.shape
    hd = C // num_heads
    scale = qk_scale if qk_scale is not None else hd ** (-0.5)
    hi = jax.lax.Precision.HIGHEST

    qkv = jnp.einsum("bnc,cd->bnd", x, params["wqkv"], precision=hi)
    qkv = qkv.reshape(B, N, 3, num_heads, hd).transpose(2, 0, 3, 1, 4)
    q, k, v = qkv[0], qkv[1], qkv[2]

    attn = jnp.einsum("bhnd,bhmd->bhnm", q, k, precision=hi) * scale
    attn = jax.nn.softmax(attn, axis=-1)
    ctx = jnp.einsum("bhnm,bhmd->bhnd", attn, v, precision=hi)
    ctx = ctx.transpose(0, 2, 1, 3).reshape(B, N, C)

    return jnp.einsum("bnc,cd->bnd", ctx, params["wproj"],
                      precision=hi) + params["bproj"]


if __name__ == "__main__":
    B = 2
    N = 64          # tokens
    DIM = 128       # embedding dim (lane-dense)
    HEADS = 8       # -> head_dim = 16

    key = jax.random.PRNGKey(0)
    kx, kp = jax.random.split(key)
    x = jax.random.normal(kx, (B, N, DIM), jnp.float32)
    params = init_params(kp, DIM)
    kparams = prepare_kernel_params(params, HEADS)   # one-time bf16 + scale fold

    out = attention_pallas(x, kparams, HEADS)
    out = jax.block_until_ready(out)

    ref = attention_ref(x, params, HEADS)
    err = float(jnp.max(jnp.abs(out - ref) / (1.0 + jnp.abs(ref))))
    if not (out.shape == (B, N, DIM) and err < 4e-2):
        raise RuntimeError(f"mismatch: shape={out.shape}, rel_err={err}")

    print("KERNEL_OK")
</pallas_src>

<mosaic_0001>
module attributes {stable_mosaic.version = 11 : i64} {
  func.func @_attention_kernel(%arg0: i32, %arg1: memref<1x64x128xf32, #tpu.memory_space<vmem>>, %arg2: memref<128x384xbf16, #tpu.memory_space<vmem>>, %arg3: memref<128x128xbf16, #tpu.memory_space<vmem>>, %arg4: memref<1x128xf32, #tpu.memory_space<vmem>>, %arg5: memref<1x64x128xf32, #tpu.memory_space<vmem>>) attributes {dimension_semantics = [#tpu.dimension_semantics<parallel>], iteration_bounds = array<i64: 2>, scalar_prefetch = 0 : i64, scratch_operands = 0 : i64, tpu.core_type = #tpu.core_type<tc>, window_params = [{transform_indices = @transform_0, window_bounds = array<i64: 1, 64, 128>}, {pipeline_mode = #tpu.pipeline_mode<synchronous>, transform_indices = @transform_1, window_bounds = array<i64: 128, 384>}, {pipeline_mode = #tpu.pipeline_mode<synchronous>, transform_indices = @transform_2, window_bounds = array<i64: 128, 128>}, {pipeline_mode = #tpu.pipeline_mode<synchronous>, transform_indices = @transform_3, window_bounds = array<i64: 1, 128>}, {transform_indices = @transform_4, window_bounds = array<i64: 1, 64, 128>}]} {
    %c0 = arith.constant 0 : index
    %c0_0 = arith.constant 0 : index
    %c0_1 = arith.constant 0 : index
    %0 = vector.load %arg1[%c0, %c0_0, %c0_1] : memref<1x64x128xf32, #tpu.memory_space<vmem>>, vector<1x64x128xf32>
    %1 = vector.shape_cast %0 : vector<1x64x128xf32> to vector<64x128xf32>
    %2 = arith.truncf %1 : vector<64x128xf32> to vector<64x128xbf16>
    %c0_2 = arith.constant 0 : index
    %c0_3 = arith.constant 0 : index
    %3 = vector.load %arg2[%c0_2, %c0_3] : memref<128x384xbf16, #tpu.memory_space<vmem>>, vector<128x384xbf16>
    %cst = arith.constant dense<0.000000e+00> : vector<64x384xf32>
    %4 = tpu.matmul %2, %3, %cst {dimension_numbers = #tpu.dot_dimension_numbers<[1], [0], [0], [1], [0, 0, 1, 1], [], []>} : vector<64x128xbf16>, vector<128x384xbf16>, vector<64x384xf32> -> vector<64x384xf32>
    %5 = vector.extract_strided_slice %4 {offsets = [0, 0], sizes = [64, 128], strides = [1, 1]} : vector<64x384xf32> to vector<64x128xf32>
    %6 = arith.truncf %5 : vector<64x128xf32> to vector<64x128xbf16>
    %7 = vector.shape_cast %6 : vector<64x128xbf16> to vector<64x8x16xbf16>
    %8 = vector.extract_strided_slice %4 {offsets = [0, 128], sizes = [64, 128], strides = [1, 1]} : vector<64x384xf32> to vector<64x128xf32>
    %9 = arith.truncf %8 : vector<64x128xf32> to vector<64x128xbf16>
    %10 = vector.shape_cast %9 : vector<64x128xbf16> to vector<64x8x16xbf16>
    %11 = vector.extract_strided_slice %4 {offsets = [0, 256], sizes = [64, 128], strides = [1, 1]} : vector<64x384xf32> to vector<64x128xf32>
    %12 = arith.truncf %11 : vector<64x128xf32> to vector<64x128xbf16>
    %13 = vector.shape_cast %12 : vector<64x128xbf16> to vector<64x8x16xbf16>
    "tpu.trace_start"() <{level = 10 : i32, message = "nhd,mhd->hnm"}> : () -> ()
    %cst_4 = arith.constant dense<0.000000e+00> : vector<8x64x64xf32>
    %14 = tpu.matmul %7, %10, %cst_4 {dimension_numbers = #tpu.dot_dimension_numbers<[2], [2], [0], [0], [0, 1, 0, 0, 1, 0], [1], [1]>} : vector<64x8x16xbf16>, vector<64x8x16xbf16>, vector<8x64x64xf32> -> vector<8x64x64xf32>
    "tpu.trace_stop"() : () -> ()
    %cst_5 = arith.constant dense<0xFF800000> : vector<8x64xf32>
    %15 = vector.multi_reduction <maximumf>, %14, %cst_5 [2] : vector<8x64x64xf32> to vector<8x64xf32>
    %16 = vector.shape_cast %15 : vector<8x64xf32> to vector<8x64x1xf32>
    %17 = vector.broadcast %16 : vector<8x64x1xf32> to vector<8x64x64xf32>
    %18 = arith.subf %14, %17 : vector<8x64x64xf32>
    %19 = math.exp %18 : vector<8x64x64xf32>
    %cst_6 = arith.constant dense<0.000000e+00> : vector<8x64xf32>
    %20 = vector.multi_reduction <add>, %19, %cst_6 [2] : vector<8x64x64xf32> to vector<8x64xf32>
    %21 = vector.shape_cast %20 : vector<8x64xf32> to vector<8x64x1xf32>
    %cst_7 = arith.constant 1.000000e+00 : f32
    %22 = vector.broadcast %cst_7 : f32 to vector<8x64x1xf32>
    %23 = arith.divf %22, %21 : vector<8x64x1xf32>
    %24 = vector.broadcast %23 : vector<8x64x1xf32> to vector<8x64x64xf32>
    %25 = arith.mulf %19, %24 : vector<8x64x64xf32>
    %26 = arith.truncf %25 : vector<8x64x64xf32> to vector<8x64x64xbf16>
    "tpu.trace_start"() <{level = 10 : i32, message = "hnm,mhd->nhd"}> : () -> ()
    %cst_8 = arith.constant dense<0.000000e+00> : vector<8x16x64xf32>
    %27 = tpu.matmul %13, %26, %cst_8 {dimension_numbers = #tpu.dot_dimension_numbers<[0], [2], [2], [1], [0, 1, 0, 2, 1, 1], [1], [0]>} : vector<64x8x16xbf16>, vector<8x64x64xbf16>, vector<8x16x64xf32> -> vector<8x16x64xf32>
    %28 = tpu.transpose %27, [2, 0, 1] : vector<8x16x64xf32> -> vector<64x8x16xf32>
    "tpu.trace_stop"() : () -> ()
    %29 = vector.shape_cast %28 : vector<64x8x16xf32> to vector<64x128xf32>
    %30 = arith.truncf %29 : vector<64x128xf32> to vector<64x128xbf16>
    %c0_9 = arith.constant 0 : index
    %c0_10 = arith.constant 0 : index
    %31 = vector.load %arg3[%c0_9, %c0_10] : memref<128x128xbf16, #tpu.memory_space<vmem>>, vector<128x128xbf16>
    %cst_11 = arith.constant dense<0.000000e+00> : vector<64x128xf32>
    %32 = tpu.matmul %30, %31, %cst_11 {dimension_numbers = #tpu.dot_dimension_numbers<[1], [0], [0], [1], [0, 0, 1, 1], [], []>} : vector<64x128xbf16>, vector<128x128xbf16>, vector<64x128xf32> -> vector<64x128xf32>
    %c0_12 = arith.constant 0 : index
    %c0_13 = arith.constant 0 : index
    %33 = vector.load %arg4[%c0_12, %c0_13] : memref<1x128xf32, #tpu.memory_space<vmem>>, vector<1x128xf32>
    %34 = vector.broadcast %33 : vector<1x128xf32> to vector<64x128xf32>
    %35 = arith.addf %32, %34 : vector<64x128xf32>
    %c0_14 = arith.constant 0 : index
    %c0_15 = arith.constant 0 : index
    %c0_16 = arith.constant 0 : index
    %36 = vector.load %arg5[%c0_14, %c0_15, %c0_16] : memref<1x64x128xf32, #tpu.memory_space<vmem>>, vector<1x64x128xf32>
    %37 = vector.shape_cast %36 : vector<1x64x128xf32> to vector<64x128xf32>
    %38 = vector.shape_cast %35 : vector<64x128xf32> to vector<1x64x128xf32>
    tpu.vector_store %arg5[%c0_14, %c0_15, %c0_16], %38 {strides = array<i32>} : memref<1x64x128xf32, #tpu.memory_space<vmem>>, vector<1x64x128xf32>,
    return
  }
  func.func @transform_0(%arg0: i32) -> (i32, i32, i32) {
    %c0_i32 = arith.constant 0 : i32
    %c0_i32_0 = arith.constant 0 : i32
    %c0_i32_1 = arith.constant 0 : i32
    return %arg0, %c0_i32, %c0_i32_0 : i32, i32, i32
  }
  func.func @transform_1(%arg0: i32) -> (i32, i32) {
    %c0_i32 = arith.constant 0 : i32
    %c0_i32_0 = arith.constant 0 : i32
    %c0_i32_1 = arith.constant 0 : i32
    return %c0_i32, %c0_i32_0 : i32, i32
  }
  func.func @transform_2(%arg0: i32) -> (i32, i32) {
    %c0_i32 = arith.constant 0 : i32
    %c0_i32_0 = arith.constant 0 : i32
    %c0_i32_1 = arith.constant 0 : i32
    return %c0_i32, %c0_i32_0 : i32, i32
  }
  func.func @transform_3(%arg0: i32) -> (i32, i32) {
    %c0_i32 = arith.constant 0 : i32
    %c0_i32_0 = arith.constant 0 : i32
    %c0_i32_1 = arith.constant 0 : i32
    return %c0_i32, %c0_i32_0 : i32, i32
  }
  func.func @transform_4(%arg0: i32) -> (i32, i32, i32) {
    %c0_i32 = arith.constant 0 : i32
    %c0_i32_0 = arith.constant 0 : i32
    %c0_i32_1 = arith.constant 0 : i32
    return %arg0, %c0_i32, %c0_i32_0 : i32, i32, i32
  }
}

</mosaic_0001>

<bundles_post_ra>
// kernel: tpu_custom_call.1
= control target key start
LH: loop header
LB: loop body
LE: loop exit
PB: predicated region body
PF: predicated region fallthrough
CT: control target
= control target key end

     0   :  { %9 = vsyncpa [#allocation3], 0  ;;  %s9433_s0 = inlined_call_operand.hbm [shape: f32[2,64,128], index: 0, kind: input, shape index: {}]   ;;  %s9434_s1 = inlined_call_operand.hbm [shape: bf16[128,384], index: 1, kind: input, shape index: {}]   ;;  %s9435_s2 = inlined_call_operand.hbm [shape: bf16[128,128], index: 2, kind: input, shape index: {}]   ;;  %s9436_s3 = inlined_call_operand.vmem [shape: f32[1,128], index: 3, kind: input, shape index: {}]   ;;  %s9437_s4 = inlined_call_operand.hbm [shape: f32[2,64,128], index: 4, kind: output, shape index: {}]  }
   0x1   :  { %11 = vsyncpa [#allocation3 + $0x1], 0 }
   0x2   :  { %12 = vsyncpa [#allocation6], 0 }
   0x3   :  { %13 = vsyncpa [#allocation4], 0 }
   0x4   :  { %15 = vsyncpa [#allocation4 + $0x1], 0  ;;  %s7112_s15 = smov 0   ;;  %s7114_s16 = smov 0  }
   0x5   :  { %s7116_s17 = smov 0   ;;  %s7118_s18 = smov 0  }
   0x6 LB: > { %s7133_s19 = sadd.s32 4294967295, %s7061_s18   ;;  %s5897_s20 = sadd.s32 4294967294, %s7061_s18   ;;  %s7061_s18 = sphi %s7118_s18, %s9610_s18   ;;  %s7057_s17 = sphi %s7116_s17, %s9609_s17   ;;  %s7053_s16 = sphi %s7114_s16, %s9608_s16   ;;  %s7049_s15 = sphi %s7112_s15, %s9607_s15  }
   0x7   : > { %p41_p0 = scmp.ne.s32.totalorder %s7053_s16, %s7049_s15  ;;  %p9438_p1 = scmp.eq.s32.totalorder %s7133_s19, 0 }
   0x8   : > { %p134_p3 = scmp.eq.s32.totalorder %s5897_s20, 1  ;;  %p5898_p5 = scmp.ge.s32.totalorder %s7061_s18, 1 }
   0x9   : > { %p7142_p4 = por %p9438_p1, %p41_p0  ;;  %p141_p7 = scmp.lt.s32.totalorder %s7061_s18, 3 }
   0xa   : > { %p7147_p6 = por %p134_p3, %p41_p0  ;;  %s7063_s24 = smov [#allocation5]  }
   0xb   : > { %s9480_s21 = scalar_select %p7142_p4, 1, 0 }
   0xc   : > { %s9481_s22 = scalar_select %p7147_p6, 1, 0 }
   0xd   : > { %p7152_p8 = pnand %p5898_p5, %p141_p7  ;;  %s153_s25 = sshll.u32 %s7063_s24, 4  ;;  %s7156_s25 = int_to_ptr.vmem [resolvable:$true] %s153_s25 }
   0xe   : > { %s7064_s27 = smov [#allocation7]   ;;  %s6905_s5 = scalar_lea.hbm %s9434_s1, 3072 }
   0xf   : > { %p6394_p9 = pneg %p7152_p8  ;;  %s166_s28 = sshll.u32 %s7064_s27, 4  ;;  %s7167_s28 = int_to_ptr.vmem [resolvable:$true] %s166_s28 }
  0x10   : > { %p6906_p12 = scmp.ne.s32.totalorder %s9434_s1, %s6905_s5  ;;  %p6912_p5 = scmp.lt.u32.totalorder %s6905_s5, %s9434_s1 }
  0x11   : > { %p7163_p11 = pnand %p6394_p9, %p9438_p1 }
  0x13   : > { %p6907_p13 = pneg %p7163_p11 }
  0x15   : > { %p6908_p0 = pnand %p6907_p13, %p6906_p12 }
  0x17   : > { %p6909_p3 = pneg %p6908_p0 }
  0x19   : > { %p6914_p7 = pnand %p6912_p5, %p6909_p3 }
  0x1b   : > { %6917 = shalt.err (!%p6914_p7)
}
  0x1c   : > { %s6918_s10 = scalar_lea.vmem %s7156_s25, 3072  ;;  %p6926_p2 = scmp.lt.s32.totalorder %s7156_s25, %s7156_s25 }
  0x1d   : > { %p6919_p9 = scmp.ne.s32.totalorder %s7156_s25, %s6918_s10  ;;  %p6927_p12 = scmp.lt.s32.totalorder %s6918_s10, %s6918_s10 }
  0x1f   : > { %p6921_p10 = pnand %p6919_p9, %p6907_p13  ;;  %p6928_p0 = por %p6927_p12, %p6926_p2 }
  0x21   : > { %p6922_p1 = pneg %p6921_p10 }
  0x23   : > { %p6929_p6 = pnand %p6928_p0, %p6922_p1 }
  0x25   : > { %6932 = shalt.err (!%p6929_p6)
}
  0x26   : > { %s7065_s11 = smov 192   ;;  %s7066_s12 = smov 12  }
  0x27   : > { %6397 = dma.hbm_to_vmem [thread:$0]  (!%p7163_p11), %s9434_s1, 3072, %s7156_s25, [#allocation6], %s7065_s11, %s7065_s11, %s7066_s12  }
  0x28   : > { %s6933_s27 = scalar_lea.hbm %s9435_s2, 1024 }
  0x29   : > { %p6934_p2 = scmp.ne.s32.totalorder %s9435_s2, %s6933_s27  ;;  %p6940_p10 = scmp.lt.u32.totalorder %s6933_s27, %s9435_s2 }
  0x2b   : > { %p6936_p1 = pnand %p6934_p2, %p6907_p13 }
  0x2d   : > { %p6937_p6 = pneg %p6936_p1 }
  0x2f   : > { %p6942_p3 = pnand %p6940_p10, %p6937_p6 }
  0x31   : > { %6945 = shalt.err (!%p6942_p3)
}
  0x32   : > { %s6946_s25 = scalar_lea.vmem %s7167_s28, 1024  ;;  %p6954_p12 = scmp.lt.s32.totalorder %s7167_s28, %s7167_s28 }
  0x33   : > { %p6947_p5 = scmp.ne.s32.totalorder %s7167_s28, %s6946_s25  ;;  %p6955_p0 = scmp.lt.s32.totalorder %s6946_s25, %s6946_s25 }
  0x35   : > { %p6949_p7 = pnand %p6947_p5, %p6907_p13  ;;  %p6956_p2 = por %p6955_p0, %p6954_p12 }
  0x37   : > { %p6950_p9 = pneg %p6949_p7 }
  0x39   : > { %p6957_p1 = pnand %p6956_p2, %p6950_p9 }
  0x3b   : > { %6960 = shalt.err (!%p6957_p1)
}
  0x3c   : > { %s7067_s7 = smov 64   ;;  %s7068_s8 = smov 4  }
  0x3d   : > { %6400 = dma.hbm_to_vmem [thread:$0]  (!%p7163_p11), %s9435_s2, 1024, %s7167_s28, [#allocation6], %s7067_s7, %s7067_s7, %s7068_s8  }
  0x3e   : > { %s7222_s11 = sadd.s32 1, %s7061_s18   ;;  %s28_s13 = sadd.s32 1, %s7057_s17 }
  0x3f   : > { %s25_s12 = ssub.s32 %s7061_s18, %s7222_s11  ;;  %p35_p6 = scmp.ne.s32.totalorder %s7057_s17, %s7053_s16 }
  0x40   : > { %p26_p13 = scmp.eq.s32.totalorder %s25_s12, 0  ;;  %p36_p10 = scmp.eq.s32.totalorder %s7061_s18, 0 }
  0x41   : > { %p9484_p5 = scmp.eq.s32.totalorder %s7133_s19, 1  ;;  %p6411_p9 = scmp.lt.s32.totalorder %s7061_s18, 2 }
  0x42   : > { %s7231_s14 = scalar_select %p26_p13, %s7057_s17, %s28_s13  }
  0x43   : > { %p37_p3 = por %p36_p10, %p35_p6  ;;  %p7235_p7 = por %p9484_p5, %p35_p6 }
  0x44   : > { %s183_s26 = sand.u32 1, %s7057_s17   ;;  %s6052_s28 = sshll.u32 %s7061_s18, 10 }
  0x45   : > { %s9485_s20 = scalar_select %p7235_p7, 1, 0 }
  0x46   : > { %s5902_s24 = sshll.u32 %s183_s26, 6  ;;  %s7245_s30 = scalar_lea.hbm %s9433_s0, %s6052_s28 }
  0x47   : > { %s187_s5 = scalar_lea.vmem [#allocation2], %s5902_s24  ;;  %p7249_p11 = pnand %p6411_p9, %p37_p3 }
  0x48   : > { %s194_s6 = sshll.u32 %s187_s5, 4  ;;  %s7253_s7 = scalar_lea.sflag [#allocation3], %s183_s26  ;;  %s7247_s6 = int_to_ptr.vmem [resolvable:$true] %s194_s6 }
  0x49   : > { %s6961_s8 = scalar_lea.hbm %s7245_s30, 1024  ;;  %p6963_p0 = pneg %p7249_p11 }
  0x4a   : > { %p6962_p12 = scmp.ne.s32.totalorder %s7245_s30, %s6961_s8  ;;  %s6966_s12 = scalar_lea.hbm %s9433_s0, 2048 }
  0x4b   : > { %p6967_p13 = scmp.lt.u32.totalorder %s7245_s30, %s9433_s0  ;;  %p6968_p6 = scmp.lt.u32.totalorder %s6966_s12, %s6961_s8 }
  0x4c   : > { %p6964_p2 = pnand %p6963_p0, %p6962_p12  ;;  %p6970_p3 = scmp.lt.u32.totalorder %s6961_s8, %s7245_s30 }
  0x4d   : > { %p6969_p10 = por %p6968_p6, %p6967_p13 }
  0x4e   : > { %p6965_p1 = pneg %p6964_p2 }
  0x4f   : > { %p6971_p5 = por %p6970_p3, %p6969_p10 }
  0x51   : > { %p6972_p9 = pnand %p6971_p5, %p6965_p1 }
  0x53   : > { %6975 = shalt.err (!%p6972_p9)
}
  0x54   : > { %s6976_s26 = scalar_lea.vmem %s7247_s6, 1024  ;;  %s7069_s28 = smov [#allocation2]  }
  0x55   : > { %p6977_p12 = scmp.ne.s32.totalorder %s7247_s6, %s6976_s26  ;;  %s6981_s27 = sshll.u32 %s7069_s28, 4  ;;  %s6982_s27 = int_to_ptr.vmem [resolvable:$false] %s6981_s27 }
  0x56   : > { %s6983_s29 = scalar_lea.vmem %s6982_s27, 2048  ;;  %p6984_p4 = scmp.lt.s32.totalorder %s7247_s6, %s6982_s27 }
  0x57   : > { %p6979_p2 = pnand %p6977_p12, %p6963_p0  ;;  %p6985_p13 = scmp.lt.s32.totalorder %s6983_s29, %s6976_s26 }
  0x59   : > { %p6980_p7 = pneg %p6979_p2  ;;  %p6986_p6 = por %p6985_p13, %p6984_p4 }
  0x5b   : > { %p6987_p10 = pnand %p6986_p6, %p6980_p7 }
  0x5d   : > { %6990 = shalt.err (!%p6987_p10)
}
  0x5e   : > { %s7070_s5 = smov 128   ;;  %s7071_s8 = smov 8  }
  0x5f   : > { %6404 = dma.hbm_to_vmem [thread:$0]  (!%p7249_p11), %s7245_s30, 1024, %s7247_s6, %s7253_s7, %s7070_s5, %s7070_s5, %s7071_s8  }
  0x60   : > { %206 = sbr.rel (%p7152_p8) target bundleno = 2214 (0x8a6), region = 36 }
  0x67   : > { %s7284_s9 = sand.u32 1, %s7053_s16   ;;  %p9487_p4 = scmp.ne.s32.totalorder %s9480_s21, 0 }
  0x68   : > { %s5906_s10 = sshll.u32 %s7284_s9, 6  ;;  %s209_s12 = scalar_lea.sflag [#allocation3], %s7284_s9 }
  0x69   : > { %s7290_s13 = scalar_lea.vmem [#allocation2], %s5906_s10 }
  0x6a   : > { %7036 = dma.done.wait (%p9487_p4), %s209_s12, 1024  }
  0x6b   : > { %7038 = vsyncadd (%p9487_p4), %s209_s12, 4294966272  ;;  %p9488_p7 = scmp.eq.s32.totalorder %s7133_s19, 0 }
  0x6d   : > { %7040 = dma.done.wait (%p9488_p7), [#allocation6], 4096   ;;  %p9489_p8 = pmov %p9488_p7 }
  0x6e   : > { %v7072_v0 = vmov 0   ;;  %v6609_v1 = vld [vmem:[#allocation5 + $0x4] ss:$12 sps:$4 sm:$0xff]   ;;  %v6611_v2 = vld [vmem:[#allocation5] ss:$12 sps:$4 sm:$0xff]   ;;  %v249_v23 = vld [vmem:[%s7290_s13 + $0x18] sm:$0xff] }
  0x6f   : > { %7042 = vsyncadd (%p9489_p8), [#allocation6], 4294963200  ;;  %450 = vmatprep.mubr.bf16.mxu0 %v7072_v0  ;;  %418 = vmatprep.subr.bf16.mxu0 %v6609_v1  ;;  %v6612_v3 = vld [vmem:[#allocation5 + $0x1c] ss:$12 sps:$4 sm:$0xff]   ;;  %v6614_v4 = vld [vmem:[#allocation5 + $0x18] ss:$12 sps:$4 sm:$0xff]  }
  0x70   : > { %419 = vmatpush1.bf16.msra.mxu0 %v6611_v2  ;;  %v6615_v5 = vld [vmem:[#allocation5 + $0x34] ss:$12 sps:$4 sm:$0xff]   ;;  %v6617_v6 = vld [vmem:[#allocation5 + $0x30] ss:$12 sps:$4 sm:$0xff]   ;;  %v6618_v7 = vld [vmem:[#allocation5 + $0x4c] ss:$12 sps:$4 sm:$0xff]  }
  0x71   : > { %420 = vmatprep.subr.bf16.mxu0 %v6612_v3  ;;  %v6620_v8 = vld [vmem:[#allocation5 + $0x48] ss:$12 sps:$4 sm:$0xff]   ;;  %v6621_v9 = vld [vmem:[#allocation5 + $0x64] ss:$12 sps:$4 sm:$0xff]   ;;  %v6623_v10 = vld [vmem:[#allocation5 + $0x60] ss:$12 sps:$4 sm:$0xff]  }
  0x72   : > { %v6624_v11 = vld [vmem:[#allocation5 + $0x7c] ss:$12 sps:$4 sm:$0xff]   ;;  %v6626_v12 = vld [vmem:[#allocation5 + $0x78] ss:$12 sps:$4 sm:$0xff]   ;;  %v6627_v13 = vld [vmem:[#allocation5 + $0x94] ss:$12 sps:$4 sm:$0xff]  }
  0x73   : > { %v6629_v14 = vld [vmem:[#allocation5 + $0x90] ss:$12 sps:$4 sm:$0xff]   ;;  %v6630_v15 = vld [vmem:[#allocation5 + $0xac] ss:$12 sps:$4 sm:$0xff]   ;;  %v6632_v16 = vld [vmem:[#allocation5 + $0xa8] ss:$12 sps:$4 sm:$0xff]  }
  0x74   : > { %421 = vmatpush1.bf16.msra.mxu0 %v6614_v4  ;;  %v246_v17 = vld [vmem:[%s7290_s13] sm:$0xff]  ;;  %v247_v18 = vld [vmem:[%s7290_s13 + $0x8] sm:$0xff]  ;;  %v248_v22 = vld [vmem:[%s7290_s13 + $0x10] sm:$0xff]  ;;  %vm932_vm0 = vcmask 130048   ;;  %s7073_s21 = smov 80   ;;  %s7074_s23 = smov 112  }
  0x75   : > { %422 = vmatprep.subr.bf16.mxu0 %v6615_v5  ;;  %v6633_v19 = vld [vmem:[#allocation5 + $0x8] ss:$12 sps:$4 sm:$0xff]   ;;  %v254_v20 = vpack.c.bf16 %v247_v18, %v246_v17  ;;  %v6634_v21 = vld [vmem:[#allocation5 + $0x20] ss:$12 sps:$4 sm:$0xff]   ;;  %v6635_v24 = vld [vmem:[#allocation5 + $0x38] ss:$12 sps:$4 sm:$0xff]   ;;  %v255_v25 = vpack.c.bf16 %v249_v23, %v248_v22 }
  0x76   : > { %v6636_v26 = vld [vmem:[#allocation5 + $0x50] ss:$12 sps:$4 sm:$0xff]   ;;  %v250_v27 = vld [vmem:[%s7290_s13 + $0x20] sm:$0xff]  ;;  %v251_v28 = vld [vmem:[%s7290_s13 + $0x28] sm:$0xff]  ;;  %s7075_s30 = smov 48   ;;  %s7076_s6 = smov 96  }
  0x77   : > { %v6637_v29 = vld [vmem:[#allocation5 + $0x68] ss:$12 sps:$4 sm:$0xff]   ;;  %v256_v30 = vpack.c.bf16 %v251_v28, %v250_v27  ;;  %v6638_v31 = vld [vmem:[#allocation5 + $0x80] ss:$12 sps:$4 sm:$0xff]   ;;  %v253_v33 = vld [vmem:[%s7290_s13 + $0x38] sm:$0xff]  ;;  %s7077_s25 = smov 16  }
  0x78   : > { %423 = vmatpush1.bf16.msra.mxu0 %v6617_v6  ;;  %v252_v32 = vld [vmem:[%s7290_s13 + $0x30] sm:$0xff]  ;;  %v6639_v34 = vld [vmem:[#allocation5 + $0x98] ss:$12 sps:$4 sm:$0xff]   ;;  %s7078_s7 = smov 64   ;;  %s7079_s24 = smov 32   ;;  %vm1549_vm1 = vcmask 523264  }
  0x79   : > { %424 = vmatprep.subr.bf16.mxu0 %v6618_v7  ;;  %v257_v35 = vpack.c.bf16 %v253_v33, %v252_v32  ;;  %v6640_v36 = vld [vmem:[#allocation5 + $0xb0] ss:$12 sps:$4 sm:$0xff]   ;;  %vm7081_vm2 = vmmov 0   ;;  %vm5590_vm3 = vcmask 261120   ;;  %vm5599_vm4 = vcmask 392192   ;;  %s244_s27 = scalar_lea.vmem [#allocation8], %s5906_s10 }
  0x7a   : > { %vm5616_vm5 = vcmask 654336   ;;  %vm5625_vm6 = vcmask 785408   ;;  %vm5634_vm7 = vcmask 916480   ;;  %s5805_s29 = sshll.u32 %s244_s27, 4  ;;  %s6053_s5 = sshll.u32 %s7133_s19, 10  ;;  %s9384_s29 = int_to_ptr.vmem [resolvable:$true] %s5805_s29 }
  0x7b   : > { %s9389_s12 = scalar_lea.hbm %s9437_s4, %s6053_s5  ;;  %s5792_s19 = scalar_lea.sflag [#allocation4], %s7284_s9 }
  0x7c   : > { %425 = vmatpush1.bf16.msra.mxu0 %v6620_v8  ;;  %s6991_s13 = scalar_lea.vmem %s9384_s29, 1024  ;;  %p9604_p0 = scmp.ne.s32.totalorder %s9485_s20, 0 }
  0x7d   : > { %426 = vmatprep.subr.bf16.mxu0 %v6621_v9  ;;  %p6992_p11 = scmp.ne.s32.totalorder %s9384_s29, %s6991_s13 }
  0x7f   : > { %p6993_p1 = pnand %p6992_p11, %p9604_p0 }
  0x80   : > { %427 = vmatpush1.bf16.msra.mxu0 %v6623_v10 }
  0x81   : > { %428 = vmatprep.subr.bf16.mxu0 %v6624_v11  ;;  %p6994_p3 = pneg %p6993_p1 }
  0x84   : > { %429 = vmatpush1.bf16.msra.mxu0 %v6626_v12 }
  0x85   : > { %430 = vmatprep.subr.bf16.mxu0 %v6627_v13 }
  0x88   : > { %431 = vmatpush1.bf16.msra.mxu0 %v6629_v14 }
  0x89   : > { %432 = vmatprep.subr.bf16.mxu0 %v6630_v15 }
  0x8c   : > { %433 = vmatpush1.bf16.msra.mxu0 %v6632_v16 }
  0x8d   : > { %6158 = vmatprep.subr.bf16.mxu0 %v6633_v19 }
  0x8f   : > { %451 = vmatmul.mubr.bf16.vlgmr.msra.gmra.mrb[0].mxu0 %v254_v20 }
  0x90   : > { %460 = vmatprep.mubr.bf16.mxu0 %v7072_v0  ;;  %6159 = vmatpush3.bf16.msra.mxu0 %v6633_v19 }
  0x91   : > { %6160 = vmatprep.subr.bf16.mxu0 %v6634_v21 }
  0x94   : > { %6161 = vmatpush3.bf16.msra.mxu0 %v6634_v21 }
  0x95   : > { %6162 = vmatprep.subr.bf16.mxu0 %v6635_v24 }
  0x97   : > { %461 = vmatmul.mubr.bf16.gmra.mrb[4].mxu0 %v255_v25 }
  0x98   : > { %470 = vmatprep.mubr.bf16.mxu0 %v7072_v0  ;;  %6163 = vmatpush3.bf16.msra.mxu0 %v6635_v24 }
  0x99   : > { %6164 = vmatprep.subr.bf16.mxu0 %v6636_v26 }
  0x9c   : > { %6165 = vmatpush3.bf16.msra.mxu0 %v6636_v26 }
  0x9d   : > { %6166 = vmatprep.subr.bf16.mxu0 %v6637_v29 }
  0x9f   : > { %471 = vmatmul.mubr.bf16.gmra.mrb[8].mxu0 %v256_v30 }
  0xa0   : > { %480 = vmatprep.mubr.bf16.mxu0 %v7072_v0  ;;  %6167 = vmatpush3.bf16.msra.mxu0 %v6637_v29 }
  0xa1   : > { %6168 = vmatprep.subr.bf16.mxu0 %v6638_v31 }
  0xa4   : > { %6169 = vmatpush3.bf16.msra.mxu0 %v6638_v31 }
  0xa5   : > { %6170 = vmatprep.subr.bf16.mxu0 %v6639_v34 }
  0xa7   : > { %481 = vmatmul.mubr.bf16.gmra.mrb[12].mxu0 %v257_v35 }
  0xa8   : > { %6171 = vmatpush3.bf16.msra.mxu0 %v6639_v34  ;;  %6174 = vmatprep.mubr.bf16.mxu0 %v254_v20 }
  0xa9   : > { %6172 = vmatprep.subr.bf16.mxu0 %v6640_v36 }
  0xac   : > { %6173 = vmatpush3.bf16.msra.mxu0 %v6640_v36 }
  0xaf   : > { %6175 = vmatmul.mubr.bf16.vlgmr.msra.gmra.mrb[16].mxu0 %v255_v25 }
  0xb0   : > { %6178 = vmatprep.mubr.bf16.mxu0 %v256_v30 }
  0xb7   : > { %6179 = vmatmul.mubr.bf16.gmra.mrb[20].mxu0 %v257_v35 }
 0x162   : > { %v452_v37 = vpop.f32.mrb[0].mxu0 }
 0x163   : > { %v454_v38 = vpop.f32.mrb[1].mxu0 }
 0x164   : > { %v456_v39 = vpop.f32.mrb[2].mxu0 }
 0x165   : > { %v556_v40 = vpack.c.bf16 %v456_v39, %v452_v37  ;;  %v458_v41 = vpop.f32.mrb[3].mxu0 }
 0x166   : > { %v7308_v42 = vpack.c.bf16 %v458_v41, %v454_v38 }
 0x167   : > { %580 = vrot.lane.b32.xlu1 %v556_v40, %s7073_s21  ;;  %564 = vrot.lane.b32.xlu0 %v556_v40, %s7074_s23 }
 0x168   : > { %6184 = vmatprep.mubr.msk.bf16.mxu1 %vm932_vm0, %v556_v40 }
 0x16a   : > { %v462_v43 = vpop.f32.mrb[4].mxu0 }
 0x16b   : > { %596 = vrot.lane.b32.xlu1 %v556_v40, %s7075_s30  ;;  %572 = vrot.lane.b32.xlu0 %v556_v40, %s7076_s6  ;;  %v464_v44 = vpop.f32.mrb[5].mxu0 }
 0x16c   : > { %v466_v45 = vpop.f32.mrb[6].mxu0 }
 0x16d   : > { %v7315_v46 = vpack.c.bf16 %v466_v45, %v462_v43  ;;  %v468_v47 = vpop.f32.mrb[7].mxu0 }
 0x16e   : > { %v7317_v48 = vpack.c.bf16 %v468_v47, %v464_v44 }
 0x16f   : > { %612 = vrot.lane.b32.xlu1 %v556_v40, %s7077_s25  ;;  %588 = vrot.lane.b32.xlu0 %v556_v40, %s7078_s7 }
 0x172   : > { %v472_v49 = vpop.f32.mrb[8].mxu0 }
 0x173   : > { %604 = vrot.lane.b32.xlu0 %v556_v40, %s7079_s24  ;;  %652 = vrot.lane.b32.xlu1 %v7308_v42, %s7073_s21  ;;  %v474_v50 = vpop.f32.mrb[9].mxu0 }
 0x174   : > { %v476_v51 = vpop.f32.mrb[10].mxu0 }
 0x175   : > { %v7324_v52 = vpack.c.bf16 %v476_v51, %v472_v49  ;;  %v478_v53 = vpop.f32.mrb[11].mxu0 }
 0x176   : > { %v7326_v54 = vpack.c.bf16 %v478_v53, %v474_v50 }
 0x177   : > { %664 = vrot.lane.b32.xlu1 %v7308_v42, %s7078_s7  ;;  %628 = vrot.lane.b32.xlu0 %v7308_v42, %s7074_s23 }
 0x17a   : > { %v482_v55 = vpop.f32.mrb[12].mxu0 }
 0x17b   : > { %676 = vrot.lane.b32.xlu1 %v7308_v42, %s7075_s30  ;;  %640 = vrot.lane.b32.xlu0 %v7308_v42, %s7076_s6  ;;  %v484_v56 = vpop.f32.mrb[13].mxu0 }
 0x17c   : > { %v486_v57 = vpop.f32.mrb[14].mxu0 }
 0x17d   : > { %v7336_v58 = vpack.c.bf16 %v486_v57, %v482_v55  ;;  %v488_v59 = vpop.f32.mrb[15].mxu0 }
 0x17e   : > { %v7338_v60 = vpack.c.bf16 %v488_v59, %v484_v56 }
 0x17f   : > { %700 = vrot.lane.b32.xlu1 %v7308_v42, %s7077_s25  ;;  %688 = vrot.lane.b32.xlu0 %v7308_v42, %s7079_s24 }
 0x182   : > { %v6176_v61 = vpop.f32.mrb[16].mxu0 }
 0x183   : > { %574 = vrot.lane.b32.xlu0 %v7315_v46, %s7076_s6  ;;  %566 = vrot.lane.b32.xlu1 %v7315_v46, %s7074_s23  ;;  %v525_v62 = vpop.f32.mrb[17].mxu0 }
 0x184   : > { %v6177_v63 = vpop.f32.mrb[18].mxu0 }
 0x185   : > { %v7348_v0 = vpack.c.bf16 %v6177_v63, %v6176_v61  ;;  %v528_v1 = vpop.f32.mrb[19].mxu0 }
 0x186   : > { %v7350_v2 = vpack.c.bf16 %v528_v1, %v525_v62 }
 0x187   : > { %590 = vrot.lane.b32.xlu0 %v7315_v46, %s7078_s7  ;;  %582 = vrot.lane.b32.xlu1 %v7315_v46, %s7073_s21 }
 0x18a   : > { %v6180_v3 = vpop.f32.mrb[20].mxu0 }
 0x18b   : > { %606 = vrot.lane.b32.xlu0 %v7315_v46, %s7079_s24  ;;  %598 = vrot.lane.b32.xlu1 %v7315_v46, %s7075_s30  ;;  %v541_v4 = vpop.f32.mrb[21].mxu0 }
 0x18c   : > { %v6181_v5 = vpop.f32.mrb[22].mxu0 }
 0x18d   : > { %v7360_v6 = vpack.c.bf16 %v6181_v5, %v6180_v3  ;;  %v544_v7 = vpop.f32.mrb[23].mxu0 }
 0x18e   : > { %v7362_v8 = vpack.c.bf16 %v544_v7, %v541_v4 }
 0x18f   : > { %614 = vrot.lane.b32.xlu1 %v7315_v46, %s7077_s25  ;;  %630 = vrot.lane.b32.xlu0 %v7317_v48, %s7074_s23 }
 0x193   : > { %654 = vrot.lane.b32.xlu1 %v7317_v48, %s7073_s21  ;;  %642 = vrot.lane.b32.xlu0 %v7317_v48, %s7076_s6 }
 0x197   : > { %702 = vrot.lane.b32.xlu1 %v7317_v48, %s7077_s25  ;;  %666 = vrot.lane.b32.xlu0 %v7317_v48, %s7078_s7 }
 0x19b   : > { %678 = vrot.lane.b32.xlu0 %v7317_v48, %s7075_s30  ;;  %568 = vrot.lane.b32.xlu1 %v7324_v52, %s7074_s23 }
 0x19f   : > { %690 = vrot.lane.b32.xlu0 %v7317_v48, %s7079_s24  ;;  %584 = vrot.lane.b32.xlu1 %v7324_v52, %s7073_s21 }
 0x1a3   : > { %576 = vrot.lane.b32.xlu0 %v7324_v52, %s7076_s6  ;;  %600 = vrot.lane.b32.xlu1 %v7324_v52, %s7075_s30 }
 0x1a7   : > { %592 = vrot.lane.b32.xlu0 %v7324_v52, %s7078_s7  ;;  %616 = vrot.lane.b32.xlu1 %v7324_v52, %s7077_s25 }
 0x1ab   : > { %608 = vrot.lane.b32.xlu0 %v7324_v52, %s7079_s24  ;;  %632 = vrot.lane.b32.xlu1 %v7326_v54, %s7074_s23 }
 0x1af   : > { %644 = vrot.lane.b32.xlu0 %v7326_v54, %s7076_s6  ;;  %656 = vrot.lane.b32.xlu1 %v7326_v54, %s7073_s21 }
 0x1b3   : > { %668 = vrot.lane.b32.xlu0 %v7326_v54, %s7078_s7  ;;  %704 = vrot.lane.b32.xlu1 %v7326_v54, %s7077_s25 }
 0x1b7   : > { %680 = vrot.lane.b32.xlu0 %v7326_v54, %s7075_s30  ;;  %570 = vrot.lane.b32.xlu1 %v7336_v58, %s7074_s23 }
 0x1bb   : > { %692 = vrot.lane.b32.xlu0 %v7326_v54, %s7079_s24  ;;  %586 = vrot.lane.b32.xlu1 %v7336_v58, %s7073_s21 }
 0x1bf   : > { %578 = vrot.lane.b32.xlu0 %v7336_v58, %s7076_s6  ;;  %602 = vrot.lane.b32.xlu1 %v7336_v58, %s7075_s30 }
 0x1c3   : > { %594 = vrot.lane.b32.xlu0 %v7336_v58, %s7078_s7  ;;  %618 = vrot.lane.b32.xlu1 %v7336_v58, %s7077_s25 }
 0x1c7   : > { %610 = vrot.lane.b32.xlu0 %v7336_v58, %s7079_s24  ;;  %634 = vrot.lane.b32.xlu1 %v7338_v60, %s7074_s23 }
 0x1cb   : > { %646 = vrot.lane.b32.xlu0 %v7338_v60, %s7076_s6  ;;  %658 = vrot.lane.b32.xlu1 %v7338_v60, %s7073_s21 }
 0x1cf   : > { %682 = vrot.lane.b32.xlu1 %v7338_v60, %s7075_s30 }
 0x1d3   : > { %706 = vrot.lane.b32.xlu1 %v7338_v60, %s7077_s25 }
 0x1d7   : > { %720 = vrot.lane.b32.xlu1 %v7350_v2, %s7074_s23 }
 0x1d9   : > { %v581_v9 = vpop.permute.xlu1 %580  ;;  %v7434_v10 = vpop.permute.xlu0 %564 }
 0x1da   : > { %6214 = vmatprep.mubr.msk.bf16.mxu0 %vm932_vm0, %v581_v9 }
 0x1db   : > { %732 = vrot.lane.b32.xlu1 %v7350_v2, %s7076_s6 }
 0x1dd   : > { %v7439_v11 = vpop.permute.xlu1 %596  ;;  %v7441_v12 = vpop.permute.xlu0 %572 }
 0x1df   : > { %726 = vrot.lane.b32.xlu1 %v7360_v6, %s7074_s23 }
 0x1e1   : > { %v7445_v13 = vpop.permute.xlu1 %612  ;;  %v7447_v14 = vpop.permute.xlu0 %588 }
 0x1e3   : > { %724 = vrot.lane.b32.xlu1 %v7362_v8, %s7074_s23 }
 0x1e5   : > { %v7451_v15 = vpop.permute.xlu0 %604  ;;  %v7453_v16 = vpop.permute.xlu1 %652 }
 0x1e9   : > { %v7455_v17 = vpop.permute.xlu1 %664  ;;  %v629_v18 = vpop.permute.xlu0 %628  ;;  %804 = vxpose.xlu0.c.b16.start [1/4] (short) (narrow) %v7308_v42, 16 }
 0x1ed   : > { %v7458_v19 = vpop.permute.xlu1 %676  ;;  %v641_v20 = vpop.permute.xlu0 %640  ;;  %805 = vxpose.xlu0.c.b16.cont [2/4] (short) (narrow) %v7317_v48, 16 }
 0x1f1   : > { %v7461_v21 = vpop.permute.xlu1 %700  ;;  %v7463_v22 = vpop.permute.xlu0 %688  ;;  %806 = vxpose.xlu0.c.b16.cont [3/4] (short) (narrow) %v7326_v54, 16 }
 0x1f5   : > { %v7466_v23 = vpop.permute.xlu0 %574  ;;  %v7468_v24 = vpop.permute.xlu1 %566  ;;  %807 = vxpose.xlu0.c.b16.end [4/4] (short) (narrow) %v7338_v60, 16 }
 0x1f9   : > { %v7471_v25 = vpop.permute.xlu0 %590  ;;  %v7473_v26 = vpop.permute.xlu1 %582 }
 0x1fd   : > { %v7475_v27 = vpop.permute.xlu0 %606  ;;  %v7477_v28 = vpop.permute.xlu1 %598 }
 0x1fe   : > { %670 = vrot.lane.b32.xlu0 %v7338_v60, %s7078_s7 }
 0x201   : > { %v7481_v29 = vpop.permute.xlu1 %614  ;;  %v631_v30 = vpop.permute.xlu0 %630 }
 0x202   : > { %694 = vrot.lane.b32.xlu0 %v7338_v60, %s7079_s24 }
 0x205   : > { %v655_v31 = vpop.permute.xlu1 %654  ;;  %v643_v32 = vpop.permute.xlu0 %642 }
 0x206   : > { %722 = vrot.lane.b32.xlu0 %v7348_v0, %s7074_s23  ;;  %820 = vxpose.xlu1.c.b16.start [1/4] (short) (narrow) %v629_v18, 16 }
 0x209   : > { %v7487_v33 = vpop.permute.xlu1 %702  ;;  %v667_v34 = vpop.permute.xlu0 %666 }
 0x20a   : > { %744 = vrot.lane.b32.xlu0 %v7350_v2, %s7073_s21  ;;  %821 = vxpose.xlu1.c.b16.cont [2/4] (short) (narrow) %v631_v30, 16 }
 0x20d   : > { %v7491_v35 = vpop.permute.xlu0 %678  ;;  %v7493_v36 = vpop.permute.xlu1 %568 }
 0x20e   : > { %736 = vrot.lane.b32.xlu0 %v7362_v8, %s7076_s6 }
 0x211   : > { %v691_v37 = vpop.permute.xlu0 %690  ;;  %v7497_v38 = vpop.permute.xlu1 %584 }
 0x215   : > { %v7499_v39 = vpop.permute.xlu0 %576  ;;  %v7501_v40 = vpop.permute.xlu1 %600 }
 0x219   : > { %v7503_v41 = vpop.permute.xlu0 %592  ;;  %v7505_v42 = vpop.permute.xlu1 %616 }
 0x21d   : > { %v7507_v43 = vpop.permute.xlu0 %608  ;;  %v633_v44 = vpop.permute.xlu1 %632 }
 0x21e   : > { %822 = vxpose.xlu1.c.b16.cont [3/4] (short) (narrow) %v633_v44, 16 }
 0x221   : > { %v645_v45 = vpop.permute.xlu0 %644  ;;  %v657_v47 = vpop.permute.xlu1 %656 }
 0x225   : > { %v669_v48 = vpop.permute.xlu0 %668  ;;  %v7509_v49 = vpop.permute.xlu1 %704 }
 0x229   : > { %v681_v50 = vpop.permute.xlu0 %680  ;;  %v7511_v51 = vpop.permute.xlu1 %570 }
 0x22c   : > { %836 = vxpose.xlu0.c.b16.start [1/4] (short) (narrow) %v641_v20, 16 }
 0x22d   : > { %v693_v53 = vpop.permute.xlu0 %692  ;;  %v7513_v54 = vpop.permute.xlu1 %586 }
 0x230   : > { %837 = vxpose.xlu0.c.b16.cont [2/4] (short) (narrow) %v643_v32, 16 }
 0x231   : > { %v7515_v55 = vpop.permute.xlu0 %578  ;;  %v7517_v56 = vpop.permute.xlu1 %602 }
 0x234   : > { %838 = vxpose.xlu0.c.b16.cont [3/4] (short) (narrow) %v645_v45, 16 }
 0x235   : > { %v7519_v57 = vpop.permute.xlu0 %594  ;;  %v7521_v59 = vpop.permute.xlu1 %618 }
 0x239   : > { %v7523_v60 = vpop.permute.xlu0 %610  ;;  %v635_v61 = vpop.permute.xlu1 %634 }
 0x23a   : > { %823 = vxpose.xlu1.c.b16.end [4/4] (short) (narrow) %v635_v61, 16 }
 0x23d   : > { %v647_v62 = vpop.permute.xlu0 %646  ;;  %v659_v1 = vpop.permute.xlu1 %658 }
 0x23e   : > { %839 = vxpose.xlu0.c.b16.end [4/4] (short) (narrow) %v647_v62, 16  ;;  %734 = vrot.lane.b32.xlu1 %v7348_v0, %s7076_s6 }
 0x247   : > { %738 = vrot.lane.b32.xlu0 %v7360_v6, %s7076_s6 }
 0x24f   : > { %v812_v63 = vpop.trf.xlu0 }
 0x250   : > { %6182 = vmatprep.subr.bf16.mxu1 %v812_v63 }
 0x251   : > { %6183 = vmatpush3.bf16.msra.mxu1 %v812_v63 }
 0x254   : > { %6185 = vmatmul.mubr.msk.bf16.vlgmr.msra.gmra.mrb[0].mxu1 %vm932_vm0, %v7315_v46  ;;  %v683_v46 = vpop.permute.xlu1 %682 }
 0x255   : > { %6188 = vmatprep.mubr.msk.bf16.mxu1 %vm932_vm0, %v7324_v52 }
 0x258   : > { %v707_v52 = vpop.permute.xlu1 %706 }
 0x25c   : > { %6189 = vmatmul.mubr.msk.bf16.gmra.mrb[4].mxu1 %vm932_vm0, %v7336_v58  ;;  %v721_v58 = vpop.permute.xlu1 %720 }
 0x25d   : > { %6194 = vmatprep.mubr.msk.bf16.mxu1 %vm932_vm0, %v7434_v10 }
 0x260   : > { %v733_v4 = vpop.permute.xlu1 %732 }
 0x261   : > { %852 = vxpose.xlu1.c.b16.start [1/4] (short) (narrow) %v7453_v16, 16 }
 0x264   : > { %v727_v7 = vpop.permute.xlu1 %726 }
 0x265   : > { %868 = vxpose.xlu0.c.b16.start [1/4] (short) (narrow) %v7455_v17, 16  ;;  %853 = vxpose.xlu1.c.b16.cont [2/4] (short) (narrow) %v655_v31, 16 }
 0x268   : > { %v725_v10 = vpop.permute.xlu1 %724 }
 0x269   : > { %869 = vxpose.xlu0.c.b16.cont [2/4] (short) (narrow) %v667_v34, 16  ;;  %854 = vxpose.xlu1.c.b16.cont [3/4] (short) (narrow) %v657_v47, 16 }
 0x26d   : > { %870 = vxpose.xlu0.c.b16.cont [3/4] (short) (narrow) %v669_v48, 16  ;;  %855 = vxpose.xlu1.c.b16.end [4/4] (short) (narrow) %v659_v1, 16 }
 0x270   : > { %v671_v3 = vpop.permute.xlu0 %670 }
 0x271   : > { %871 = vxpose.xlu0.c.b16.end [4/4] (short) (narrow) %v671_v3, 16  ;;  %2350 = vxpose.xlu1.c.b16.start [1/4] (short) (narrow) %v7350_v2, 16 }
 0x274   : > { %v695_v5 = vpop.permute.xlu0 %694 }
 0x275   : > { %900 = vxpose.xlu0.c.b16.start [1/4] (short) (narrow) %v7463_v22, 16  ;;  %2351 = vxpose.xlu1.c.b16.cont [2/4] (short) (narrow) %v7348_v0, 16 }
 0x278   : > { %v723_v9 = vpop.permute.xlu0 %722 }
 0x279   : > { %901 = vxpose.xlu0.c.b16.cont [2/4] (short) (narrow) %v691_v37, 16  ;;  %2352 = vxpose.xlu1.c.b16.cont [3/4] (short) (narrow) %v7362_v8, 16 }
 0x27c   : > { %v745_v16 = vpop.permute.xlu0 %744 }
 0x27d   : > { %902 = vxpose.xlu0.c.b16.cont [3/4] (short) (narrow) %v693_v53, 16  ;;  %2353 = vxpose.xlu1.c.b16.end [4/4] (short) (narrow) %v7360_v6, 16 }
 0x280   : > { %v737_v17 = vpop.permute.xlu0 %736 }
 0x281   : > { %903 = vxpose.xlu0.c.b16.end [4/4] (short) (narrow) %v695_v5, 16  ;;  %884 = vxpose.xlu1.c.b16.start [1/4] (short) (narrow) %v7458_v19, 16 }
 0x285   : > { %2366 = vxpose.xlu0.c.b16.start [1/4] (short) (narrow) %v721_v58, 16  ;;  %885 = vxpose.xlu1.c.b16.cont [2/4] (short) (narrow) %v7491_v35, 16 }
 0x289   : > { %2367 = vxpose.xlu0.c.b16.cont [2/4] (short) (narrow) %v723_v9, 16  ;;  %886 = vxpose.xlu1.c.b16.cont [3/4] (short) (narrow) %v681_v50, 16 }
 0x28d   : > { %887 = vxpose.xlu1.c.b16.end [4/4] (short) (narrow) %v683_v46, 16  ;;  %2368 = vxpose.xlu0.c.b16.cont [3/4] (short) (narrow) %v725_v10, 16 }
 0x291   : > { %916 = vxpose.xlu1.c.b16.start [1/4] (short) (narrow) %v7461_v21, 16  ;;  %2369 = vxpose.xlu0.c.b16.end [4/4] (short) (narrow) %v727_v7, 16 }
 0x294   : > { %v828_v18 = vpop.trf.xlu1 }
 0x295   : > { %917 = vxpose.xlu1.c.b16.cont [2/4] (short) (narrow) %v7487_v33, 16  ;;  %2398 = vxpose.xlu0.c.b16.start [1/4] (short) (narrow) %v745_v16, 16 }
 0x296   : > { %6192 = vmatprep.subr.bf16.mxu1 %v828_v18 }
 0x297   : > { %6193 = vmatpush3.bf16.msra.mxu1 %v828_v18 }
 0x298   : > { %v844_v19 = vpop.trf.xlu0 }
 0x299   : > { %918 = vxpose.xlu1.c.b16.cont [3/4] (short) (narrow) %v7509_v49, 16  ;;  %6202 = vmatprep.subr.bf16.mxu1 %v844_v19 }
 0x29a   : > { %6195 = vmatmul.mubr.msk.bf16.vlgmr.msra.gmra.mrb[8].mxu1 %vm932_vm0, %v7468_v24 }
 0x29b   : > { %6198 = vmatprep.mubr.msk.bf16.mxu1 %vm932_vm0, %v7493_v36  ;;  %6203 = vmatpush3.bf16.msra.mxu1 %v844_v19 }
 0x29d   : > { %919 = vxpose.xlu1.c.b16.end [4/4] (short) (narrow) %v707_v52, 16 }
 0x2a1   : > { %2382 = vxpose.xlu1.c.b16.start [1/4] (short) (narrow) %v733_v4, 16 }
 0x2a2   : > { %6199 = vmatmul.mubr.msk.bf16.gmra.mrb[12].mxu1 %vm932_vm0, %v7511_v51 }
 0x2a3   : > { %6204 = vmatprep.mubr.msk.bf16.mxu1 %vm932_vm0, %v7441_v12 }
 0x2aa   : > { %6205 = vmatmul.mubr.msk.bf16.vlgmr.msra.gmra.mrb[16].mxu1 %vm932_vm0, %v7466_v23 }
 0x2ab   : > { %6208 = vmatprep.mubr.msk.bf16.mxu1 %vm932_vm0, %v7499_v39 }
 0x2b0   : > { %v735_v20 = vpop.permute.xlu1 %734 }
 0x2b1   : > { %2383 = vxpose.xlu1.c.b16.cont [2/4] (short) (narrow) %v735_v20, 16 }
 0x2b2   : > { %6209 = vmatmul.mubr.msk.bf16.gmra.mrb[20].mxu1 %vm932_vm0, %v7515_v55 }
 0x2b3   : > { %6224 = vmatprep.mubr.msk.bf16.mxu1 %vm932_vm0, %v7447_v14 }
 0x2b5   : > { %2384 = vxpose.xlu1.c.b16.cont [3/4] (short) (narrow) %v737_v17, 16 }
 0x2b9   : > { %v739_v21 = vpop.permute.xlu0 %738 }
 0x2ba   : > { %2385 = vxpose.xlu1.c.b16.end [4/4] (short) (narrow) %v739_v21, 16 }
 0x2be   : > { %746 = vrot.lane.b32.xlu1 %v7348_v0, %s7073_s21 }
 0x2c2   : > { %748 = vrot.lane.b32.xlu1 %v7362_v8, %s7073_s21 }
 0x2c6   : > { %750 = vrot.lane.b32.xlu1 %v7360_v6, %s7073_s21 }
 0x2c7   : > { %v860_v12 = vpop.trf.xlu1 }
 0x2c8   : > { %6212 = vmatprep.subr.bf16.mxu0 %v860_v12 }
 0x2c9   : > { %6213 = vmatpush3.bf16.msra.mxu0 %v860_v12 }
 0x2ca   : > { %756 = vrot.lane.b32.xlu1 %v7350_v2, %s7078_s7 }
 0x2cb   : > { %v876_v22 = vpop.trf.xlu0 }
 0x2cc   : > { %6215 = vmatmul.mubr.msk.bf16.vlgmr.msra.gmra.mrb[24].mxu0 %vm932_vm0, %v7473_v26  ;;  %6222 = vmatprep.subr.bf16.mxu1 %v876_v22 }
 0x2cd   : > { %6218 = vmatprep.mubr.msk.bf16.mxu0 %vm932_vm0, %v7497_v38  ;;  %6223 = vmatpush3.bf16.msra.mxu1 %v876_v22 }
 0x2ce   : > { %758 = vrot.lane.b32.xlu1 %v7348_v0, %s7078_s7 }
 0x2d0   : > { %6225 = vmatmul.mubr.msk.bf16.vlgmr.msra.gmra.mrb[24].mxu1 %vm932_vm0, %v7471_v25 }
 0x2d1   : > { %6228 = vmatprep.mubr.msk.bf16.mxu1 %vm932_vm0, %v7503_v41 }
 0x2d2   : > { %760 = vrot.lane.b32.xlu1 %v7362_v8, %s7078_s7 }
 0x2d4   : > { %6219 = vmatmul.mubr.msk.bf16.gmra.mrb[28].mxu0 %vm932_vm0, %v7513_v54 }
 0x2d5   : > { %6234 = vmatprep.mubr.msk.bf16.mxu0 %vm932_vm0, %v7439_v11 }
 0x2d6   : > { %772 = vrot.lane.b32.xlu1 %v7362_v8, %s7075_s30 }
 0x2d7   : > { %v7603_v11 = vpop.trf.xlu1 }
 0x2d8   : > { %6229 = vmatmul.mubr.msk.bf16.gmra.mrb[28].mxu1 %vm932_vm0, %v7519_v57  ;;  %9490 = vst [vmem:[#allocation12_spill] sm:$0xff] %v7603_v11 }
 0x2d9   : > { %6244 = vmatprep.mubr.msk.bf16.mxu1 %vm932_vm0, %v7451_v15 }
 0x2da   : > { %774 = vrot.lane.b32.xlu1 %v7360_v6, %s7075_s30 }
 0x2db   : > { %v908_v14 = vpop.trf.xlu0 }
 0x2dc   : > { %6242 = vmatprep.subr.bf16.mxu1 %v908_v14 }
 0x2dd   : > { %6243 = vmatpush3.bf16.msra.mxu1 %v908_v14 }
 0x2de   : > { %780 = vrot.lane.b32.xlu1 %v7350_v2, %s7079_s24 }
 0x2e0   : > { %6245 = vmatmul.mubr.msk.bf16.vlgmr.msra.gmra.mrb[32].mxu1 %vm932_vm0, %v7475_v27 }
 0x2e1   : > { %6248 = vmatprep.mubr.msk.bf16.mxu1 %vm932_vm0, %v7507_v43 }
 0x2e2   : > { %782 = vrot.lane.b32.xlu1 %v7348_v0, %s7079_s24 }
 0x2e6   : > { %784 = vrot.lane.b32.xlu1 %v7362_v8, %s7079_s24 }
 0x2e7   : > { %v892_v15 = vpop.trf.xlu1 }
 0x2e8   : > { %6232 = vmatprep.subr.bf16.mxu0 %v892_v15  ;;  %6249 = vmatmul.mubr.msk.bf16.gmra.mrb[36].mxu1 %vm932_vm0, %v7523_v60 }
 0x2e9   : > { %6233 = vmatpush3.bf16.msra.mxu0 %v892_v15 }
 0x2ea   : > { %796 = vrot.lane.b32.xlu1 %v7362_v8, %s7077_s25 }
 0x2ec   : > { %6235 = vmatmul.mubr.msk.bf16.vlgmr.msra.gmra.mrb[32].mxu0 %vm932_vm0, %v7477_v28 }
 0x2ed   : > { %6238 = vmatprep.mubr.msk.bf16.mxu0 %vm932_vm0, %v7501_v40 }
 0x2f4   : > { %6239 = vmatmul.mubr.msk.bf16.gmra.mrb[36].mxu0 %vm932_vm0, %v7517_v56 }
 0x2f5   : > { %6254 = vmatprep.mubr.msk.bf16.mxu0 %vm932_vm0, %v7445_v13 }
 0x2f7   : > { %v924_v23 = vpop.trf.xlu1 }
 0x2f8   : > { %6252 = vmatprep.subr.bf16.mxu0 %v924_v23 }
 0x2f9   : > { %6253 = vmatpush3.bf16.msra.mxu0 %v924_v23 }
 0x2fc   : > { %6255 = vmatmul.mubr.msk.bf16.vlgmr.msra.gmra.mrb[40].mxu0 %vm932_vm0, %v7481_v29 }
 0x2fd   : > { %6258 = vmatprep.mubr.msk.bf16.mxu0 %vm932_vm0, %v7505_v42 }
 0x304   : > { %6259 = vmatmul.mubr.msk.bf16.gmra.mrb[44].mxu0 %vm932_vm0, %v7521_v59 }
 0x314   : > { %v7637_v27 = vpop.trf.xlu1 }
 0x315   : > { %9491 = vst [vmem:[#allocation13_spill] sm:$0xff] %v7637_v27 }
 0x327   : > { %v7627_v8 = vpop.f32.mrb[0].mxu1 }
 0x328   : > { %v7629_v24 = vpop.f32.mrb[1].mxu1  ;;  %v1556_v13 = vsel %vm1549_vm1, %v7627_v8, -inf }
 0x329   : > { %v7633_v25 = vpop.f32.mrb[2].mxu1  ;;  %1557 = vmax.xlane.f32.xlu1 %v1556_v13 }
 0x32a   : > { %v7635_v26 = vpop.f32.mrb[3].mxu1  ;;  %v1559_v47 = vsel %vm1549_vm1, %v7633_v25, -inf }
 0x32b   : > { %v1553_v28 = vsel %vm1549_vm1, %v7635_v26, -inf }
 0x32d   : > { %1554 = vmax.xlane.f32.xlu1 %v1553_v28 }
 0x32f   : > { %v7641_v29 = vpop.f32.mrb[4].mxu1 }
 0x330   : > { %v7643_v30 = vpop.f32.mrb[5].mxu1  ;;  %v747_v31 = vpop.permute.xlu1 %746  ;;  %v1568_v32 = vsel %vm1549_vm1, %v7641_v29, -inf }
 0x331   : > { %v7647_v33 = vpop.f32.mrb[6].mxu1  ;;  %1569 = vmax.xlane.f32.xlu1 %v1568_v32  ;;  %2399 = vxpose.xlu0.c.b16.cont [2/4] (short) (narrow) %v747_v31, 16  ;;  %v1562_v36 = vsel %vm1549_vm1, %v7643_v30, -inf }
 0x332   : > { %v7649_v34 = vpop.f32.mrb[7].mxu1  ;;  %v1571_v48 = vsel %vm1549_vm1, %v7647_v33, -inf }
 0x333   : > { %v1565_v54 = vsel %vm1549_vm1, %v7649_v34, -inf }
 0x334   : > { %v749_v35 = vpop.permute.xlu1 %748 }
 0x335   : > { %1563 = vmax.xlane.f32.xlu1 %v1562_v36  ;;  %2400 = vxpose.xlu0.c.b16.cont [3/4] (short) (narrow) %v749_v35, 16 }
 0x338   : > { %v751_v37 = vpop.permute.xlu1 %750 }
 0x339   : > { %2401 = vxpose.xlu0.c.b16.end [4/4] (short) (narrow) %v751_v37, 16 }
 0x33c   : > { %v7749_v22 = vpop.permute.xlu1 %756 }
 0x33d   : > { %9499 = vst [vmem:[#allocation21_spill] sm:$0xff] %v7749_v22 }
 0x340   : > { %v7763_v32 = vpop.permute.xlu1 %758 }
 0x341   : > { %9502 = vst [vmem:[#allocation24_spill] sm:$0xff] %v7763_v32 }
 0x342   : > { %768 = vrot.lane.b32.xlu0 %v7350_v2, %s7075_s30 }
 0x346   : > { %770 = vrot.lane.b32.xlu0 %v7348_v0, %s7075_s30 }
 0x34a   : > { %762 = vrot.lane.b32.xlu0 %v7360_v6, %s7078_s7 }
 0x34e   : > { %792 = vrot.lane.b32.xlu0 %v7350_v2, %s7077_s25  ;;  %v1550_v2 = vsel %vm1549_vm1, %v7629_v24, -inf }
 0x352   : > { %794 = vrot.lane.b32.xlu0 %v7348_v0, %s7077_s25 }
 0x356   : > { %786 = vrot.lane.b32.xlu0 %v7360_v6, %s7079_s24 }
 0x36d   : > { %v7665_v38 = vpop.f32.mrb[8].mxu1 }
 0x36e   : > { %v7667_v39 = vpop.f32.mrb[9].mxu1  ;;  %v1580_v40 = vsel %vm1549_vm1, %v7665_v38, -inf }
 0x36f   : > { %v7671_v41 = vpop.f32.mrb[10].mxu1  ;;  %1581 = vmax.xlane.f32.xlu1 %v1580_v40  ;;  %v1574_v55 = vsel %vm1549_vm1, %v7667_v39, -inf }
 0x370   : > { %v7673_v42 = vpop.f32.mrb[11].mxu1  ;;  %v1583_v61 = vsel %vm1549_vm1, %v7671_v41, -inf }
 0x371   : > { %v1577_v10 = vsel %vm1549_vm1, %v7673_v42, -inf }
 0x375   : > { %v7677_v43 = vpop.f32.mrb[12].mxu1  ;;  %1551 = vmax.xlane.f32.xlu0 %v1550_v2 }
 0x376   : > { %v7679_v0 = vpop.f32.mrb[13].mxu1  ;;  %v1592_v18 = vsel %vm1549_vm1, %v7677_v43, -inf }
 0x377   : > { %v7681_v44 = vpop.f32.mrb[14].mxu1  ;;  %v1586_v31 = vsel %vm1549_vm1, %v7679_v0, -inf }
 0x378   : > { %v7683_v45 = vpop.f32.mrb[15].mxu1  ;;  %v1595_v28 = vsel %vm1549_vm1, %v7681_v44, -inf }
 0x379   : > { %1560 = vmax.xlane.f32.xlu0 %v1559_v47 }
 0x37d   : > { %v7689_v49 = vpop.f32.mrb[16].mxu1  ;;  %1572 = vmax.xlane.f32.xlu0 %v1571_v48  ;;  %v1589_v48 = vsel %vm1549_vm1, %v7683_v45, -inf }
 0x37e   : > { %9492 = vst [vmem:[#allocation14_spill] sm:$0xff] %v7689_v49  ;;  %v7691_v50 = vpop.f32.mrb[17].mxu1 }
 0x37f   : > { %9493 = vst [vmem:[#allocation15_spill] sm:$0xff] %v7691_v50  ;;  %v7693_v51 = vpop.f32.mrb[18].mxu1 }
 0x380   : > { %v7695_v53 = vpop.f32.mrb[19].mxu1 }
 0x381   : > { %1566 = vmax.xlane.f32.xlu0 %v1565_v54  ;;  %v7779_v54 = vpop.permute.xlu1 %760 }
 0x382   : > { %9503 = vst [vmem:[#allocation25_spill] sm:$0xff] %v7779_v54 }
 0x385   : > { %v7701_v56 = vpop.f32.mrb[20].mxu1  ;;  %1575 = vmax.xlane.f32.xlu0 %v1574_v55  ;;  %v1604_v55 = vsel %vm1549_vm1, %v7689_v49, -inf }
 0x386   : > { %v7703_v57 = vpop.f32.mrb[21].mxu1 }
 0x387   : > { %9494 = vst [vmem:[#allocation16_spill] sm:$0xff] %v7703_v57  ;;  %v7705_v59 = vpop.f32.mrb[22].mxu1 }
 0x388   : > { %9495 = vst [vmem:[#allocation17_spill] sm:$0xff] %v7705_v59  ;;  %v7707_v60 = vpop.f32.mrb[23].mxu1 }
 0x389   : > { %1584 = vmax.xlane.f32.xlu0 %v1583_v61 }
 0x39f   : > { %v7711_v62 = vpop.f32.mrb[24].mxu0 }
 0x3a0   : > { %v7713_v63 = vpop.f32.mrb[25].mxu0  ;;  %v1628_v1 = vsel %vm1549_vm1, %v7711_v62, -inf }
 0x3a1   : > { %1629 = vmax.xlane.f32.xlu1 %v1628_v1  ;;  %v7717_v46 = vpop.f32.mrb[26].mxu0  ;;  %v1622_v5 = vsel %vm1549_vm1, %v7713_v63, -inf }
 0x3a2   : > { %v7719_v3 = vpop.f32.mrb[27].mxu0  ;;  %v1631_v52 = vsel %vm1549_vm1, %v7717_v46, -inf }
 0x3a3   : > { %v7723_v58 = vpop.f32.mrb[24].mxu1  ;;  %1632 = vmax.xlane.f32.xlu0 %v1631_v52  ;;  %v1625_v21 = vsel %vm1549_vm1, %v7719_v3, -inf }
 0x3a4   : > { %9496 = vst [vmem:[#allocation18_spill] sm:$0xff] %v7723_v58  ;;  %v7725_v4 = vpop.f32.mrb[25].mxu1 }
 0x3a5   : > { %9497 = vst [vmem:[#allocation19_spill] sm:$0xff] %v7725_v4  ;;  %v7729_v7 = vpop.f32.mrb[26].mxu1  ;;  %1623 = vmax.xlane.f32.xlu1 %v1622_v5 }
 0x3a6   : > { %v7731_v9 = vpop.f32.mrb[27].mxu1 }
 0x3a7   : > { %v7735_v16 = vpop.f32.mrb[28].mxu0  ;;  %1578 = vmax.xlane.f32.xlu0 %v1577_v10  ;;  %v7791_v10 = vpop.permute.xlu1 %772 }
 0x3a8   : > { %v7737_v17 = vpop.f32.mrb[29].mxu0  ;;  %v1640_v15 = vsel %vm1549_vm1, %v7735_v16, -inf  ;;  %9504 = vst [vmem:[#allocation26_spill] sm:$0xff] %v7791_v10  ;;  %v1616_v10 = vsel %vm1549_vm1, %v7701_v56, -inf }
 0x3a9   : > { %9498 = vst [vmem:[#allocation20_spill] sm:$0xff] %v7737_v17  ;;  %1593 = vmax.xlane.f32.xlu1 %v1592_v18  ;;  %v7741_v19 = vpop.f32.mrb[30].mxu0  ;;  %v1634_v40 = vsel %vm1549_vm1, %v7737_v17, -inf }
 0x3aa   : > { %v7743_v20 = vpop.f32.mrb[31].mxu0  ;;  %v1643_v35 = vsel %vm1549_vm1, %v7741_v19, -inf }
 0x3ab   : > { %v7747_v12 = vpop.f32.mrb[28].mxu1  ;;  %1626 = vmax.xlane.f32.xlu0 %v1625_v21  ;;  %v1637_v61 = vsel %vm1549_vm1, %v7743_v20, -inf  ;;  %v1607_v21 = vsel %vm1549_vm1, %v7693_v51, -inf }
 0x3ac   : > { %v7751_v14 = vpop.f32.mrb[29].mxu1 }
 0x3ad   : > { %9500 = vst [vmem:[#allocation22_spill] sm:$0xff] %v7751_v14  ;;  %v7755_v23 = vpop.f32.mrb[30].mxu1  ;;  %1641 = vmax.xlane.f32.xlu1 %v1640_v15 }
 0x3ae   : > { %9501 = vst [vmem:[#allocation23_spill] sm:$0xff] %v7755_v23  ;;  %v7757_v13 = vpop.f32.mrb[31].mxu1 }
 0x3af   : > { %1596 = vmax.xlane.f32.xlu0 %v1595_v28 }
 0x3b1   : > { %1587 = vmax.xlane.f32.xlu1 %v1586_v31 }
 0x3b3   : > { %v7767_v36 = vpop.f32.mrb[32].mxu1  ;;  %1644 = vmax.xlane.f32.xlu0 %v1643_v35 }
 0x3b4   : > { %v7769_v37 = vpop.f32.mrb[33].mxu1 }
 0x3b5   : > { %v7773_v2 = vpop.f32.mrb[34].mxu1  ;;  %1635 = vmax.xlane.f32.xlu1 %v1634_v40 }
 0x3b6   : > { %v7775_v47 = vpop.f32.mrb[35].mxu1 }
 0x3b7   : > { %1590 = vmax.xlane.f32.xlu0 %v1589_v48 }
 0x3b9   : > { %1605 = vmax.xlane.f32.xlu1 %v1604_v55  ;;  %v7809_v55 = vpop.permute.xlu1 %774 }
 0x3ba   : > { %9507 = vst [vmem:[#allocation29_spill] sm:$0xff] %v7809_v55 }
 0x3bb   : > { %v7785_v1 = vpop.f32.mrb[36].mxu1  ;;  %1638 = vmax.xlane.f32.xlu0 %v1637_v61  ;;  %v1598_v61 = vsel %vm1549_vm1, %v7691_v50, -inf  ;;  %v1613_v50 = vsel %vm1549_vm1, %v7707_v60, -inf }
 0x3bc   : > { %v7787_v52 = vpop.f32.mrb[37].mxu1 }
 0x3bd   : > { %v7789_v5 = vpop.f32.mrb[38].mxu1 }
 0x3be   : > { %v7793_v18 = vpop.f32.mrb[39].mxu1 }
 0x3bf   : > { %v7797_v15 = vpop.f32.mrb[32].mxu0  ;;  %1608 = vmax.xlane.f32.xlu0 %v1607_v21  ;;  %v1601_v21 = vsel %vm1549_vm1, %v7695_v53, -inf }
 0x3c0   : > { %9505 = vst [vmem:[#allocation27_spill] sm:$0xff] %v7797_v15  ;;  %v7799_v28 = vpop.f32.mrb[33].mxu0  ;;  %v1676_v31 = vsel %vm1549_vm1, %v7797_v15, -inf }
 0x3c1   : > { %9506 = vst [vmem:[#allocation28_spill] sm:$0xff] %v7799_v28  ;;  %1677 = vmax.xlane.f32.xlu1 %v1676_v31  ;;  %v7803_v35 = vpop.f32.mrb[34].mxu0  ;;  %v1670_v54 = vsel %vm1549_vm1, %v7799_v28, -inf }
 0x3c2   : > { %v7805_v40 = vpop.f32.mrb[35].mxu0  ;;  %v1679_v48 = vsel %vm1549_vm1, %v7803_v35, -inf }
 0x3c3   : > { %1680 = vmax.xlane.f32.xlu0 %v1679_v48  ;;  %v7823_v48 = vpop.permute.xlu1 %780 }
 0x3c4   : > { %9509 = vst [vmem:[#allocation31_spill] sm:$0xff] %v7823_v48 }
 0x3c5   : > { %1599 = vmax.xlane.f32.xlu1 %v1598_v61  ;;  %v1673_v61 = vsel %vm1549_vm1, %v7805_v40, -inf }
 0x3c7   : > { %v7815_v27 = vpop.f32.mrb[36].mxu0  ;;  %1602 = vmax.xlane.f32.xlu0 %v1601_v21  ;;  %v1619_v21 = vsel %vm1549_vm1, %v7705_v59, -inf  ;;  %v7847_v59 = vpop.trf.xlu0 }
 0x3c8   : > { %v7817_v31 = vpop.f32.mrb[37].mxu0  ;;  %v1688_v48 = vsel %vm1549_vm1, %v7815_v27, -inf  ;;  %9513 = vst [vmem:[#allocation35_spill] sm:$0xff] %v7847_v59 }
 0x3c9   : > { %9508 = vst [vmem:[#allocation30_spill] sm:$0xff] %v7817_v31  ;;  %1671 = vmax.xlane.f32.xlu1 %v1670_v54  ;;  %v7821_v32 = vpop.f32.mrb[38].mxu0  ;;  %v7835_v54 = vpop.permute.xlu1 %782  ;;  %v1682_v49 = vsel %vm1549_vm1, %v7817_v31, -inf  ;;  %v1655_v31 = vsel %vm1549_vm1, %v7729_v7, -inf }
 0x3ca   : > { %v7825_v55 = vpop.f32.mrb[39].mxu0  ;;  %9511 = vst [vmem:[#allocation33_spill] sm:$0xff] %v7835_v54 }
 0x3cb   : > { %1674 = vmax.xlane.f32.xlu0 %v1673_v61  ;;  %v7863_v59 = vpop.trf.xlu0 }
 0x3cc   : > { %9516 = vst [vmem:[#allocation38_spill] sm:$0xff] %v7863_v59 }
 0x3cd   : > { %1617 = vmax.xlane.f32.xlu1 %v1616_v10  ;;  %v1691_v10 = vsel %vm1549_vm1, %v7821_v32, -inf  ;;  %v7851_v54 = vpop.permute.xlu1 %784 }
 0x3ce   : > { %9514 = vst [vmem:[#allocation36_spill] sm:$0xff] %v7851_v54 }
 0x3cf   : > { %v7833_v22 = vpop.f32.mrb[40].mxu0  ;;  %1620 = vmax.xlane.f32.xlu0 %v1619_v21  ;;  %v1610_v21 = vsel %vm1549_vm1, %v7703_v57, -inf }
 0x3d0   : > { %9510 = vst [vmem:[#allocation32_spill] sm:$0xff] %v7833_v22  ;;  %v7837_v11 = vpop.f32.mrb[41].mxu0  ;;  %v1724_v59 = vsel %vm1549_vm1, %v7833_v22, -inf }
 0x3d1   : > { %9512 = vst [vmem:[#allocation34_spill] sm:$0xff] %v7837_v11  ;;  %1689 = vmax.xlane.f32.xlu1 %v1688_v48  ;;  %v7841_v28 = vpop.f32.mrb[42].mxu0  ;;  %v7869_v54 = vpop.permute.xlu1 %796 }
 0x3d2   : > { %v7843_v61 = vpop.f32.mrb[43].mxu0  ;;  %9517 = vst [vmem:[#allocation39_spill] sm:$0xff] %v7869_v54 }
 0x3d3   : > { %1692 = vmax.xlane.f32.xlu0 %v1691_v10  ;;  %v1721_v22 = vsel %vm1549_vm1, %v7843_v61, -inf }
 0x3d5   : > { %1611 = vmax.xlane.f32.xlu1 %v1610_v21  ;;  %v1685_v21 = vsel %vm1549_vm1, %v7825_v55, -inf  ;;  %v1558_v17 = vpop.xlane.xlu1 %1557 }
 0x3d6   : > { %v1744_v54 = vsub.f32 %v7627_v8, %v1558_v17  ;;  %v1664_v17 = vsel %vm1549_vm1, %v7747_v12, -inf }
 0x3d7   : > { %v7855_v48 = vpop.f32.mrb[44].mxu0  ;;  %1614 = vmax.xlane.f32.xlu0 %v1613_v50  ;;  %v1652_v50 = vsel %vm1549_vm1, %v7723_v58, -inf }
 0x3d8   : > { %v7857_v15 = vpop.f32.mrb[45].mxu0 }
 0x3d9   : > { %9515 = vst [vmem:[#allocation37_spill] sm:$0xff] %v7857_v15  ;;  %1683 = vmax.xlane.f32.xlu1 %v1682_v49  ;;  %v7861_v10 = vpop.f32.mrb[46].mxu0  ;;  %v7875_v49 = vpop.permute.xlu0 %768 }
 0x3da   : > { %v7865_v57 = vpop.f32.mrb[47].mxu0  ;;  %9518 = vst [vmem:[#allocation40_spill] sm:$0xff] %v7875_v49  ;;  %v1810_v49 = vmul.f32 1.442695, %v1744_v54  ;;  %v1736_v54 = vsel %vm1549_vm1, %v7855_v48, -inf }
 0x3db   : > { %1686 = vmax.xlane.f32.xlu0 %v1685_v21  ;;  %v1727_v21 = vsel %vm1549_vm1, %v7841_v28, -inf }
 0x3dc   : > { %6649 = vpow2.f32 %v1810_v49  ;;  %v1667_v49 = vsel %vm1549_vm1, %v7755_v23, -inf }
 0x3dd   : > { %1653 = vmax.xlane.f32.xlu1 %v1652_v50  ;;  %v1646_v50 = vsel %vm1549_vm1, %v7725_v4, -inf  ;;  %v7884_v58 = vpop.permute.xlu0 %770 }
 0x3de   : > { %9519 = vst [vmem:[#allocation41_spill] sm:$0xff] %v7884_v58 }
 0x3df   : > { %1656 = vmax.xlane.f32.xlu0 %v1655_v31  ;;  %v1649_v31 = vsel %vm1549_vm1, %v7731_v9, -inf }
 0x3e1   : > { %1725 = vmax.xlane.f32.xlu1 %v1724_v59  ;;  %v1718_v59 = vsel %vm1549_vm1, %v7837_v11, -inf  ;;  %v7892_v8 = vpop.permute.xlu0 %762 }
 0x3e2   : > { %9520 = vst [vmem:[#allocation42_spill] sm:$0xff] %v7892_v8 }
 0x3e3   : > { %1728 = vmax.xlane.f32.xlu0 %v1727_v21  ;;  %v1730_v21 = vsel %vm1549_vm1, %v7857_v15, -inf }
 0x3e5   : > { %1647 = vmax.xlane.f32.xlu1 %v1646_v50  ;;  %v7900_v50 = vpop.permute.xlu0 %792 }
 0x3e6   : > { %9521 = vst [vmem:[#allocation43_spill] sm:$0xff] %v7900_v50 }
 0x3e7   : > { %1650 = vmax.xlane.f32.xlu0 %v1649_v31  ;;  %v7906_v31 = vpop.eup %6649 }
 0x3e8   : > { %9522 = vst [vmem:[#allocation44_spill] sm:$0xff] %v7906_v31 }
 0x3e9   : > { %1719 = vmax.xlane.f32.xlu1 %v1718_v59  ;;  %v1739_v59 = vsel %vm1549_vm1, %v7861_v10, -inf }
 0x3eb   : > { %1722 = vmax.xlane.f32.xlu0 %v1721_v22  ;;  %v1658_v22 = vsel %vm1549_vm1, %v7751_v14, -inf }
 0x3ed   : > { %1665 = vmax.xlane.f32.xlu1 %v1664_v17  ;;  %v7910_v17 = vpop.permute.xlu0 %794 }
 0x3ee   : > { %9523 = vst [vmem:[#allocation45_spill] sm:$0xff] %v7910_v17 }
 0x3ef   : > { %1731 = vmax.xlane.f32.xlu0 %v1730_v21  ;;  %v1940_v21 = vsel %vm1549_vm1, %v7906_v31, 0.0 }
 0x3f1   : > { %1737 = vmax.xlane.f32.xlu1 %v1736_v54  ;;  %v1661_v54 = vsel %vm1549_vm1, %v7757_v13, -inf  ;;  %v7916_v8 = vpop.permute.xlu0 %786 }
 0x3f2   : > { %9524 = vst [vmem:[#allocation46_spill] sm:$0xff] %v7916_v8 }
 0x3f3   : > { %1668 = vmax.xlane.f32.xlu0 %v1667_v49  ;;  %v1555_v49 = vpop.xlane.xlu1 %1554 }
 0x3f4   : > { %v1743_v17 = vsub.f32 %v7635_v26, %v1555_v49 }
 0x3f5   : > { %1659 = vmax.xlane.f32.xlu1 %v1658_v22  ;;  %v1733_v22 = vsel %vm1549_vm1, %v7865_v57, -inf }
 0x3f6   : > { %v1808_v15 = vmul.f32 1.442695, %v1743_v17  ;;  %v1694_v17 = vsel %vm1549_vm1, %v7769_v37, -inf }
 0x3f7   : > { %1740 = vmax.xlane.f32.xlu0 %v1739_v59  ;;  %v1570_v58 = vpop.xlane.xlu1 %1569 }
 0x3f9   : > { %1941 = vadd.xlane.f32.xlu1 %v1940_v21 }
 0x3fb   : > { %1662 = vmax.xlane.f32.xlu0 %v1661_v54  ;;  %v1748_v54 = vsub.f32 %v7641_v29, %v1570_v58  ;;  %v1564_v8 = vpop.xlane.xlu1 %1563 }
 0x3fc   : > { %v1746_v4 = vsub.f32 %v7643_v30, %v1564_v8 }
 0x3fe   : > { %v1814_v26 = vmul.f32 1.442695, %v1746_v4  ;;  %v1700_v4 = vsel %vm1549_vm1, %v7767_v36, -inf }
 0x3ff   : > { %1734 = vmax.xlane.f32.xlu0 %v1733_v22  ;;  %v1818_v22 = vmul.f32 1.442695, %v1748_v54  ;;  %v1703_v54 = vsel %vm1549_vm1, %v7773_v2, -inf }
 0x402   : > { %v1552_v50 = vpop.xlane.xlu0 %1551 }
 0x403   : > { %v1742_v59 = vsub.f32 %v7629_v24, %v1552_v50 }
 0x405   : > { %v1806_v23 = vmul.f32 1.442695, %v1742_v59 }
 0x406   : > { %v1561_v31 = vpop.xlane.xlu0 %1560 }
 0x407   : > { %6651 = vpow2.f32 %v1806_v23  ;;  %v1745_v21 = vsub.f32 %v7633_v25, %v1561_v31 }
 0x409   : > { %v1812_v14 = vmul.f32 1.442695, %v1745_v21 }
 0x40a   : > { %v1573_v11 = vpop.xlane.xlu0 %1572 }
 0x40b   : > { %6653 = vpow2.f32 %v1812_v14  ;;  %v1749_v50 = vsub.f32 %v7647_v33, %v1573_v11 }
 0x40c   : > { %6655 = vpow2.f32 %v1808_v15  ;;  %v1582_v15 = vpop.xlane.xlu1 %1581 }
 0x40d   : > { %6657 = vpow2.f32 %v1818_v22  ;;  %v1820_v58 = vmul.f32 1.442695, %v1749_v50  ;;  %v1752_v33 = vsub.f32 %v7665_v38, %v1582_v15  ;;  %v1697_v50 = vsel %vm1549_vm1, %v7775_v47, -inf }
 0x40e   : > { %v1567_v23 = vpop.xlane.xlu0 %1566  ;;  %6659 = vpow2.f32 %v1814_v26  ;;  %v1712_v15 = vsel %vm1549_vm1, %v7785_v1, -inf }
 0x40f   : > { %v1747_v14 = vsub.f32 %v7649_v34, %v1567_v23  ;;  %6661 = vpow2.f32 %v1820_v58  ;;  %v1826_v59 = vmul.f32 1.442695, %v1752_v33 }
 0x411   : > { %v7925_v24 = vpop.eup %6651  ;;  %v1816_v31 = vmul.f32 1.442695, %v1747_v14 }
 0x412   : > { %v1934_v25 = vsel %vm1549_vm1, %v7925_v24, 0.0  ;;  %v1576_v11 = vpop.xlane.xlu0 %1575 }
 0x413   : > { %1935 = vadd.xlane.f32.xlu1 %v1934_v25  ;;  %6663 = vpow2.f32 %v1816_v31  ;;  %v1750_v31 = vsub.f32 %v7667_v39, %v1576_v11  ;;  %v1715_v39 = vsel %vm1549_vm1, %v7789_v5, -inf }
 0x414   : > { %6665 = vpow2.f32 %v1826_v59 }
 0x415   : > { %v7930_v29 = vpop.eup %6653 }
 0x416   : > { %v1943_v30 = vsel %vm1549_vm1, %v7930_v29, 0.0  ;;  %v7937_v8 = vpop.eup %6655  ;;  %v1585_v21 = vpop.xlane.xlu0 %1584 }
 0x417   : > { %1944 = vadd.xlane.f32.xlu0 %v1943_v30  ;;  %1701 = vmax.xlane.f32.xlu1 %v1700_v4  ;;  %v1937_v34 = vsel %vm1549_vm1, %v7937_v8, 0.0  ;;  %v7944_v49 = vpop.eup %6657  ;;  %v1753_v26 = vsub.f32 %v7671_v41, %v1585_v21  ;;  %v1709_v4 = vsel %vm1549_vm1, %v7793_v18, -inf }
 0x418   : > { %v1952_v38 = vsel %vm1549_vm1, %v7944_v49, 0.0  ;;  %v7950_v22 = vpop.eup %6659 }
 0x419   : > { %v1946_v23 = vsel %vm1549_vm1, %v7950_v22, 0.0  ;;  %v7957_v25 = vpop.eup %6661  ;;  %v1828_v58 = vmul.f32 1.442695, %v1753_v26 }
 0x41a   : > { %v1955_v14 = vsel %vm1549_vm1, %v7957_v25, 0.0 }
 0x41b   : > { %1695 = vmax.xlane.f32.xlu1 %v1694_v17  ;;  %1938 = vadd.xlane.f32.xlu0 %v1937_v34  ;;  %6667 = vpow2.f32 %v1828_v58  ;;  %v1706_v34 = vsel %vm1549_vm1, %v7787_v52, -inf }
 0x41d   : > { %v7963_v30 = vpop.eup %6663 }
 0x41e   : > { %v1949_v41 = vsel %vm1549_vm1, %v7963_v30, 0.0  ;;  %v7969_v33 = vpop.eup %6665 }
 0x41f   : > { %1704 = vmax.xlane.f32.xlu0 %v1703_v54  ;;  %1953 = vadd.xlane.f32.xlu1 %v1952_v38  ;;  %v1964_v59 = vsel %vm1549_vm1, %v7969_v33, 0.0  ;;  %v1822_v54 = vmul.f32 1.442695, %v1750_v31 }
 0x423   : > { %1698 = vmax.xlane.f32.xlu0 %v1697_v50  ;;  %1947 = vadd.xlane.f32.xlu1 %v1946_v23 }
 0x425   : > { %v7982_v11 = vpop.eup %6667 }
 0x427   : > { %1956 = vadd.xlane.f32.xlu0 %v1955_v14  ;;  %1713 = vmax.xlane.f32.xlu1 %v1712_v15 }
 0x42b   : > { %1950 = vadd.xlane.f32.xlu0 %v1949_v41  ;;  %1710 = vmax.xlane.f32.xlu1 %v1709_v4 }
 0x42e   : > { %v1630_v17 = vpop.xlane.xlu1 %1629 }
 0x42f   : > { %v1768_v21 = vsub.f32 %v7711_v62, %v1630_v17  ;;  %1707 = vmax.xlane.f32.xlu0 %v1706_v34  ;;  %1965 = vadd.xlane.f32.xlu1 %v1964_v59  ;;  %v9457_v17 = vmov 0.0  }
 0x430   : > { %v1633_v38 = vpop.xlane.xlu0 %1632  ;;  %6262 = vmatprep.subr.bf16.mxu1 %v9457_v17  ;;  %6274 = vmatprep.subr.bf16.mxu0 %v9457_v17 }
 0x431   : > { %v1858_v26 = vmul.f32 1.442695, %v1768_v21  ;;  %v1769_v50 = vsub.f32 %v7717_v46, %v1633_v38  ;;  %v1967_v46 = vsel %vm1549_vm1, %v7982_v11, 0.0 }
 0x432   : > { %v7978_v23 = vpop.xlane.xlu1 %1623 }
 0x433   : > { %6669 = vpow2.f32 %v1858_v26  ;;  %v1860_v58 = vmul.f32 1.442695, %v1769_v50  ;;  %1716 = vmax.xlane.f32.xlu0 %v1715_v39 }
 0x434   : > { %6671 = vpow2.f32 %v1822_v54  ;;  %v1579_v14 = vpop.xlane.xlu0 %1578 }
 0x435   : > { %6673 = vpow2.f32 %v1860_v58  ;;  %v1751_v62 = vsub.f32 %v7673_v42, %v1579_v14 }
 0x436   : > { %v7985_v15 = vpop.xlane.xlu1 %1593 }
 0x437   : > { %v1824_v41 = vmul.f32 1.442695, %v1751_v62  ;;  %1968 = vadd.xlane.f32.xlu0 %v1967_v46 }
 0x438   : > { %v1627_v4 = vpop.xlane.xlu0 %1626 }
 0x439   : > { %6675 = vpow2.f32 %v1824_v41  ;;  %v1767_v31 = vsub.f32 %v7719_v3, %v1627_v4 }
 0x43a   : > { %v1642_v34 = vpop.xlane.xlu1 %1641 }
 0x43b   : > { %v1856_v59 = vmul.f32 1.442695, %v1767_v31  ;;  %v1772_v42 = vsub.f32 %v7735_v16, %v1642_v34 }
 0x43c   : > { %v1597_v21 = vpop.xlane.xlu0 %1596 }
 0x43d   : > { %v7993_v54 = vpop.eup %6669  ;;  %6677 = vpow2.f32 %v1856_v59  ;;  %v1866_v38 = vmul.f32 1.442695, %v1772_v42  ;;  %v1757_v26 = vsub.f32 %v7681_v44, %v1597_v21 }
 0x43e   : > { %v7996_v50 = vpop.eup %6671  ;;  %v7998_v39 = vpop.xlane.xlu1 %1587  ;;  %v2012_v3 = vsel %vm1549_vm1, %v7993_v54, 0.0 }
 0x43f   : > { %v8002_v58 = vpop.eup %6673  ;;  %6679 = vpow2.f32 %v1866_v38  ;;  %v1836_v14 = vmul.f32 1.442695, %v1757_v26  ;;  %2013 = vadd.xlane.f32.xlu1 %v2012_v3  ;;  %v1958_v44 = vsel %vm1549_vm1, %v7996_v50, 0.0 }
 0x440   : > { %v1645_v16 = vpop.xlane.xlu0 %1644  ;;  %v2015_v62 = vsel %vm1549_vm1, %v8002_v58, 0.0 }
 0x441   : > { %v1773_v46 = vsub.f32 %v7741_v19, %v1645_v16  ;;  %2016 = vadd.xlane.f32.xlu0 %v2015_v62  ;;  %6681 = vpow2.f32 %v1836_v14 }
 0x442   : > { %v8011_v31 = vpop.xlane.xlu1 %1635 }
 0x443   : > { %v8009_v41 = vpop.eup %6675  ;;  %v1868_v4 = vmul.f32 1.442695, %v1773_v46  ;;  %1959 = vadd.xlane.f32.xlu1 %v1958_v44 }
 0x444   : > { %v1591_v34 = vpop.xlane.xlu0 %1590  ;;  %v1961_v59 = vsel %vm1549_vm1, %v8009_v41, 0.0 }
 0x445   : > { %v1755_v42 = vsub.f32 %v7683_v45, %v1591_v34  ;;  %1962 = vadd.xlane.f32.xlu0 %v1961_v59  ;;  %6683 = vpow2.f32 %v1868_v4 }
 0x446   : > { %v8023_v16 = vpop.xlane.xlu1 %1605 }
 0x447   : > { %v8016_v21 = vpop.eup %6677  ;;  %v1832_v19 = vmul.f32 1.442695, %v1755_v42 }
 0x448   : > { %9525 = vst [vmem:[#allocation47_spill] sm:$0xff] %v8016_v21  ;;  %v1639_v38 = vpop.xlane.xlu0 %1638  ;;  %v2009_v26 = vsel %vm1549_vm1, %v8016_v21, 0.0 }
 0x449   : > { %v8020_v3 = vpop.eup %6679  ;;  %v1771_v14 = vsub.f32 %v7743_v20, %v1639_v38  ;;  %2010 = vadd.xlane.f32.xlu0 %v2009_v26  ;;  %6685 = vpow2.f32 %v1832_v19 }
 0x44a   : > { %9526 = vst [vmem:[#allocation48_spill] sm:$0xff] %v8020_v3  ;;  %v2024_v45 = vsel %vm1549_vm1, %v8020_v3, 0.0 }
 0x44b   : > { %v1864_v62 = vmul.f32 1.442695, %v1771_v14  ;;  %v8027_v44 = vpop.eup %6681 }
 0x44c   : > { %v1609_v46 = vpop.xlane.xlu0 %1608  ;;  %v1979_v20 = vsel %vm1549_vm1, %v8027_v44, 0.0 }
 0x44d   : > { %v1761_v4 = vsub.f32 %v7693_v51, %v1609_v46  ;;  %2025 = vadd.xlane.f32.xlu0 %v2024_v45  ;;  %6687 = vpow2.f32 %v1864_v62 }
 0x44e   : > { %v8030_v34 = vpop.xlane.xlu1 %1677 }
 0x44f   : > { %v1844_v59 = vmul.f32 1.442695, %v1761_v4  ;;  %v8034_v38 = vpop.eup %6683 }
 0x450   : > { %v1681_v42 = vpop.xlane.xlu0 %1680  ;;  %9527 = vst [vmem:[#allocation49_spill] sm:$0xff] %v8034_v38  ;;  %v2027_v51 = vsel %vm1549_vm1, %v8034_v38, 0.0 }
 0x451   : > { %v1785_v19 = vsub.f32 %v7803_v35, %v1681_v42  ;;  %1980 = vadd.xlane.f32.xlu0 %v1979_v20  ;;  %6689 = vpow2.f32 %v1844_v59  ;;  %v9528_v42 = vmov 0.0  }
 0x452   : > { %v8037_v26 = vpop.xlane.xlu1 %1599  ;;  %6270 = vmatprep.mubr.msk.bf16.mxu1 %vm7081_vm2, %v9528_v42  ;;  %6282 = vmatprep.mubr.msk.bf16.mxu0 %vm7081_vm2, %v9528_v42 }
 0x453   : > { %v1892_v14 = vmul.f32 1.442695, %v1785_v19  ;;  %v8043_v62 = vpop.eup %6685 }
 0x454   : > { %v1603_v17 = vpop.xlane.xlu0 %1602  ;;  %798 = vrot.lane.b32.xlu1 %v7360_v6, %s7077_s25  ;;  %v1973_v59 = vsel %vm1549_vm1, %v8043_v62, 0.0 }
 0x455   : > { %v1759_v46 = vsub.f32 %v7695_v53, %v1603_v17  ;;  %2028 = vadd.xlane.f32.xlu0 %v2027_v51  ;;  %6691 = vpow2.f32 %v1892_v14 }
 0x456   : > { %v8046_v45 = vpop.xlane.xlu1 %1671 }
 0x457   : > { %v1840_v35 = vmul.f32 1.442695, %v1759_v46  ;;  %v8054_v6 = vpop.eup %6687 }
 0x458   : > { %v1675_v4 = vpop.xlane.xlu0 %1674  ;;  %v2021_v51 = vsel %vm1549_vm1, %v8054_v6, 0.0 }
 0x459   : > { %v1783_v53 = vsub.f32 %v7805_v40, %v1675_v4  ;;  %1974 = vadd.xlane.f32.xlu0 %v1973_v59  ;;  %6693 = vpow2.f32 %v1840_v35 }
 0x45a   : > { %v1618_v17 = vpop.xlane.xlu1 %1617 }
 0x45b   : > { %v1888_v20 = vmul.f32 1.442695, %v1783_v53  ;;  %v1764_v19 = vsub.f32 %v7701_v56, %v1618_v17  ;;  %v8062_v46 = vpop.eup %6689  ;;  %v1766_v56 = vsub.f32 %v7713_v63, %v7978_v23 }
 0x45c   : > { %v8058_v14 = vpop.xlane.xlu0 %1620  ;;  %v1991_v35 = vsel %vm1549_vm1, %v8062_v46, 0.0 }
 0x45d   : > { %2022 = vadd.xlane.f32.xlu0 %v2021_v51  ;;  %6695 = vpow2.f32 %v1888_v20  ;;  %v1850_v38 = vmul.f32 1.442695, %v1764_v19  ;;  %v1854_v19 = vmul.f32 1.442695, %v1766_v56  ;;  %v1756_v51 = vsub.f32 %v7677_v43, %v7985_v15 }
 0x45e   : > { %v1690_v3 = vpop.xlane.xlu1 %1689  ;;  %v1754_v56 = vsub.f32 %v7679_v0, %v7998_v39 }
 0x45f   : > { %v1788_v21 = vsub.f32 %v7815_v27, %v1690_v3  ;;  %v8067_v4 = vpop.eup %6691  ;;  %6697 = vpow2.f32 %v1850_v38 }
 0x460   : > { %v1693_v40 = vpop.xlane.xlu0 %1692  ;;  %v2063_v27 = vsel %vm1549_vm1, %v8067_v4, 0.0 }
 0x461   : > { %1992 = vadd.xlane.f32.xlu0 %v1991_v35  ;;  %v1898_v53 = vmul.f32 1.442695, %v1788_v21  ;;  %v1789_v17 = vsub.f32 %v7821_v32, %v1693_v40  ;;  %v1834_v40 = vmul.f32 1.442695, %v1756_v51 }
 0x462   : > { %v8071_v59 = vpop.xlane.xlu1 %1611 }
 0x463   : > { %v8076_v3 = vpop.eup %6693  ;;  %6699 = vpow2.f32 %v1898_v53  ;;  %v1900_v63 = vmul.f32 1.442695, %v1789_v17 }
 0x464   : > { %v1615_v20 = vpop.xlane.xlu0 %1614  ;;  %v1985_v32 = vsel %vm1549_vm1, %v8076_v3, 0.0  ;;  %6701 = vpow2.f32 %v1854_v19  ;;  %v9529_v19 = vld [vmem:[#allocation20_spill] sm:$0xff] }
 0x465   : > { %2064 = vadd.xlane.f32.xlu0 %v2063_v27  ;;  %v1763_v23 = vsub.f32 %v7707_v60, %v1615_v20  ;;  %6703 = vpow2.f32 %v1900_v63  ;;  %v1830_v20 = vmul.f32 1.442695, %v1754_v56  ;;  %v1770_v51 = vsub.f32 %v9529_v19, %v8011_v31 }
 0x466   : > { %v8080_v35 = vpop.xlane.xlu1 %1683  ;;  %6705 = vpow2.f32 %v1834_v40  ;;  %v9531_v40 = vld [vmem:[#allocation14_spill] sm:$0xff] }
 0x467   : > { %v8085_v38 = vpop.eup %6695  ;;  %v1848_v43 = vmul.f32 1.442695, %v1763_v23  ;;  %v1760_v56 = vsub.f32 %v9531_v40, %v8023_v16 }
 0x468   : > { %v1687_v21 = vpop.xlane.xlu0 %1686  ;;  %v2057_v60 = vsel %vm1549_vm1, %v8085_v38, 0.0 }
 0x469   : > { %1986 = vadd.xlane.f32.xlu0 %v1985_v32  ;;  %v1787_v15 = vsub.f32 %v7825_v55, %v1687_v21  ;;  %v8094_v17 = vpop.eup %6697  ;;  %6707 = vpow2.f32 %v1848_v43  ;;  %v1862_v21 = vmul.f32 1.442695, %v1770_v51  ;;  %v9533_v51 = vld [vmem:[#allocation27_spill] sm:$0xff] }
 0x46a   : > { %v8089_v27 = vpop.xlane.xlu1 %1653  ;;  %v2000_v55 = vsel %vm1549_vm1, %v8094_v17, 0.0  ;;  %6709 = vpow2.f32 %v1830_v20  ;;  %v1842_v20 = vmul.f32 1.442695, %v1760_v56  ;;  %v1784_v16 = vsub.f32 %v9533_v51, %v8030_v34 }
 0x46b   : > { %v1896_v0 = vmul.f32 1.442695, %v1787_v15 }
 0x46c   : > { %v1657_v53 = vpop.xlane.xlu0 %1656  ;;  %v1890_v34 = vmul.f32 1.442695, %v1784_v16 }
 0x46d   : > { %2058 = vadd.xlane.f32.xlu0 %v2057_v60  ;;  %v1777_v39 = vsub.f32 %v7729_v7, %v1657_v53  ;;  %v8103_v23 = vpop.eup %6699  ;;  %6711 = vpow2.f32 %v1896_v0 }
 0x46e   : > { %v8098_v32 = vpop.xlane.xlu1 %1725  ;;  %9530 = vst [vmem:[#allocation20_spill] sm:$0xff] %v8103_v23  ;;  %v8110_v15 = vpop.eup %6701  ;;  %v2072_v53 = vsel %vm1549_vm1, %v8103_v23, 0.0  ;;  %6713 = vpow2.f32 %v1862_v21 }
 0x46f   : > { %v1876_v31 = vmul.f32 1.442695, %v1777_v39  ;;  %v8114_v19 = vpop.eup %6703  ;;  %v2006_v39 = vsel %vm1549_vm1, %v8110_v15, 0.0 }
 0x470   : > { %v1729_v63 = vpop.xlane.xlu0 %1728  ;;  %9532 = vst [vmem:[#allocation14_spill] sm:$0xff] %v8114_v19  ;;  %v2075_v21 = vsel %vm1549_vm1, %v8114_v19, 0.0 }
 0x471   : > { %2001 = vadd.xlane.f32.xlu0 %v2000_v55  ;;  %v1801_v43 = vsub.f32 %v7841_v28, %v1729_v63  ;;  %6715 = vpow2.f32 %v1876_v31  ;;  %v8123_v63 = vpop.eup %6705  ;;  %v9534_v31 = vld [vmem:[#allocation15_spill] sm:$0xff] }
 0x472   : > { %v8107_v60 = vpop.xlane.xlu1 %1647  ;;  %6717 = vpow2.f32 %v1842_v20  ;;  %v1976_v51 = vsel %vm1549_vm1, %v8123_v63, 0.0 }
 0x473   : > { %v1924_v0 = vmul.f32 1.442695, %v1801_v43  ;;  %v8127_v56 = vpop.eup %6707  ;;  %v1758_v43 = vsub.f32 %v9534_v31, %v8037_v26 }
 0x474   : > { %v1651_v7 = vpop.xlane.xlu0 %1650  ;;  %v1997_v20 = vsel %vm1549_vm1, %v8127_v56, 0.0 }
 0x475   : > { %2073 = vadd.xlane.f32.xlu0 %v2072_v53  ;;  %v1775_v28 = vsub.f32 %v7731_v9, %v1651_v7  ;;  %6719 = vpow2.f32 %v1924_v0  ;;  %v1838_v26 = vmul.f32 1.442695, %v1758_v43  ;;  %v9536_v0 = vld [vmem:[#allocation28_spill] sm:$0xff] }
 0x476   : > { %v8118_v55 = vpop.xlane.xlu1 %1719  ;;  %6721 = vpow2.f32 %v1890_v34 }
 0x477   : > { %v1872_v9 = vmul.f32 1.442695, %v1775_v28  ;;  %v1782_v28 = vsub.f32 %v9536_v0, %v8046_v45 }
 0x478   : > { %v1723_v40 = vpop.xlane.xlu0 %1722  ;;  %2007 = vadd.xlane.f32.xlu1 %v2006_v39  ;;  %v8134_v39 = vpop.eup %6709 }
 0x479   : > { %2076 = vadd.xlane.f32.xlu0 %v2075_v21  ;;  %v1799_v7 = vsub.f32 %v7843_v61, %v1723_v40  ;;  %v8140_v16 = vpop.eup %6711  ;;  %6723 = vpow2.f32 %v1872_v9  ;;  %v1970_v21 = vsel %vm1549_vm1, %v8134_v39, 0.0  ;;  %v1886_v45 = vmul.f32 1.442695, %v1782_v28  ;;  %v9537_v9 = vld [vmem:[#allocation16_spill] sm:$0xff] }
 0x47a   : > { %v1666_v53 = vpop.xlane.xlu1 %1665  ;;  %9535 = vst [vmem:[#allocation27_spill] sm:$0xff] %v8140_v16  ;;  %v8147_v31 = vpop.eup %6713  ;;  %v2069_v34 = vsel %vm1549_vm1, %v8140_v16, 0.0  ;;  %6725 = vpow2.f32 %v1838_v26 }
 0x47b   : > { %v1920_v61 = vmul.f32 1.442695, %v1799_v7  ;;  %v1780_v40 = vsub.f32 %v7747_v12, %v1666_v53  ;;  %v8153_v43 = vpop.eup %6715  ;;  %v1762_v12 = vsub.f32 %v9537_v9, %v8071_v59  ;;  %v9539_v59 = vld [vmem:[#allocation30_spill] sm:$0xff] }
 0x47c   : > { %v8136_v23 = vpop.xlane.xlu0 %1731  ;;  %1977 = vadd.xlane.f32.xlu1 %v1976_v51  ;;  %v8160_v0 = vpop.eup %6717  ;;  %v2039_v16 = vsel %vm1549_vm1, %v8153_v43, 0.0  ;;  %v1786_v28 = vsub.f32 %v9539_v59, %v8080_v35 }
 0x47d   : > { %1998 = vadd.xlane.f32.xlu0 %v1997_v20  ;;  %6727 = vpow2.f32 %v1920_v61  ;;  %v1882_v53 = vmul.f32 1.442695, %v1780_v40  ;;  %v2018_v20 = vsel %vm1549_vm1, %v8147_v31, 0.0  ;;  %v1846_v26 = vmul.f32 1.442695, %v1762_v12 }
 0x47e   : > { %v1738_v51 = vpop.xlane.xlu1 %1737  ;;  %6729 = vpow2.f32 %v1886_v45  ;;  %v1988_v40 = vsel %vm1549_vm1, %v8160_v0, 0.0  ;;  %v9540_v45 = vld [vmem:[#allocation17_spill] sm:$0xff]  ;;  %v1894_v12 = vmul.f32 1.442695, %v1786_v28 }
 0x47f   : > { %v1804_v7 = vsub.f32 %v7855_v48, %v1738_v51  ;;  %6731 = vpow2.f32 %v1882_v53  ;;  %v1765_v35 = vsub.f32 %v9540_v45, %v8058_v14 }
 0x480   : > { %v8149_v19 = vpop.xlane.xlu0 %1668  ;;  %1971 = vadd.xlane.f32.xlu1 %v1970_v21  ;;  %6733 = vpow2.f32 %v1846_v26  ;;  %v9542_v26 = vld [vmem:[#allocation18_spill] sm:$0xff] }
 0x481   : > { %2070 = vadd.xlane.f32.xlu0 %v2069_v34  ;;  %v8164_v34 = vpop.eup %6719  ;;  %v1930_v48 = vmul.f32 1.442695, %v1804_v7  ;;  %v1852_v14 = vmul.f32 1.442695, %v1765_v35  ;;  %v1776_v28 = vsub.f32 %v9542_v26, %v8089_v27  ;;  %v9544_v27 = vld [vmem:[#allocation32_spill] sm:$0xff]  ;;  %v9546_v26 = vld [vmem:[#allocation19_spill] sm:$0xff] }
 0x482   : > { %9538 = vst [vmem:[#allocation15_spill] sm:$0xff] %v8164_v34  ;;  %v8171_v51 = vpop.eup %6721 }
 0x483   : > { %6735 = vpow2.f32 %v1930_v48  ;;  %v2060_v7 = vsel %vm1549_vm1, %v8171_v51, 0.0  ;;  %v1874_v35 = vmul.f32 1.442695, %v1776_v28  ;;  %v1774_v28 = vsub.f32 %v9546_v26, %v8107_v60 }
 0x484   : > { %v1741_v21 = vpop.xlane.xlu0 %1740  ;;  %2019 = vadd.xlane.f32.xlu1 %v2018_v20  ;;  %v2111_v20 = vsel %vm1549_vm1, %v8164_v34, 0.0  ;;  %6737 = vpow2.f32 %v1894_v12  ;;  %v1800_v12 = vsub.f32 %v9544_v27, %v8098_v32  ;;  %v1660_v32 = vpop.xlane.xlu1 %1659  ;;  %v9548_v27 = vld [vmem:[#allocation34_spill] sm:$0xff] }
 0x485   : > { %2040 = vadd.xlane.f32.xlu0 %v2039_v16  ;;  %v1805_v61 = vsub.f32 %v7861_v10, %v1741_v21  ;;  %v8175_v16 = vpop.eup %6723 }
 0x486   : > { %v8182_v21 = vpop.eup %6725 }
 0x487   : > { %v1932_v10 = vmul.f32 1.442695, %v1805_v61  ;;  %v1982_v61 = vsel %vm1549_vm1, %v8182_v21, 0.0 }
 0x488   : > { %v1663_v9 = vpop.xlane.xlu0 %1662  ;;  %1989 = vadd.xlane.f32.xlu1 %v1988_v40  ;;  %v2033_v40 = vsel %vm1549_vm1, %v8175_v16, 0.0 }
 0x489   : > { %2112 = vadd.xlane.f32.xlu0 %v2111_v20  ;;  %v1779_v53 = vsub.f32 %v7757_v13, %v1663_v9  ;;  %v8186_v20 = vpop.eup %6727  ;;  %6739 = vpow2.f32 %v1932_v10 }
 0x48a   : > { %9541 = vst [vmem:[#allocation28_spill] sm:$0xff] %v8186_v20  ;;  %v8193_v9 = vpop.eup %6729  ;;  %v2105_v45 = vsel %vm1549_vm1, %v8186_v20, 0.0  ;;  %6741 = vpow2.f32 %v1852_v14  ;;  %v1922_v14 = vmul.f32 1.442695, %v1800_v12  ;;  %v1798_v12 = vsub.f32 %v9548_v27, %v8118_v55 }
 0x48b   : > { %v1880_v13 = vmul.f32 1.442695, %v1779_v53 }
 0x48c   : > { %v1735_v59 = vpop.xlane.xlu0 %1734  ;;  %2061 = vadd.xlane.f32.xlu1 %v2060_v7  ;;  %v8197_v7 = vpop.eup %6731 }
 0x48d   : > { %2034 = vadd.xlane.f32.xlu0 %v2033_v40  ;;  %v1803_v48 = vsub.f32 %v7865_v57, %v1735_v59  ;;  %9543 = vst [vmem:[#allocation16_spill] sm:$0xff] %v8197_v7  ;;  %6743 = vpow2.f32 %v1880_v13  ;;  %v2054_v57 = vsel %vm1549_vm1, %v8193_v9, 0.0  ;;  %v8203_v53 = vpop.eup %6733  ;;  %v2048_v59 = vsel %vm1549_vm1, %v8197_v7, 0.0  ;;  %v9553_v7 = vld [vmem:[#allocation23_spill] sm:$0xff] }
 0x48e   : > { %v8207_v40 = vpop.eup %6735  ;;  %6745 = vpow2.f32 %v1874_v35  ;;  %v1994_v13 = vsel %vm1549_vm1, %v8203_v53, 0.0  ;;  %v1870_v35 = vmul.f32 1.442695, %v1774_v28 }
 0x48f   : > { %v1928_v10 = vmul.f32 1.442695, %v1803_v48  ;;  %9545 = vst [vmem:[#allocation30_spill] sm:$0xff] %v8207_v40  ;;  %v8213_v48 = vpop.eup %6737 }
 0x490   : > { %1983 = vadd.xlane.f32.xlu1 %v1982_v61  ;;  %v2120_v61 = vsel %vm1549_vm1, %v8207_v40, 0.0  ;;  %v2066_v60 = vsel %vm1549_vm1, %v8213_v48, 0.0 }
 0x491   : > { %2106 = vadd.xlane.f32.xlu0 %v2105_v45  ;;  %6747 = vpow2.f32 %v1928_v10 }
 0x492   : > { %6749 = vpow2.f32 %v1922_v14  ;;  %v9550_v14 = vld [vmem:[#allocation22_spill] sm:$0xff] }
 0x493   : > { %v8217_v45 = vpop.eup %6739  ;;  %6751 = vpow2.f32 %v1870_v35  ;;  %v1778_v28 = vsub.f32 %v9550_v14, %v1660_v32 }
 0x494   : > { %2055 = vadd.xlane.f32.xlu1 %v2054_v57  ;;  %9547 = vst [vmem:[#allocation17_spill] sm:$0xff] %v8217_v45  ;;  %v8223_v10 = vpop.eup %6741  ;;  %v1942_v57 = vpop.xlane.xlu1 %1941 }
 0x495   : > { %2049 = vadd.xlane.f32.xlu0 %v2048_v59  ;;  %v2123_v59 = vsel %vm1549_vm1, %v8217_v45, 0.0  ;;  %v2003_v55 = vsel %vm1549_vm1, %v8223_v10, 0.0  ;;  %v9552_v45 = vld [vmem:[#allocation37_spill] sm:$0xff]  ;;  %v1878_v35 = vmul.f32 1.442695, %v1778_v28 }
 0x496   : > { %v1802_v34 = vsub.f32 %v9552_v45, %v8136_v23 }
 0x497   : > { %v8227_v26 = vpop.eup %6743 }
 0x498   : > { %1995 = vadd.xlane.f32.xlu1 %v1994_v13  ;;  %9549 = vst [vmem:[#allocation18_spill] sm:$0xff] %v8227_v26  ;;  %v1918_v13 = vmul.f32 1.442695, %v1798_v12  ;;  %v1926_v20 = vmul.f32 1.442695, %v1802_v34 }
 0x499   : > { %2121 = vadd.xlane.f32.xlu0 %v2120_v61  ;;  %v8232_v61 = vpop.eup %6745 }
 0x49a   : > { %6753 = vpow2.f32 %v1918_v13  ;;  %v2036_v32 = vsel %vm1549_vm1, %v8232_v61, 0.0 }
 0x49b   : > { %v8236_v40 = vpop.eup %6747  ;;  %6755 = vpow2.f32 %v1878_v35 }
 0x49c   : > { %2067 = vadd.xlane.f32.xlu1 %v2066_v60  ;;  %v2045_v60 = vsel %vm1549_vm1, %v8227_v26, 0.0  ;;  %9551 = vst [vmem:[#allocation32_spill] sm:$0xff] %v8236_v40  ;;  %v8242_v12 = vpop.eup %6749  ;;  %v1781_v26 = vsub.f32 %v9553_v7, %v8149_v19 }
 0x49d   : > { %2124 = vadd.xlane.f32.xlu0 %v2123_v59  ;;  %v2108_v23 = vsel %vm1549_vm1, %v8242_v12, 0.0  ;;  %v8250_v45 = vpop.eup %6751 }
 0x49e   : > { %v2030_v34 = vsel %vm1549_vm1, %v8250_v45, 0.0 }
 0x4a0   : > { %2004 = vadd.xlane.f32.xlu1 %v2003_v55  ;;  %v1936_v27 = vpop.xlane.xlu1 %1935  ;;  %v2117_v55 = vsel %vm1549_vm1, %v8236_v40, 0.0 }
 0x4a1   : > { %2046 = vadd.xlane.f32.xlu0 %v2045_v60  ;;  %6757 = vrcp.f32 %v1936_v27  ;;  %v1884_v60 = vmul.f32 1.442695, %v1781_v26 }
 0x4a2   : > { %6759 = vpow2.f32 %v1926_v20 }
 0x4a4   : > { %v1945_v59 = vpop.xlane.xlu0 %1944  ;;  %2037 = vadd.xlane.f32.xlu1 %v2036_v32  ;;  %v1702_v14 = vpop.xlane.xlu1 %1701 }
 0x4a5   : > { %2118 = vadd.xlane.f32.xlu0 %v2117_v55  ;;  %v1792_v32 = vsub.f32 %v7767_v36, %v1702_v14  ;;  %v8255_v19 = vpop.eup %6753 }
 0x4a6   : > { %v2102_v36 = vsel %vm1549_vm1, %v8255_v19, 0.0  ;;  %v8261_v14 = vpop.eup %6755 }
 0x4a7   : > { %v1906_v55 = vmul.f32 1.442695, %v1792_v32 }
 0x4a8   : > { %v1939_v13 = vpop.xlane.xlu0 %1938  ;;  %2109 = vadd.xlane.f32.xlu1 %v2108_v23  ;;  %v1696_v28 = vpop.xlane.xlu1 %1695 }
 0x4a9   : > { %6761 = vrcp.f32 %v1939_v13  ;;  %v1790_v20 = vsub.f32 %v7769_v37, %v1696_v28  ;;  %v2042_v37 = vsel %vm1549_vm1, %v8261_v14, 0.0 }
 0x4aa   : > { %6763 = vrcp.f32 %v1945_v59 }
 0x4ab   : > { %6765 = vpow2.f32 %v1884_v60  ;;  %v1902_v60 = vmul.f32 1.442695, %v1790_v20 }
 0x4ac   : > { %v1705_v7 = vpop.xlane.xlu0 %1704  ;;  %2031 = vadd.xlane.f32.xlu1 %v2030_v34  ;;  %v1954_v35 = vpop.xlane.xlu1 %1953  ;;  %6767 = vrcp.f32 %v1942_v57 }
 0x4ad   : > { %v1793_v27 = vsub.f32 %v7773_v2, %v1705_v7  ;;  %v6758_v34 = vpop.eup %6757 }
 0x4ae   : > { %v8264_v2 = vpop.eup %6759 }
 0x4af   : > { %v1908_v26 = vmul.f32 1.442695, %v1793_v27  ;;  %9554 = vst [vmem:[#allocation19_spill] sm:$0xff] %v8264_v2 }
 0x4b0   : > { %v1699_v23 = vpop.xlane.xlu0 %1698  ;;  %2103 = vadd.xlane.f32.xlu1 %v2102_v36  ;;  %v1948_v13 = vpop.xlane.xlu1 %1947 }
 0x4b1   : > { %6769 = vpow2.f32 %v1908_v26  ;;  %v1791_v59 = vsub.f32 %v7775_v47, %v1699_v23  ;;  %v2254_v26 = vmul.f32 %v6758_v34, %v7925_v24  ;;  %v2114_v23 = vsel %vm1549_vm1, %v8264_v2, 0.0 }
 0x4b2   : > { %6771 = vpow2.f32 %v1906_v55 }
 0x4b3   : > { %v1904_v57 = vmul.f32 1.442695, %v1791_v59  ;;  %v6762_v28 = vpop.eup %6761 }
 0x4b4   : > { %v1957_v32 = vpop.xlane.xlu0 %1956  ;;  %2043 = vadd.xlane.f32.xlu1 %v2042_v37  ;;  %v1714_v7 = vpop.xlane.xlu1 %1713  ;;  %v2255_v47 = vmul.f32 %v6762_v28, %v7937_v8 }
 0x4b5   : > { %6773 = vpow2.f32 %v1904_v57  ;;  %v1796_v27 = vsub.f32 %v7785_v1, %v1714_v7  ;;  %v6764_v36 = vpop.eup %6763 }
 0x4b6   : > { %6775 = vpow2.f32 %v1902_v60  ;;  %v8271_v55 = vpop.eup %6765  ;;  %v2318_v59 = vpack.c.bf16 %v2255_v47, %v2254_v26  ;;  %v2257_v8 = vmul.f32 %v6764_v36, %v7930_v29 }
 0x4b7   : > { %v1914_v20 = vmul.f32 1.442695, %v1796_v27  ;;  %v6768_v40 = vpop.eup %6767  ;;  %6777 = vrcp.f32 %v1948_v13  ;;  %v2051_v28 = vsel %vm1549_vm1, %v8271_v55, 0.0  ;;  %v9555_v13 = vld [vmem:[#allocation44_spill] sm:$0xff] }
 0x4b8   : > { %v1951_v37 = vpop.xlane.xlu0 %1950  ;;  %2115 = vadd.xlane.f32.xlu1 %v2114_v23  ;;  %v1711_v57 = vpop.xlane.xlu1 %1710  ;;  %v2482_v24 = vsel %vm1549_vm1, %v2318_v59, 0  ;;  %v2256_v7 = vmul.f32 %v6768_v40, %v9555_v13 }
 0x4b9   : > { %6779 = vpow2.f32 %v1914_v20  ;;  %v1795_v1 = vsub.f32 %v7793_v18, %v1711_v57  ;;  %6263 = vmatpush3.bf16.xpose.msra.mxu1 %v2482_v24 }
 0x4ba   : > { %6781 = vrcp.f32 %v1951_v37  ;;  %6264 = vmatprep.subr.bf16.mxu1 %v9528_v42  ;;  %v2319_v47 = vpack.c.bf16 %v2257_v8, %v2256_v7 }
 0x4bb   : > { %v8278_v34 = vpop.eup %6769  ;;  %v1912_v60 = vmul.f32 1.442695, %v1795_v1  ;;  %6783 = vrcp.f32 %v1957_v32 }
 0x4bc   : > { %v8284_v27 = vpop.eup %6771  ;;  %v1708_v18 = vpop.xlane.xlu0 %1707  ;;  %2052 = vadd.xlane.f32.xlu1 %v2051_v28  ;;  %v2087_v29 = vsel %vm1549_vm1, %v8278_v34, 0.0 }
 0x4bd   : > { %6785 = vpow2.f32 %v1912_v60  ;;  %v1794_v26 = vsub.f32 %v7787_v52, %v1708_v18  ;;  %2088 = vadd.xlane.f32.xlu0 %v2087_v29  ;;  %v2084_v40 = vsel %vm1549_vm1, %v8284_v27, 0.0  ;;  %v2485_v52 = vsel %vm1549_vm1, %v2319_v47, 0 }
 0x4be   : > { %6787 = vrcp.f32 %v1954_v35 }
 0x4bf   : > { %v8289_v36 = vpop.eup %6773  ;;  %v1910_v20 = vmul.f32 1.442695, %v1794_v26  ;;  %v1966_v26 = vpop.xlane.xlu1 %1965 }
 0x4c0   : > { %v8293_v23 = vpop.eup %6775  ;;  %v1717_v32 = vpop.xlane.xlu0 %1716  ;;  %2085 = vadd.xlane.f32.xlu1 %v2084_v40  ;;  %v2081_v59 = vsel %vm1549_vm1, %v8289_v36, 0.0 }
 0x4c1   : > { %6789 = vpow2.f32 %v1910_v20  ;;  %v1797_v37 = vsub.f32 %v7789_v5, %v1717_v32  ;;  %2082 = vadd.xlane.f32.xlu0 %v2081_v59  ;;  %v6778_v35 = vpop.eup %6777  ;;  %6265 = vmatpush3.bf16.xpose.msra.mxu1 %v2485_v52  ;;  %v2078_v24 = vsel %vm1549_vm1, %v8293_v23, 0.0 }
 0x4c2   : > { %6266 = vmatprep.subr.bf16.mxu1 %v9528_v42  ;;  %v2258_v5 = vmul.f32 %v6778_v35, %v7950_v22 }
 0x4c3   : > { %v8299_v57 = vpop.eup %6779  ;;  %v1916_v1 = vmul.f32 1.442695, %v1797_v37 }
 0x4c4   : > { %9556 = vst [vmem:[#allocation34_spill] sm:$0xff] %v8299_v57  ;;  %v6782_v8 = vpop.eup %6781  ;;  %2079 = vadd.xlane.f32.xlu1 %v2078_v24  ;;  %v2096_v60 = vsel %vm1549_vm1, %v8299_v57, 0.0  ;;  %v1969_v32 = vpop.xlane.xlu0 %1968 }
 0x4c5   : > { %6791 = vpow2.f32 %v1916_v1  ;;  %2097 = vadd.xlane.f32.xlu0 %v2096_v60  ;;  %v2259_v28 = vmul.f32 %v6782_v8, %v7963_v30  ;;  %v6784_v13 = vpop.eup %6783 }
 0x4c6   : > { %v2261_v40 = vmul.f32 %v6784_v13, %v7957_v25  ;;  %v9559_v13 = vld [vmem:[#allocation12_spill] sm:$0xff] }
 0x4c7   : > { %v8308_v7 = vpop.eup %6785  ;;  %v2320_v18 = vpack.c.bf16 %v2259_v28, %v2258_v5 }
 0x4c8   : > { %9557 = vst [vmem:[#allocation22_spill] sm:$0xff] %v8308_v7  ;;  %v6788_v29 = vpop.eup %6787  ;;  %v2093_v47 = vsel %vm1549_vm1, %v8308_v7, 0.0 }
 0x4c9   : > { %v2488_v20 = vsel %vm1549_vm1, %v2320_v18, 0  ;;  %2094 = vadd.xlane.f32.xlu0 %v2093_v47  ;;  %v2260_v22 = vmul.f32 %v6788_v29, %v7944_v49 }
 0x4ca   : > { %6267 = vmatpush3.bf16.xpose.msra.mxu1 %v2488_v20 }
 0x4cb   : > { %v8314_v59 = vpop.eup %6789  ;;  %6268 = vmatprep.subr.bf16.mxu1 %v9528_v42  ;;  %v2321_v52 = vpack.c.bf16 %v2261_v40, %v2260_v22 }
 0x4cc   : > { %v2014_v30 = vpop.xlane.xlu1 %2013  ;;  %v2090_v37 = vsel %vm1549_vm1, %v8314_v59, 0.0 }
 0x4cd   : > { %6793 = vrcp.f32 %v2014_v30  ;;  %2091 = vadd.xlane.f32.xlu1 %v2090_v37  ;;  %v2491_v8 = vsel %vm1549_vm1, %v2321_v52, 0 }
 0x4ce   : > { %v2017_v35 = vpop.xlane.xlu0 %2016 }
 0x4cf   : > { %v8320_v1 = vpop.eup %6791  ;;  %6795 = vrcp.f32 %v2017_v35 }
 0x4d0   : > { %9558 = vst [vmem:[#allocation37_spill] sm:$0xff] %v8320_v1  ;;  %v1960_v25 = vpop.xlane.xlu1 %1959  ;;  %v2099_v24 = vsel %vm1549_vm1, %v8320_v1, 0.0  ;;  %v9573_v1 = vld [vmem:[#allocation36_spill] sm:$0xff] }
 0x4d1   : > { %6797 = vrcp.f32 %v1960_v25  ;;  %2100 = vadd.xlane.f32.xlu1 %v2099_v24 }
 0x4d2   : > { %6269 = vmatpush3.bf16.xpose.msra.mxu1 %v2491_v8  ;;  %v1963_v49 = vpop.xlane.xlu0 %1962 }
 0x4d3   : > { %6799 = vrcp.f32 %v1963_v49  ;;  %6286 = vmatprep.subr.bf16.mxu1 %v9528_v42 }
 0x4d4   : > { %6801 = vrcp.f32 %v1969_v32 }
 0x4d5   : > { %6803 = vrcp.f32 %v1966_v26 }
 0x4d6   : > { %v8326_v60 = vpop.xlane.xlu0 %2010 }
 0x4d7   : > { %v6794_v5 = vpop.eup %6793 }
 0x4d8   : > { %v8333_v29 = vmul.f32 %v6794_v5, %v7993_v54 }
 0x4d9   : > { %v6796_v28 = vpop.eup %6795  ;;  %6271 = vmatmul.mubr.msk.bf16.vlgmr.msra.gmra.mrb[40].mxu1 %vm1549_vm1, %v9559_v13 }
 0x4da   : > { %v8330_v18 = vpop.xlane.xlu0 %2025  ;;  %v8336_v47 = vmul.f32 %v6796_v28, %v8002_v58  ;;  %6294 = vmatprep.mubr.msk.bf16.mxu1 %vm7081_vm2, %v9528_v42 }
 0x4db   : > { %v6798_v20 = vpop.eup %6797 }
 0x4dc   : > { %v2262_v22 = vmul.f32 %v6798_v20, %v7996_v50  ;;  %v9560_v20 = vld [vmem:[#allocation40_spill] sm:$0xff] }
 0x4dd   : > { %v6800_v26 = vpop.eup %6799 }
 0x4de   : > { %v1981_v32 = vpop.xlane.xlu0 %1980  ;;  %v2263_v30 = vmul.f32 %v6800_v26, %v8009_v41  ;;  %v6802_v37 = vpop.eup %6801  ;;  %v9561_v26 = vld [vmem:[#allocation41_spill] sm:$0xff] }
 0x4df   : > { %v6804_v54 = vpop.eup %6803  ;;  %v2265_v25 = vmul.f32 %v6802_v37, %v7982_v11  ;;  %v799_v37 = vpop.permute.xlu1 %798 }
 0x4e0   : > { %v2322_v52 = vpack.c.bf16 %v2263_v30, %v2262_v22  ;;  %v2264_v24 = vmul.f32 %v6804_v54, %v7969_v33  ;;  %v9562_v33 = vld [vmem:[#allocation21_spill] sm:$0xff]  ;;  %v9563_v22 = vld [vmem:[#allocation26_spill] sm:$0xff] }
 0x4e1   : > { %v9565_v54 = vld [vmem:[#allocation29_spill] sm:$0xff] }
 0x4e2   : > { %v8344_v35 = vpop.xlane.xlu0 %2028  ;;  %v2538_v58 = vsel %vm1549_vm1, %v2322_v52, 0  ;;  %v2323_v49 = vpack.c.bf16 %v2265_v25, %v2264_v24  ;;  %v9564_v52 = vld [vmem:[#allocation24_spill] sm:$0xff]  ;;  %v9566_v24 = vld [vmem:[#allocation25_spill] sm:$0xff] }
 0x4e3   : > { %6275 = vmatpush3.bf16.xpose.msra.mxu0 %v2538_v58 }
 0x4e4   : > { %6276 = vmatprep.subr.bf16.mxu0 %v9528_v42  ;;  %v2541_v50 = vsel %vm1549_vm1, %v2323_v49, 0  ;;  %v9567_v49 = vld [vmem:[#allocation43_spill] sm:$0xff] }
 0x4e6   : > { %v1975_v8 = vpop.xlane.xlu0 %1974 }
 0x4e7   : > { %6805 = vrcp.f32 %v1975_v8 }
 0x4ea   : > { %v8350_v5 = vpop.xlane.xlu0 %2022 }
 0x4eb   : > { %6277 = vmatpush3.bf16.xpose.msra.mxu0 %v2541_v50 }
 0x4ec   : > { %6278 = vmatprep.subr.bf16.mxu0 %v9528_v42 }
 0x4ee   : > { %v1993_v41 = vpop.xlane.xlu0 %1992 }
 0x4f2   : > { %v8354_v28 = vpop.xlane.xlu0 %2064 }
 0x4f6   : > { %v1987_v13 = vpop.xlane.xlu0 %1986  ;;  %2430 = vxpose.xlu0.c.b16.start [1/4] (short) (narrow) %v9560_v20, 16  ;;  %v9568_v20 = vld [vmem:[#allocation42_spill] sm:$0xff] }
 0x4fa   : > { %v8357_v11 = vpop.xlane.xlu0 %2058  ;;  %2431 = vxpose.xlu0.c.b16.cont [2/4] (short) (narrow) %v9561_v26, 16  ;;  %v9569_v26 = vld [vmem:[#allocation45_spill] sm:$0xff] }
 0x4fe   : > { %2414 = vxpose.xlu1.c.b16.start [1/4] (short) (narrow) %v9562_v33, 16  ;;  %2432 = vxpose.xlu0.c.b16.cont [3/4] (short) (narrow) %v9563_v22, 16  ;;  %v8362_v30 = vpop.xlane.xlu0 %2001 }
 0x502   : > { %2415 = vxpose.xlu1.c.b16.cont [2/4] (short) (narrow) %v9564_v52, 16  ;;  %2433 = vxpose.xlu0.c.b16.end [4/4] (short) (narrow) %v9565_v54, 16  ;;  %v8366_v58 = vpop.xlane.xlu0 %2073  ;;  %v9570_v52 = vld [vmem:[#allocation31_spill] sm:$0xff] }
 0x503   : > { %v9571_v54 = vld [vmem:[#allocation39_spill] sm:$0xff] }
 0x505   : > { %v2008_v25 = vpop.xlane.xlu1 %2007 }
 0x506   : > { %2416 = vxpose.xlu1.c.b16.cont [3/4] (short) (narrow) %v9566_v24, 16  ;;  %2462 = vxpose.xlu0.c.b16.start [1/4] (short) (narrow) %v9567_v49, 16  ;;  %v8372_v33 = vpop.xlane.xlu0 %2076  ;;  %v9572_v24 = vld [vmem:[#allocation33_spill] sm:$0xff] }
 0x509   : > { %v1978_v50 = vpop.xlane.xlu1 %1977 }
 0x50a   : > { %2417 = vxpose.xlu1.c.b16.end [4/4] (short) (narrow) %v9568_v20, 16  ;;  %2463 = vxpose.xlu0.c.b16.cont [2/4] (short) (narrow) %v9569_v26, 16  ;;  %v1999_v40 = vpop.xlane.xlu0 %1998  ;;  %v6806_v20 = vpop.eup %6805 }
 0x50d   : > { %v1972_v22 = vpop.xlane.xlu1 %1971 }
 0x50e   : > { %6807 = vrcp.f32 %v1972_v22  ;;  %2446 = vxpose.xlu1.c.b16.start [1/4] (short) (narrow) %v9570_v52, 16  ;;  %2464 = vxpose.xlu0.c.b16.cont [3/4] (short) (narrow) %v9571_v54, 16  ;;  %v8378_v26 = vpop.xlane.xlu0 %2070 }
 0x50f   : > { %6809 = vrcp.f32 %v1978_v50  ;;  %v2267_v50 = vmul.f32 %v6806_v20, %v8043_v62 }
 0x510   : > { %6811 = vrcp.f32 %v1981_v32  ;;  %v9574_v32 = vld [vmem:[#allocation46_spill] sm:$0xff] }
 0x511   : > { %v2020_v57 = vpop.xlane.xlu1 %2019  ;;  %6813 = vrcp.f32 %v2008_v25 }
 0x512   : > { %2447 = vxpose.xlu1.c.b16.cont [2/4] (short) (narrow) %v9572_v24, 16  ;;  %2465 = vxpose.xlu0.c.b16.end [4/4] (short) (narrow) %v799_v37, 16  ;;  %6815 = vrcp.f32 %v8326_v60  ;;  %v8386_v7 = vpop.xlane.xlu0 %2040 }
 0x513   : > { %6817 = vrcp.f32 %v1987_v13 }
 0x515   : > { %v1990_v49 = vpop.xlane.xlu1 %1989 }
 0x516   : > { %2448 = vxpose.xlu1.c.b16.cont [3/4] (short) (narrow) %v9573_v1, 16 }
 0x518   : > { %v6808_v8 = vpop.eup %6807 }
 0x519   : > { %v8380_v22 = vpop.xlane.xlu1 %2061  ;;  %v2266_v52 = vmul.f32 %v6808_v8, %v8134_v39  ;;  %v6810_v54 = vpop.eup %6809 }
 0x51a   : > { %2449 = vxpose.xlu1.c.b16.end [4/4] (short) (narrow) %v9574_v32, 16  ;;  %v6812_v24 = vpop.eup %6811  ;;  %v2268_v25 = vmul.f32 %v6810_v54, %v8123_v63  ;;  %v8392_v8 = vpop.xlane.xlu0 %2112 }
 0x51b   : > { %v2324_v37 = vpack.c.bf16 %v2267_v50, %v2266_v52  ;;  %v2269_v62 = vmul.f32 %v6812_v24, %v8027_v44  ;;  %v6814_v20 = vpop.eup %6813 }
 0x51c   : > { %v6816_v13 = vpop.eup %6815  ;;  %v2278_v32 = vmul.f32 %v6814_v20, %v8110_v15 }
 0x51d   : > { %v1984_v1 = vpop.xlane.xlu1 %1983  ;;  %v2544_v2 = vsel %vm1549_vm1, %v2324_v37, 0  ;;  %v2325_v60 = vpack.c.bf16 %v2269_v62, %v2268_v25  ;;  %v6818_v63 = vpop.eup %6817  ;;  %v9576_v62 = vld [vmem:[#allocation35_spill] sm:$0xff] }
 0x51e   : > { %6819 = vrcp.f32 %v1984_v1  ;;  %6279 = vmatpush3.bf16.xpose.msra.mxu0 %v2544_v2  ;;  %v9575_v2 = vld [vmem:[#allocation47_spill] sm:$0xff]  ;;  %v2271_v24 = vmul.f32 %v6818_v63, %v8076_v3 }
 0x51f   : > { %6280 = vmatprep.subr.bf16.mxu0 %v9528_v42  ;;  %6821 = vrcp.f32 %v1990_v49  ;;  %v2547_v50 = vsel %vm1549_vm1, %v2325_v60, 0  ;;  %v2279_v44 = vmul.f32 %v6816_v13, %v9575_v2 }
 0x520   : > { %6823 = vrcp.f32 %v1993_v41  ;;  %v2035_v41 = vpop.xlane.xlu0 %2034 }
 0x521   : > { %v2056_v39 = vpop.xlane.xlu1 %2055  ;;  %6825 = vrcp.f32 %v2020_v57  ;;  %v2330_v1 = vpack.c.bf16 %v2279_v44, %v2278_v32  ;;  %v9577_v44 = vpack.c.bf16 %v8336_v47, %v8333_v29 }
 0x524   : > { %v8409_v3 = vpop.xlane.xlu0 %2106 }
 0x525   : > { %v1996_v52 = vpop.xlane.xlu1 %1995 }
 0x526   : > { %6281 = vmatpush3.bf16.xpose.msra.mxu0 %v2547_v50  ;;  %6827 = vrcp.f32 %v1996_v52 }
 0x527   : > { %6298 = vmatprep.subr.bf16.mxu0 %v9528_v42  ;;  %6829 = vrcp.f32 %v8350_v5  ;;  %v2650_v5 = vsel %vm1549_vm1, %v2330_v1, 0 }
 0x528   : > { %v6820_v49 = vpop.eup %6819  ;;  %6831 = vrcp.f32 %v1999_v40  ;;  %v8418_v63 = vpop.xlane.xlu0 %2049 }
 0x529   : > { %v8399_v54 = vpop.xlane.xlu1 %2067  ;;  %v2270_v37 = vmul.f32 %v6820_v49, %v8182_v21  ;;  %v6822_v15 = vpop.eup %6821  ;;  %6833 = vrcp.f32 %v8344_v35  ;;  %v2653_v49 = vsel %vm1549_vm1, %v9577_v44, 0 }
 0x52a   : > { %v6824_v57 = vpop.eup %6823  ;;  %v2272_v13 = vmul.f32 %v6822_v15, %v8160_v0 }
 0x52b   : > { %v2326_v25 = vpack.c.bf16 %v2271_v24, %v2270_v37  ;;  %v2273_v21 = vmul.f32 %v6824_v57, %v8062_v46  ;;  %v6826_v40 = vpop.eup %6825 }
 0x52c   : > { %v2282_v37 = vmul.f32 %v6826_v40, %v8147_v31 }
 0x52d   : > { %6283 = vmatmul.mubr.msk.bf16.vlgmr.msra.gmra.mrb[48].mxu0 %vm1549_vm1, %v9576_v62  ;;  %v2005_v60 = vpop.xlane.xlu1 %2004  ;;  %v2594_v20 = vsel %vm1549_vm1, %v2326_v25, 0  ;;  %v2327_v52 = vpack.c.bf16 %v2273_v21, %v2272_v13  ;;  %v8434_v25 = vpop.xlane.xlu0 %2121 }
 0x52e   : > { %6287 = vmatpush3.bf16.xpose.msra.mxu1 %v2594_v20  ;;  %6299 = vmatpush3.bf16.xpose.msra.mxu0 %v2650_v5  ;;  %6835 = vrcp.f32 %v2005_v60  ;;  %v9579_v20 = vld [vmem:[#allocation48_spill] sm:$0xff] }
 0x52f   : > { %6288 = vmatprep.subr.bf16.mxu1 %v9528_v42  ;;  %6300 = vmatprep.subr.bf16.mxu0 %v9528_v42  ;;  %6837 = vrcp.f32 %v8330_v18  ;;  %v2597_v46 = vsel %vm1549_vm1, %v2327_v52, 0 }
 0x530   : > { %6306 = vmatprep.mubr.msk.bf16.mxu0 %vm7081_vm2, %v9528_v42  ;;  %v6828_v50 = vpop.eup %6827  ;;  %6839 = vrcp.f32 %v8362_v30 }
 0x531   : > { %v2038_v0 = vpop.xlane.xlu1 %2037  ;;  %v6830_v35 = vpop.eup %6829  ;;  %v2274_v18 = vmul.f32 %v6828_v50, %v8203_v53  ;;  %6841 = vrcp.f32 %v8357_v11 }
 0x532   : > { %v6832_v32 = vpop.eup %6831  ;;  %v2283_v24 = vmul.f32 %v6830_v35, %v8054_v6  ;;  %6843 = vrcp.f32 %v2056_v39  ;;  %v9578_v39 = vld [vmem:[#allocation49_spill] sm:$0xff]  ;;  %v8448_v21 = vpop.xlane.xlu0 %2124 }
 0x533   : > { %v2275_v30 = vmul.f32 %v6832_v32, %v8127_v56  ;;  %v6834_v29 = vpop.eup %6833  ;;  %6845 = vrcp.f32 %v2035_v41 }
 0x534   : > { %v2332_v53 = vpack.c.bf16 %v2283_v24, %v2282_v37  ;;  %v2285_v60 = vmul.f32 %v6834_v29, %v9578_v39 }
 0x535   : > { %v8420_v2 = vpop.xlane.xlu1 %2109  ;;  %v2328_v1 = vpack.c.bf16 %v2275_v30, %v2274_v18 }
 0x536   : > { %6289 = vmatpush3.bf16.xpose.msra.mxu1 %v2597_v46  ;;  %6301 = vmatpush3.bf16.xpose.msra.mxu0 %v2653_v49  ;;  %v2656_v56 = vsel %vm1549_vm1, %v2332_v53, 0  ;;  %v2047_v44 = vpop.xlane.xlu0 %2046 }
 0x537   : > { %6290 = vmatprep.subr.bf16.mxu1 %v9528_v42  ;;  %6302 = vmatprep.subr.bf16.mxu0 %v9528_v42  ;;  %v2600_v62 = vsel %vm1549_vm1, %v2328_v1, 0  ;;  %v9581_v1 = vld [vmem:[#allocation38_spill] sm:$0xff] }
 0x538   : > { %v6836_v15 = vpop.eup %6835 }
 0x539   : > { %v2032_v47 = vpop.xlane.xlu1 %2031  ;;  %v6838_v31 = vpop.eup %6837  ;;  %v2277_v6 = vmul.f32 %v6836_v15, %v8223_v10 }
 0x53a   : > { %6847 = vrcp.f32 %v2032_v47  ;;  %v6840_v11 = vpop.eup %6839  ;;  %v2284_v5 = vmul.f32 %v6838_v31, %v9579_v20  ;;  %v8463_v29 = vpop.xlane.xlu0 %2118  ;;  %v9580_v47 = vld [vmem:[#allocation13_spill] sm:$0xff] }
 0x53b   : > { %6849 = vrcp.f32 %v8380_v22  ;;  %v2276_v41 = vmul.f32 %v6840_v11, %v8094_v17  ;;  %v6842_v13 = vpop.eup %6841 }
 0x53c   : > { %6851 = vrcp.f32 %v2038_v0  ;;  %v2333_v52 = vpack.c.bf16 %v2285_v60, %v2284_v5  ;;  %v6844_v50 = vpop.eup %6843  ;;  %v2295_v49 = vmul.f32 %v6842_v13, %v8085_v38  ;;  %v9583_v13 = vld [vmem:[#allocation27_spill] sm:$0xff] }
 0x53d   : > { %v8436_v57 = vpop.xlane.xlu1 %2103  ;;  %6853 = vrcp.f32 %v8354_v28  ;;  %v2329_v40 = vpack.c.bf16 %v2277_v6, %v2276_v41  ;;  %v6846_v22 = vpop.eup %6845  ;;  %v2294_v28 = vmul.f32 %v6844_v50, %v8193_v9 }
 0x53e   : > { %6291 = vmatpush3.bf16.xpose.msra.mxu1 %v2600_v62  ;;  %6303 = vmatpush3.bf16.xpose.msra.mxu0 %v2656_v56  ;;  %6855 = vrcp.f32 %v8386_v7  ;;  %v2659_v46 = vsel %vm1549_vm1, %v2333_v52, 0  ;;  %v2287_v7 = vmul.f32 %v6846_v22, %v8175_v16 }
 0x53f   : > { %6292 = vmatprep.subr.bf16.mxu1 %v9528_v42  ;;  %6304 = vmatprep.subr.bf16.mxu0 %v9528_v42  ;;  %v2603_v17 = vsel %vm1549_vm1, %v2329_v40, 0  ;;  %6857 = vrcp.f32 %v8399_v54  ;;  %v2338_v9 = vpack.c.bf16 %v2295_v49, %v2294_v28 }
 0x541   : > { %v2044_v10 = vpop.xlane.xlu1 %2043  ;;  %v2762_v16 = vsel %vm1549_vm1, %v2338_v9, 0 }
 0x542   : > { %6859 = vrcp.f32 %v2044_v10 }
 0x543   : > { %6861 = vrcp.f32 %v8378_v26 }
 0x544   : > { %v6848_v35 = vpop.eup %6847  ;;  %6863 = vrcp.f32 %v2047_v44  ;;  %v9586_v44 = vld [vmem:[#allocation20_spill] sm:$0xff] }
 0x545   : > { %v8451_v32 = vpop.xlane.xlu1 %2115  ;;  %v2286_v0 = vmul.f32 %v6848_v35, %v8250_v45  ;;  %v6850_v18 = vpop.eup %6849  ;;  %6865 = vrcp.f32 %v8372_v33 }
 0x546   : > { %6293 = vmatpush3.bf16.xpose.msra.mxu1 %v2603_v17  ;;  %6305 = vmatpush3.bf16.xpose.msra.mxu0 %v2659_v46  ;;  %v6852_v30 = vpop.eup %6851  ;;  %v2296_v53 = vmul.f32 %v6850_v18, %v8171_v51  ;;  %v9584_v46 = vld [vmem:[#allocation14_spill] sm:$0xff] }
 0x547   : > { %6310 = vmatprep.subr.bf16.mxu1 %v9528_v42  ;;  %6322 = vmatprep.subr.bf16.mxu0 %v9528_v42  ;;  %v2334_v37 = vpack.c.bf16 %v2287_v7, %v2286_v0  ;;  %v6854_v24 = vpop.eup %6853  ;;  %v2288_v26 = vmul.f32 %v6852_v30, %v8232_v61 }
 0x548   : > { %v6856_v54 = vpop.eup %6855  ;;  %v2297_v11 = vmul.f32 %v6854_v24, %v8067_v4 }
 0x549   : > { %v2053_v45 = vpop.xlane.xlu1 %2052  ;;  %v2706_v38 = vsel %vm1549_vm1, %v2334_v37, 0  ;;  %v2289_v31 = vmul.f32 %v6856_v54, %v8153_v43  ;;  %v6858_v51 = vpop.eup %6857 }
 0x54a   : > { %6867 = vrcp.f32 %v2053_v45  ;;  %v2089_v61 = vpop.xlane.xlu0 %2088  ;;  %v2339_v62 = vpack.c.bf16 %v2297_v11, %v2296_v53  ;;  %v2298_v20 = vmul.f32 %v6858_v51, %v8213_v48 }
 0x54b   : > { %6869 = vrcp.f32 %v8366_v58  ;;  %v2335_v33 = vpack.c.bf16 %v2289_v31, %v2288_v26  ;;  %v9587_v26 = vld [vmem:[#allocation28_spill] sm:$0xff] }
 0x54c   : > { %v6860_v56 = vpop.eup %6859  ;;  %6871 = vrcp.f32 %v8418_v63  ;;  %v2765_v60 = vsel %vm1549_vm1, %v2339_v62, 0  ;;  %v9582_v63 = vld [vmem:[#allocation18_spill] sm:$0xff] }
 0x54d   : > { %6295 = vmatmul.mubr.msk.bf16.vlgmr.msra.gmra.mrb[44].mxu1 %vm1549_vm1, %v9580_v47  ;;  %6307 = vmatmul.mubr.msk.bf16.vlgmr.msra.gmra.mrb[52].mxu0 %vm1549_vm1, %v9581_v1  ;;  %v2086_v15 = vpop.xlane.xlu1 %2085  ;;  %v6862_v6 = vpop.eup %6861  ;;  %v2709_v4 = vsel %vm1549_vm1, %v2335_v33, 0  ;;  %v2290_v41 = vmul.f32 %v6860_v56, %v8261_v14  ;;  %6873 = vrcp.f32 %v8436_v57 }
 0x54e   : > { %6311 = vmatpush3.bf16.xpose.msra.mxu1 %v2706_v38  ;;  %6323 = vmatpush3.bf16.xpose.msra.mxu0 %v2762_v16  ;;  %v6864_v43 = vpop.eup %6863  ;;  %v2083_v58 = vpop.xlane.xlu0 %2082  ;;  %v2299_v10 = vmul.f32 %v6862_v6, %v9583_v13  ;;  %v9588_v6 = vld [vmem:[#allocation15_spill] sm:$0xff]  ;;  %v9591_v13 = vld [vmem:[#allocation32_spill] sm:$0xff] }
 0x54f   : > { %6312 = vmatprep.subr.bf16.mxu1 %v9528_v42  ;;  %6324 = vmatprep.subr.bf16.mxu0 %v9528_v42  ;;  %v2291_v5 = vmul.f32 %v6864_v43, %v9582_v63  ;;  %v6866_v40 = vpop.eup %6865 }
 0x550   : > { %6318 = vmatprep.mubr.msk.bf16.mxu1 %vm7081_vm2, %v9528_v42  ;;  %6330 = vmatprep.mubr.msk.bf16.mxu0 %vm7081_vm2, %v9528_v42  ;;  %v2340_v52 = vpack.c.bf16 %v2299_v10, %v2298_v20  ;;  %v2301_v0 = vmul.f32 %v6866_v40, %v9584_v46  ;;  %v9593_v46 = vld [vmem:[#allocation17_spill] sm:$0xff] }
 0x551   : > { %v2080_v39 = vpop.xlane.xlu1 %2079  ;;  %v2336_v14 = vpack.c.bf16 %v2291_v5, %v2290_v41 }
 0x552   : > { %6875 = vrcp.f32 %v2080_v39  ;;  %v2768_v35 = vsel %vm1549_vm1, %v2340_v52, 0  ;;  %v2098_v49 = vpop.xlane.xlu0 %2097 }
 0x553   : > { %6877 = vrcp.f32 %v8409_v3  ;;  %v2712_v57 = vsel %vm1549_vm1, %v2336_v14, 0  ;;  %v9585_v3 = vld [vmem:[#allocation16_spill] sm:$0xff] }
 0x554   : > { %v6868_v48 = vpop.eup %6867  ;;  %6879 = vrcp.f32 %v2083_v58  ;;  %v9589_v58 = vld [vmem:[#allocation19_spill] sm:$0xff] }
 0x555   : > { %v6870_v50 = vpop.eup %6869  ;;  %v2293_v17 = vmul.f32 %v6868_v48, %v8271_v55  ;;  %6881 = vrcp.f32 %v8420_v2 }
 0x556   : > { %6313 = vmatpush3.bf16.xpose.msra.mxu1 %v2709_v4  ;;  %6325 = vmatpush3.bf16.xpose.msra.mxu0 %v2765_v60  ;;  %v6872_v22 = vpop.eup %6871  ;;  %v2300_v7 = vmul.f32 %v6870_v50, %v9586_v44  ;;  %6883 = vrcp.f32 %v2086_v15  ;;  %v2095_v38 = vpop.xlane.xlu0 %2094  ;;  %v9595_v44 = vld [vmem:[#allocation30_spill] sm:$0xff] }
 0x557   : > { %6314 = vmatprep.subr.bf16.mxu1 %v9528_v42  ;;  %6326 = vmatprep.subr.bf16.mxu0 %v9528_v42  ;;  %v2292_v28 = vmul.f32 %v6872_v22, %v9585_v3  ;;  %v6874_v45 = vpop.eup %6873  ;;  %6885 = vrcp.f32 %v8392_v8  ;;  %v9594_v3 = vld [vmem:[#allocation34_spill] sm:$0xff] }
 0x558   : > { %v2341_v37 = vpack.c.bf16 %v2301_v0, %v2300_v7  ;;  %6887 = vrcp.f32 %v2089_v61  ;;  %v2310_v1 = vmul.f32 %v6874_v45, %v8255_v19 }
 0x559   : > { %v2337_v55 = vpack.c.bf16 %v2293_v17, %v2292_v28  ;;  %6889 = vrcp.f32 %v8451_v32 }
 0x55a   : > { %v2092_v18 = vpop.xlane.xlu1 %2091  ;;  %v2771_v54 = vsel %vm1549_vm1, %v2341_v37, 0 }
 0x55b   : > { %v2715_v24 = vsel %vm1549_vm1, %v2337_v55, 0  ;;  %6891 = vrcp.f32 %v2092_v18 }
 0x55c   : > { %v6876_v9 = vpop.eup %6875  ;;  %6893 = vrcp.f32 %v8463_v29  ;;  %v2438_v11 = vpop.trf.xlu0 }
 0x55d   : > { %v6878_v30 = vpop.eup %6877  ;;  %v2302_v47 = vmul.f32 %v6876_v9, %v8293_v23  ;;  %6895 = vrcp.f32 %v2095_v38 }
 0x55e   : > { %6315 = vmatpush3.bf16.xpose.msra.mxu1 %v2712_v57  ;;  %6327 = vmatpush3.bf16.xpose.msra.mxu0 %v2768_v35  ;;  %v6880_v2 = vpop.eup %6879  ;;  %v2101_v16 = vpop.xlane.xlu1 %2100  ;;  %v2311_v53 = vmul.f32 %v6878_v30, %v9587_v26  ;;  %6897 = vrcp.f32 %v8448_v21  ;;  %v9592_v35 = vld [vmem:[#allocation37_spill] sm:$0xff] }
 0x55f   : > { %6316 = vmatprep.subr.bf16.mxu1 %v9528_v42  ;;  %6328 = vmatprep.subr.bf16.mxu0 %v9528_v42  ;;  %v2303_v8 = vmul.f32 %v6880_v2, %v8289_v36  ;;  %v6882_v15 = vpop.eup %6881  ;;  %6899 = vrcp.f32 %v2101_v16 }
 0x560   : > { %v2346_v19 = vpack.c.bf16 %v2311_v53, %v2310_v1  ;;  %v6884_v31 = vpop.eup %6883  ;;  %v2312_v29 = vmul.f32 %v6882_v15, %v8242_v12  ;;  %6901 = vrcp.f32 %v8434_v25  ;;  %v9590_v25 = vld [vmem:[#allocation22_spill] sm:$0xff] }
 0x561   : > { %v2342_v23 = vpack.c.bf16 %v2303_v8, %v2302_v47  ;;  %v6886_v61 = vpop.eup %6885  ;;  %v2304_v62 = vmul.f32 %v6884_v31, %v8284_v27  ;;  %6903 = vrcp.f32 %v2098_v49 }
 0x562   : > { %v6888_v32 = vpop.eup %6887  ;;  %v2874_v33 = vsel %vm1549_vm1, %v2346_v19, 0  ;;  %v2313_v43 = vmul.f32 %v6886_v61, %v9588_v6 }
 0x563   : > { %v2818_v36 = vsel %vm1549_vm1, %v2342_v23, 0  ;;  %v2305_v56 = vmul.f32 %v6888_v32, %v8278_v34  ;;  %v6890_v12 = vpop.eup %6889 }
 0x564   : > { %v2422_v51 = vpop.trf.xlu1  ;;  %v2347_v21 = vpack.c.bf16 %v2313_v43, %v2312_v29  ;;  %v2314_v63 = vmul.f32 %v6890_v12, %v9589_v58 }
 0x565   : > { %v2343_v27 = vpack.c.bf16 %v2305_v56, %v2304_v62  ;;  %v6892_v39 = vpop.eup %6891 }
 0x566   : > { %6317 = vmatpush3.bf16.xpose.msra.mxu1 %v2715_v24  ;;  %6329 = vmatpush3.bf16.xpose.msra.mxu0 %v2771_v54  ;;  %v6894_v4 = vpop.eup %6893  ;;  %v2877_v41 = vsel %vm1549_vm1, %v2347_v21, 0  ;;  %v2306_v20 = vmul.f32 %v6892_v39, %v8314_v59 }
 0x567   : > { %6334 = vmatprep.subr.bf16.mxu1 %v9528_v42  ;;  %6346 = vmatprep.subr.bf16.mxu0 %v9528_v42  ;;  %v6896_v60 = vpop.eup %6895  ;;  %v2821_v34 = vsel %vm1549_vm1, %v2343_v27, 0  ;;  %v2315_v10 = vmul.f32 %v6894_v4, %v9591_v13 }
 0x568   : > { %v2307_v5 = vmul.f32 %v6896_v60, %v9590_v25  ;;  %v6898_v40 = vpop.eup %6897 }
 0x569   : > { %v2348_v52 = vpack.c.bf16 %v2315_v10, %v2314_v63  ;;  %v6900_v48 = vpop.eup %6899  ;;  %v2317_v0 = vmul.f32 %v6898_v40, %v9593_v46 }
 0x56a   : > { %v2344_v14 = vpack.c.bf16 %v2307_v5, %v2306_v20  ;;  %v6902_v50 = vpop.eup %6901  ;;  %v2309_v17 = vmul.f32 %v6900_v48, %v9592_v35  ;;  %v7082_v48 = vmov 1983009808   ;;  %v7083_v35 = vmov 1934713408  }
 0x56b   : > { %v6904_v22 = vpop.eup %6903  ;;  %v2880_v57 = vsel %vm1549_vm1, %v2348_v52, 0  ;;  %v2316_v7 = vmul.f32 %v6902_v50, %v9595_v44  ;;  %v3185_v50 = vunpack.c.l.s4 %v7082_v48 }
 0x56c   : > { %v2824_v59 = vsel %vm1549_vm1, %v2344_v14, 0  ;;  %v2308_v28 = vmul.f32 %v6904_v22, %v9594_v3  ;;  %v2470_v37 = vpop.trf.xlu0  ;;  %v3187_v22 = vlaneseq }
 0x56d   : > { %6319 = vmatmul.mubr.msk.bf16.vlgmr.msra.gmra.mrb[48].mxu1 %vm1549_vm1, %v2422_v51  ;;  %6331 = vmatmul.mubr.msk.bf16.vlgmr.msra.gmra.mrb[56].mxu0 %vm1549_vm1, %v2438_v11  ;;  %v2349_v18 = vpack.c.bf16 %v2317_v0, %v2316_v7  ;;  %v3186_v46 = vunpack.c.0.s8 %v3185_v50 }
 0x56e   : > { %6335 = vmatpush3.bf16.xpose.msra.mxu1 %v2818_v36  ;;  %6347 = vmatpush3.bf16.xpose.msra.mxu0 %v2874_v33  ;;  %v2345_v49 = vpack.c.bf16 %v2309_v17, %v2308_v28  ;;  %v3249_v17 = vunpack.c.l.s4 %v7083_v35  ;;  %v3188_v0 = vshrl.u32 %v3187_v22, 7 }
 0x56f   : > { %6336 = vmatprep.subr.bf16.mxu1 %v9528_v42  ;;  %6348 = vmatprep.subr.bf16.mxu0 %v9528_v42  ;;  %v2883_v55 = vsel %vm1549_vm1, %v2349_v18, 0 }
 0x570   : > { %6342 = vmatprep.mubr.msk.bf16.mxu1 %vm7081_vm2, %v9528_v42  ;;  %6354 = vmatprep.mubr.msk.bf16.mxu0 %vm7081_vm2, %v9528_v42  ;;  %v2827_v45 = vsel %vm1549_vm1, %v2345_v49, 0  ;;  %v3250_v28 = vunpack.c.0.s8 %v3249_v17  ;;  %v8574_v44 = vsub.s32 %v3186_v46, %v3188_v0 }
 0x574   : > { %v2454_v9 = vpop.trf.xlu1 }
 0x576   : > { %6337 = vmatpush3.bf16.xpose.msra.mxu1 %v2821_v34  ;;  %6349 = vmatpush3.bf16.xpose.msra.mxu0 %v2877_v41 }
 0x577   : > { %6338 = vmatprep.subr.bf16.mxu1 %v9528_v42  ;;  %6350 = vmatprep.subr.bf16.mxu0 %v9528_v42 }
 0x57e   : > { %6339 = vmatpush3.bf16.xpose.msra.mxu1 %v2824_v59  ;;  %6351 = vmatpush3.bf16.xpose.msra.mxu0 %v2880_v57 }
 0x57f   : > { %6340 = vmatprep.subr.bf16.mxu1 %v9528_v42  ;;  %6352 = vmatprep.subr.bf16.mxu0 %v9528_v42 }
 0x586   : > { %6341 = vmatpush3.bf16.xpose.msra.mxu1 %v2827_v45  ;;  %6353 = vmatpush3.bf16.xpose.msra.mxu0 %v2883_v55 }
 0x58d   : > { %6343 = vmatmul.mubr.msk.bf16.vlgmr.msra.gmra.mrb[52].mxu1 %vm1549_vm1, %v2454_v9  ;;  %6355 = vmatmul.mubr.msk.bf16.vlgmr.msra.gmra.mrb[60].mxu0 %vm1549_vm1, %v2470_v37  ;;  %v8576_v9 = vsub.s32 %v3250_v28, %v3188_v0 }
 0x5ac   : > { %v2527_v30 = vpop.f32.mrb[40].mxu1 }
 0x5ad   : > { %2926 = vxpose.xlu1.b32.start [1/2] (short) (narrow) %v2527_v30, 64  ;;  %v6272_v42 = vpop.f32.mrb[41].mxu1 }
 0x5ae   : > { %v2530_v2 = vpop.f32.mrb[42].mxu1 }
 0x5af   : > { %v6273_v24 = vpop.f32.mrb[43].mxu1 }
 0x5b1   : > { %2927 = vxpose.xlu1.b32.end [2/2] (short) (narrow) %v2530_v2, 64 }
 0x600   : > { %v2583_v54 = vpop.f32.mrb[48].mxu0 }
 0x601   : > { %2958 = vxpose.xlu0.b32.start [1/2] (short) (narrow) %v2583_v54, 64  ;;  %v6284_v47 = vpop.f32.mrb[49].mxu0 }
 0x602   : > { %v2586_v1 = vpop.f32.mrb[50].mxu0 }
 0x603   : > { %v6285_v38 = vpop.f32.mrb[51].mxu0 }
 0x605   : > { %2959 = vxpose.xlu0.b32.end [2/2] (short) (narrow) %v2586_v1, 64 }
 0x620   : > { %v2639_v16 = vpop.f32.mrb[44].mxu1  ;;  %v2695_v8 = vpop.f32.mrb[52].mxu0 }
 0x621   : > { %3022 = vxpose.xlu1.b32.start [1/2] (short) (narrow) %v2695_v8, 64  ;;  %v6308_v26 = vpop.f32.mrb[53].mxu0  ;;  %2990 = vxpose.xlu0.b32.start [1/2] (short) (narrow) %v2639_v16, 64  ;;  %v6296_v53 = vpop.f32.mrb[45].mxu1 }
 0x622   : > { %v2642_v15 = vpop.f32.mrb[46].mxu1  ;;  %v2698_v23 = vpop.f32.mrb[54].mxu0 }
 0x623   : > { %v6297_v19 = vpop.f32.mrb[47].mxu1  ;;  %v6309_v31 = vpop.f32.mrb[55].mxu0 }
 0x625   : > { %3023 = vxpose.xlu1.b32.end [2/2] (short) (narrow) %v2698_v23, 64  ;;  %2991 = vxpose.xlu0.b32.end [2/2] (short) (narrow) %v2642_v15, 64 }
 0x62d   : > { %v2942_v60 = vpop.trf.xlu1 }
 0x631   : > { %v2943_v34 = vpop.trf.xlu1 }
 0x635   : > { %v8550_v41 = vpop.trf.xlu1 }
 0x639   : > { %v8552_v58 = vpop.trf.xlu1 }
 0x63d   : > { %v8556_v5 = vpop.trf.xlu1 }
 0x640   : > { %v2751_v11 = vpop.f32.mrb[48].mxu1  ;;  %v2807_v51 = vpop.f32.mrb[56].mxu0 }
 0x641   : > { %3086 = vxpose.xlu1.b32.start [1/2] (short) (narrow) %v2807_v51, 64  ;;  %3054 = vxpose.xlu0.b32.start [1/2] (short) (narrow) %v2751_v11, 64  ;;  %v6320_v61 = vpop.f32.mrb[49].mxu1  ;;  %v6332_v32 = vpop.f32.mrb[57].mxu0 }
 0x642   : > { %v2754_v36 = vpop.f32.mrb[50].mxu1  ;;  %v2810_v33 = vpop.f32.mrb[58].mxu0 }
 0x643   : > { %v6321_v62 = vpop.f32.mrb[51].mxu1  ;;  %v6333_v29 = vpop.f32.mrb[59].mxu0 }
 0x644   : > { %v8560_v10 = vpop.trf.xlu1 }
 0x645   : > { %3087 = vxpose.xlu1.b32.end [2/2] (short) (narrow) %v2810_v33, 64  ;;  %3055 = vxpose.xlu0.b32.end [2/2] (short) (narrow) %v2754_v36, 64 }
 0x648   : > { %v8566_v52 = vpop.trf.xlu1 }
 0x64c   : > { %v8570_v57 = vpop.trf.xlu1 }
 0x660   : > { %v2863_v56 = vpop.f32.mrb[52].mxu1  ;;  %v2919_v6 = vpop.f32.mrb[60].mxu0 }
 0x661   : > { %3150 = vxpose.xlu1.b32.start [1/2] (short) (narrow) %v2919_v6, 64  ;;  %3118 = vxpose.xlu0.b32.start [1/2] (short) (narrow) %v2863_v56, 64  ;;  %v6344_v43 = vpop.f32.mrb[53].mxu1  ;;  %v6356_v12 = vpop.f32.mrb[61].mxu0 }
 0x662   : > { %v2866_v27 = vpop.f32.mrb[54].mxu1  ;;  %v2922_v21 = vpop.f32.mrb[62].mxu0 }
 0x663   : > { %v6345_v39 = vpop.f32.mrb[55].mxu1  ;;  %v6357_v4 = vpop.f32.mrb[63].mxu0 }
 0x665   : > { %3151 = vxpose.xlu1.b32.end [2/2] (short) (narrow) %v2922_v21, 64  ;;  %3119 = vxpose.xlu0.b32.end [2/2] (short) (narrow) %v2866_v27, 64 }
 0x681   : > { %v2974_v20 = vpop.trf.xlu0 }
 0x685   : > { %v2975_v63 = vpop.trf.xlu0 }
 0x689   : > { %v8554_v25 = vpop.trf.xlu0 }
 0x68d   : > { %v8558_v13 = vpop.trf.xlu0 }
 0x691   : > { %v8562_v40 = vpop.trf.xlu0 }
 0x695   : > { %v8564_v14 = vpop.trf.xlu0 }
 0x699   : > { %v8568_v59 = vpop.trf.xlu0 }
 0x69d   : > { %v8572_v3 = vpop.trf.xlu0 }
 0x6a1   : > { %v3006_v7 = vpop.trf.xlu0  ;;  %v3038_v49 = vpop.trf.xlu1 }
 0x6a2   : > { %v3182_v18 = vcombine.low %v2942_v60, %v3006_v7  ;;  %v3183_v45 = vcombine.high %v2942_v60, %v3006_v7  ;;  %v3198_v55 = vcombine.low %v2974_v20, %v3038_v49  ;;  %v3199_v37 = vcombine.high %v2974_v20, %v3038_v49 }
 0x6a4   : > { %v3190_v30 = vrot.slane %v3182_v18, %v8574_v44  ;;  %v3197_v42 = vrot.slane %v3183_v45, %v8574_v44  ;;  %v3206_v2 = vrot.slane %v3198_v55, %v8574_v44  ;;  %v3213_v24 = vrot.slane %v3199_v37, %v8574_v44 }
 0x6a5   : > { %v3007_v54 = vpop.trf.xlu0  ;;  %v3039_v47 = vpop.trf.xlu1 }
 0x6a6   : > { %v3246_v1 = vcombine.low %v3190_v30, %v3206_v2  ;;  %v3247_v38 = vcombine.high %v3190_v30, %v3206_v2  ;;  %v3262_v16 = vcombine.low %v3197_v42, %v3213_v24  ;;  %v3263_v8 = vcombine.high %v3197_v42, %v3213_v24 }
 0x6a7   : > { %v3318_v26 = vcombine.low %v2943_v34, %v3007_v54  ;;  %v3319_v53 = vcombine.high %v2943_v34, %v3007_v54  ;;  %v3334_v15 = vcombine.low %v2975_v63, %v3039_v47  ;;  %v3335_v23 = vcombine.high %v2975_v63, %v3039_v47 }
 0x6a8   : > { %v3254_v19 = vrot.slane %v3246_v1, %v8576_v9  ;;  %v3261_v31 = vrot.slane %v3247_v38, %v8576_v9  ;;  %v3270_v11 = vrot.slane %v3262_v16, %v8576_v9  ;;  %v3277_v51 = vrot.slane %v3263_v8, %v8576_v9 }
 0x6a9   : > { %v3326_v61 = vrot.slane %v3318_v26, %v8574_v44  ;;  %v3333_v32 = vrot.slane %v3319_v53, %v8574_v44  ;;  %v3342_v36 = vrot.slane %v3334_v15, %v8574_v44  ;;  %v3349_v33 = vrot.slane %v3335_v23, %v8574_v44  ;;  %v3008_v62 = vpop.trf.xlu0  ;;  %v3040_v29 = vpop.trf.xlu1 }
 0x6aa   : > { %v5974_v56 = vcombine.low %v3254_v19, %v3261_v31  ;;  %v5976_v6 = vcombine.high %v3254_v19, %v3261_v31  ;;  %v5978_v43 = vcombine.low %v3270_v11, %v3277_v51  ;;  %v5980_v12 = vcombine.high %v3270_v11, %v3277_v51 }
 0x6ab   : > { %v3382_v27 = vcombine.low %v3326_v61, %v3342_v36  ;;  %v3383_v21 = vcombine.high %v3326_v61, %v3342_v36  ;;  %v3398_v39 = vcombine.low %v3333_v32, %v3349_v33  ;;  %v3399_v4 = vcombine.high %v3333_v32, %v3349_v33 }
 0x6ac   : > { %v8591_v60 = vrot.slane %v5974_v56, %v8574_v44  ;;  %v8594_v34 = vrot.slane %v5976_v6, %v8574_v44  ;;  %v8597_v20 = vrot.slane %v5978_v43, %v8574_v44  ;;  %v3454_v46 = vcombine.low %v8550_v41, %v3008_v62 }
 0x6ad   : > { %v3390_v63 = vrot.slane %v3382_v27, %v8576_v9  ;;  %v3397_v48 = vrot.slane %v3383_v21, %v8576_v9  ;;  %v3406_v50 = vrot.slane %v3398_v39, %v8576_v9  ;;  %v3413_v22 = vrot.slane %v3399_v4, %v8576_v9  ;;  %v3009_v35 = vpop.trf.xlu0  ;;  %v3041_v17 = vpop.trf.xlu1 }
 0x6ae   : > { %v3455_v0 = vcombine.high %v8550_v41, %v3008_v62  ;;  %v3470_v28 = vcombine.low %v8554_v25, %v3040_v29  ;;  %v3471_v7 = vcombine.high %v8554_v25, %v3040_v29  ;;  %v8608_v49 = vrot.slane %v5980_v12, %v8574_v44 }
 0x6af   : > { %v5982_v18 = vcombine.low %v3390_v63, %v3397_v48  ;;  %v5984_v45 = vcombine.high %v3390_v63, %v3397_v48  ;;  %v5986_v55 = vcombine.low %v3406_v50, %v3413_v22  ;;  %v3462_v37 = vrot.slane %v3454_v46, %v8574_v44 }
 0x6b0   : > { %v3469_v30 = vrot.slane %v3455_v0, %v8574_v44  ;;  %v3478_v42 = vrot.slane %v3470_v28, %v8574_v44  ;;  %v3485_v2 = vrot.slane %v3471_v7, %v8574_v44  ;;  %v5988_v54 = vcombine.high %v3406_v50, %v3413_v22 }
 0x6b1   : > { %v8615_v41 = vrot.slane %v5982_v18, %v8574_v44  ;;  %v8618_v24 = vrot.slane %v5984_v45, %v8574_v44  ;;  %v8621_v25 = vrot.slane %v5986_v55, %v8574_v44  ;;  %v3010_v47 = vpop.trf.xlu0  ;;  %v3042_v1 = vpop.trf.xlu1  ;;  %v3590_v53 = vcombine.low %v8552_v58, %v3009_v35 }
 0x6b2   : > { %v3518_v38 = vcombine.low %v3462_v37, %v3478_v42  ;;  %v3519_v16 = vcombine.high %v3462_v37, %v3478_v42  ;;  %v3534_v8 = vcombine.low %v3469_v30, %v3485_v2  ;;  %v3535_v26 = vcombine.high %v3469_v30, %v3485_v2 }
 0x6b3   : > { %v3591_v15 = vcombine.high %v8552_v58, %v3009_v35  ;;  %v3606_v23 = vcombine.low %v8558_v13, %v3041_v17  ;;  %v3607_v19 = vcombine.high %v8558_v13, %v3041_v17  ;;  %v3598_v32 = vrot.slane %v3590_v53, %v8574_v44 }
 0x6b4   : > { %v3526_v31 = vrot.slane %v3518_v38, %v8576_v9  ;;  %v3533_v11 = vrot.slane %v3519_v16, %v8576_v9  ;;  %v3542_v51 = vrot.slane %v3534_v8, %v8576_v9  ;;  %v3549_v61 = vrot.slane %v3535_v26, %v8576_v9 }
 0x6b5   : > { %v3605_v36 = vrot.slane %v3591_v15, %v8574_v44  ;;  %v3614_v33 = vrot.slane %v3606_v23, %v8574_v44  ;;  %v3621_v58 = vrot.slane %v3607_v19, %v8574_v44  ;;  %v3011_v62 = vpop.trf.xlu0  ;;  %v3043_v29 = vpop.trf.xlu1  ;;  %v8636_v4 = vrot.slane %v5988_v54, %v8574_v44 }
 0x6b6   : > { %v5990_v56 = vcombine.low %v3526_v31, %v3533_v11  ;;  %v5992_v13 = vcombine.high %v3526_v31, %v3533_v11  ;;  %v5994_v6 = vcombine.low %v3542_v51, %v3549_v61  ;;  %v5996_v43 = vcombine.high %v3542_v51, %v3549_v61 }
 0x6b7   : > { %v3654_v12 = vcombine.low %v3598_v32, %v3614_v33  ;;  %v3655_v27 = vcombine.high %v3598_v32, %v3614_v33  ;;  %v3670_v21 = vcombine.low %v3605_v36, %v3621_v58  ;;  %v3671_v39 = vcombine.high %v3605_v36, %v3621_v58 }
 0x6b8   : > { %v8639_v63 = vrot.slane %v5990_v56, %v8574_v44  ;;  %v8642_v48 = vrot.slane %v5992_v13, %v8574_v44  ;;  %v8645_v50 = vrot.slane %v5994_v6, %v8574_v44  ;;  %v3726_v7 = vcombine.low %v8556_v5, %v3010_v47 }
 0x6b9   : > { %v3662_v22 = vrot.slane %v3654_v12, %v8576_v9  ;;  %v3669_v35 = vrot.slane %v3655_v27, %v8576_v9  ;;  %v3678_v17 = vrot.slane %v3670_v21, %v8576_v9  ;;  %v3685_v46 = vrot.slane %v3671_v39, %v8576_v9  ;;  %v8651_v0 = vpop.trf.xlu0  ;;  %v8653_v28 = vpop.trf.xlu1 }
 0x6ba   : > { %v3727_v18 = vcombine.high %v8556_v5, %v3010_v47  ;;  %v3742_v45 = vcombine.low %v8562_v40, %v3042_v1  ;;  %v3743_v55 = vcombine.high %v8562_v40, %v3042_v1  ;;  %v8660_v37 = vrot.slane %v5996_v43, %v8574_v44 }
 0x6bb   : > { %v5998_v30 = vcombine.low %v3662_v22, %v3669_v35  ;;  %v6000_v42 = vcombine.high %v3662_v22, %v3669_v35  ;;  %v6002_v2 = vcombine.low %v3678_v17, %v3685_v46  ;;  %v3734_v54 = vrot.slane %v3726_v7, %v8574_v44 }
 0x6bc   : > { %v3741_v38 = vrot.slane %v3727_v18, %v8574_v44  ;;  %v3750_v16 = vrot.slane %v3742_v45, %v8574_v44  ;;  %v3757_v8 = vrot.slane %v3743_v55, %v8574_v44  ;;  %v6004_v1 = vcombine.high %v3678_v17, %v3685_v46 }
 0x6bd   : > { %v8667_v5 = vrot.slane %v5998_v30, %v8574_v44  ;;  %v8670_v47 = vrot.slane %v6000_v42, %v8574_v44  ;;  %v8673_v40 = vrot.slane %v6002_v2, %v8574_v44  ;;  %v8675_v26 = vpop.trf.xlu0  ;;  %v8677_v53 = vpop.trf.xlu1  ;;  %v3862_v11 = vcombine.low %v8560_v10, %v3011_v62 }
 0x6be   : > { %v3790_v15 = vcombine.low %v3734_v54, %v3750_v16  ;;  %v3791_v23 = vcombine.high %v3734_v54, %v3750_v16  ;;  %v3806_v19 = vcombine.low %v3741_v38, %v3757_v8  ;;  %v3807_v31 = vcombine.high %v3741_v38, %v3757_v8 }
 0x6bf   : > { %v3863_v51 = vcombine.high %v8560_v10, %v3011_v62  ;;  %v3878_v61 = vcombine.low %v8564_v14, %v3043_v29  ;;  %v3879_v32 = vcombine.high %v8564_v14, %v3043_v29  ;;  %v3870_v13 = vrot.slane %v3862_v11, %v8574_v44 }
 0x6c0   : > { %v3798_v36 = vrot.slane %v3790_v15, %v8576_v9  ;;  %v3805_v33 = vrot.slane %v3791_v23, %v8576_v9  ;;  %v3814_v58 = vrot.slane %v3806_v19, %v8576_v9  ;;  %v3821_v56 = vrot.slane %v3807_v31, %v8576_v9 }
 0x6c1   : > { %v3877_v6 = vrot.slane %v3863_v51, %v8574_v44  ;;  %v3886_v43 = vrot.slane %v3878_v61, %v8574_v44  ;;  %v3893_v10 = vrot.slane %v3879_v32, %v8574_v44  ;;  %v8691_v62 = vpop.trf.xlu0  ;;  %v8693_v12 = vpop.trf.xlu1  ;;  %v8696_v46 = vrot.slane %v6004_v1, %v8574_v44 }
 0x6c2   : > { %v6006_v14 = vcombine.low %v3798_v36, %v3805_v33  ;;  %v6008_v29 = vcombine.high %v3798_v36, %v3805_v33  ;;  %v6010_v27 = vcombine.low %v3814_v58, %v3821_v56  ;;  %v6012_v21 = vcombine.high %v3814_v58, %v3821_v56 }
 0x6c3   : > { %v3926_v39 = vcombine.low %v3870_v13, %v3886_v43  ;;  %v3927_v22 = vcombine.high %v3870_v13, %v3886_v43  ;;  %v3942_v35 = vcombine.low %v3877_v6, %v3893_v10  ;;  %v3943_v17 = vcombine.high %v3877_v6, %v3893_v10 }
 0x6c4   : > { %v8699_v7 = vrot.slane %v6006_v14, %v8574_v44  ;;  %v8702_v18 = vrot.slane %v6008_v29, %v8574_v44  ;;  %v8705_v45 = vrot.slane %v6010_v27, %v8574_v44  ;;  %v3998_v16 = vcombine.low %v8566_v52, %v8651_v0 }
 0x6c5   : > { %v3934_v55 = vrot.slane %v3926_v39, %v8576_v9  ;;  %v3941_v30 = vrot.slane %v3927_v22, %v8576_v9  ;;  %v3950_v42 = vrot.slane %v3942_v35, %v8576_v9  ;;  %v3957_v2 = vrot.slane %v3943_v17, %v8576_v9  ;;  %v8711_v54 = vpop.trf.xlu0  ;;  %v8713_v38 = vpop.trf.xlu1 }
 0x6c6   : > { %v3999_v8 = vcombine.high %v8566_v52, %v8651_v0  ;;  %v4014_v1 = vcombine.low %v8568_v59, %v8653_v28  ;;  %v4015_v15 = vcombine.high %v8568_v59, %v8653_v28  ;;  %v8724_v23 = vrot.slane %v6012_v21, %v8574_v44 }
 0x6c7   : > { %v6014_v19 = vcombine.low %v3934_v55, %v3941_v30  ;;  %v6016_v31 = vcombine.high %v3934_v55, %v3941_v30  ;;  %v6018_v11 = vcombine.low %v3950_v42, %v3957_v2  ;;  %v4006_v51 = vrot.slane %v3998_v16, %v8574_v44 }
 0x6c8   : > { %v4013_v61 = vrot.slane %v3999_v8, %v8574_v44  ;;  %v4022_v32 = vrot.slane %v4014_v1, %v8574_v44  ;;  %v4029_v52 = vrot.slane %v4015_v15, %v8574_v44  ;;  %v6020_v28 = vcombine.high %v3950_v42, %v3957_v2 }
 0x6c9   : > { %v8731_v0 = vrot.slane %v6014_v19, %v8574_v44  ;;  %v8734_v36 = vrot.slane %v6016_v31, %v8574_v44  ;;  %v8737_v59 = vrot.slane %v6018_v11, %v8574_v44  ;;  %v8739_v33 = vpop.trf.xlu0  ;;  %v8741_v58 = vpop.trf.xlu1  ;;  %v4335_v10 = vcombine.high %v8591_v60, %v8594_v34 }
 0x6ca   : > { %v4062_v56 = vcombine.low %v4006_v51, %v4022_v32  ;;  %v4063_v13 = vcombine.high %v4006_v51, %v4022_v32  ;;  %v4078_v6 = vcombine.low %v4013_v61, %v4029_v52  ;;  %v4079_v43 = vcombine.high %v4013_v61, %v4029_v52 }
 0x6cb   : > { %v4367_v14 = vcombine.high %v8597_v20, %v8608_v49  ;;  %v4471_v29 = vcombine.high %v8615_v41, %v8618_v24  ;;  %v4503_v27 = vcombine.high %v8621_v25, %v8636_v4  ;;  %v8756_v17 = vrot.slane %v4335_v10, %v8576_v9 }
 0x6cc   : > { %v4070_v21 = vrot.slane %v4062_v56, %v8576_v9  ;;  %v4077_v39 = vrot.slane %v4063_v13, %v8576_v9  ;;  %v4086_v22 = vrot.slane %v4078_v6, %v8576_v9  ;;  %v4093_v35 = vrot.slane %v4079_v43, %v8576_v9 }
 0x6cd   : > { %v8759_v55 = vrot.slane %v4367_v14, %v8576_v9  ;;  %v4485_v30 = vrot.slane %v4471_v29, %v8576_v9  ;;  %v4517_v42 = vrot.slane %v4503_v27, %v8576_v9  ;;  %v8763_v2 = vpop.trf.xlu0  ;;  %v8765_v16 = vpop.trf.xlu1  ;;  %v4334_v51 = vcombine.low %v8591_v60, %v8594_v34 }
 0x6ce   : > { %v6022_v8 = vcombine.low %v4070_v21, %v4077_v39  ;;  %v6024_v1 = vcombine.high %v4070_v21, %v4077_v39  ;;  %v6026_v15 = vcombine.low %v4086_v22, %v4093_v35  ;;  %v6028_v19 = vcombine.high %v4086_v22, %v4093_v35 }
 0x6cf   : > { %v4400_v31 = vcombine.low %v8756_v17, %v8759_v55  ;;  %v4536_v11 = vcombine.low %v4485_v30, %v4517_v42  ;;  %v4366_v61 = vcombine.low %v8597_v20, %v8608_v49  ;;  %v8774_v32 = vrot.slane %v6020_v28, %v8574_v44 }
 0x6d0   : > { %v8777_v52 = vrot.slane %v6022_v8, %v8574_v44  ;;  %v8780_v56 = vrot.slane %v6024_v1, %v8574_v44  ;;  %v8783_v13 = vrot.slane %v6026_v15, %v8574_v44  ;;  %v8786_v43 = vrot.slane %v4334_v51, %v8576_v9 }
 0x6d1   : > { %v6474_v6 = vpack.i.bf16 %v4536_v11, %v4400_v31  ;;  %v8789_v60 = vrot.slane %v4366_v61, %v8576_v9  ;;  %v4470_v34 = vcombine.low %v8615_v41, %v8618_v24  ;;  %v8793_v20 = vpop.trf.xlu0  ;;  %v8795_v49 = vpop.trf.xlu1  ;;  %v4502_v28 = vcombine.low %v8621_v25, %v8636_v4 }
 0x6d2   : > { %v4134_v10 = vcombine.low %v8570_v57, %v8675_v26  ;;  %v4135_v14 = vcombine.high %v8570_v57, %v8675_v26  ;;  %v4150_v29 = vcombine.low %v8572_v3, %v8677_v53  ;;  %v8806_v27 = vrot.slane %v6028_v19, %v8574_v44 }
 0x6d3   : > { %6475 = vrot.lane.b32.xlu1 %v6474_v6, %s7079_s24  ;;  %v4399_v41 = vcombine.high %v8786_v43, %v8789_v60  ;;  %v8812_v24 = vrot.slane %v4470_v34, %v8576_v9  ;;  %v4151_v25 = vcombine.high %v8572_v3, %v8677_v53  ;;  %v8817_v4 = vrot.slane %v4502_v28, %v8576_v9 }
 0x6d4   : > { %v4142_v57 = vrot.slane %v4134_v10, %v8574_v44  ;;  %v4149_v26 = vrot.slane %v4135_v14, %v8574_v44  ;;  %v4158_v21 = vrot.slane %v4150_v29, %v8574_v44  ;;  %v4537_v22 = vcombine.high %v4485_v30, %v4517_v42 }
 0x6d5   : > { %v4165_v39 = vrot.slane %v4151_v25, %v8574_v44  ;;  %v4606_v35 = vcombine.low %v8639_v63, %v8642_v48  ;;  %v4638_v8 = vcombine.low %v8645_v50, %v8660_v37  ;;  %v8827_v1 = vpop.trf.xlu0  ;;  %v4535_v3 = vcombine.high %v8812_v24, %v8817_v4  ;;  %v8833_v31 = vpop.trf.xlu1 }
 0x6d6   : > { %v4198_v53 = vcombine.low %v4142_v57, %v4158_v21  ;;  %v4199_v15 = vcombine.high %v4142_v57, %v4158_v21  ;;  %v4742_v19 = vcombine.low %v8667_v5, %v8670_v47  ;;  %v4401_v42 = vcombine.high %v8756_v17, %v8759_v55 }
 0x6d7   : > { %v4214_v11 = vcombine.low %v4149_v26, %v4165_v39  ;;  %v4215_v30 = vcombine.high %v4149_v26, %v4165_v39  ;;  %v8838_v51 = vrot.slane %v4606_v35, %v8576_v9  ;;  %v6469_v61 = vpack.i.bf16 %v4535_v3, %v4399_v41 }
 0x6d8   : > { %v4206_v6 = vrot.slane %v4198_v53, %v8576_v9  ;;  %v4213_v34 = vrot.slane %v4199_v15, %v8576_v9  ;;  %v8843_v28 = vrot.slane %v4638_v8, %v8576_v9  ;;  %v8848_v29 = vrot.slane %v4742_v19, %v8576_v9 }
 0x6d9   : > { %v4222_v10 = vrot.slane %v4214_v11, %v8576_v9  ;;  %v4229_v14 = vrot.slane %v4215_v30, %v8576_v9  ;;  %v4774_v17 = vcombine.low %v8673_v40, %v8696_v46  ;;  %v8852_v55 = vpop.trf.xlu0  ;;  %6470 = vrot.lane.b32.xlu0 %v6469_v61, %s7077_s25  ;;  %v6479_v57 = vpack.i.bf16 %v4537_v22, %v4401_v42 }
 0x6da   : > { %v6030_v41 = vcombine.low %v4206_v6, %v4213_v34  ;;  %v6032_v25 = vcombine.high %v4206_v6, %v4213_v34  ;;  %v4607_v26 = vcombine.high %v8639_v63, %v8642_v48  ;;  %v4639_v8 = vcombine.high %v8645_v50, %v8660_v37  ;;  %v8870_v63 = vpop.trf.xlu1 }
 0x6db   : > { %v6034_v21 = vcombine.low %v4222_v10, %v4229_v14  ;;  %v6036_v39 = vcombine.high %v4222_v10, %v4229_v14  ;;  %v8858_v35 = vrot.slane %v4774_v17, %v8576_v9  ;;  %v4671_v53 = vcombine.high %v8838_v51, %v8843_v28 }
 0x6dc   : > { %v8863_v3 = vrot.slane %v6030_v41, %v8574_v44  ;;  %v4621_v15 = vrot.slane %v4607_v26, %v8576_v9  ;;  %v4743_v22 = vcombine.high %v8667_v5, %v8670_v47  ;;  %v8873_v48 = vrot.slane %v6032_v25, %v8574_v44 }
 0x6dd   : > { %v8876_v19 = vrot.slane %v6034_v21, %v8574_v44  ;;  %v4807_v50 = vcombine.high %v8848_v29, %v8858_v35  ;;  %v4653_v37 = vrot.slane %v4639_v8, %v8576_v9  ;;  %6480 = vrot.lane.b32.xlu0 %v6479_v57, %s7075_s30  ;;  %v4775_v5 = vcombine.high %v8673_v40, %v8696_v46  ;;  %v8889_v42 = vpop.trf.xlu0 }
 0x6de   : > { %v4757_v11 = vrot.slane %v4743_v22, %v8576_v9  ;;  %v4878_v47 = vcombine.low %v8699_v7, %v8702_v18  ;;  %v4910_v30 = vcombine.low %v8705_v45, %v8724_v23  ;;  %v8892_v61 = vrot.slane %v6036_v39, %v8574_v44  ;;  %v8918_v22 = vpop.trf.xlu1 }
 0x6df   : > { %v6484_v6 = vpack.i.bf16 %v4807_v50, %v4671_v53  ;;  %v4672_v34 = vcombine.low %v4621_v15, %v4653_v37  ;;  %v5014_v10 = vcombine.low %v8731_v0, %v8734_v36  ;;  %v4789_v14 = vrot.slane %v4775_v5, %v8576_v9 }
 0x6e0   : > { %v8898_v40 = vrot.slane %v4878_v47, %v8576_v9  ;;  %v8901_v46 = vrot.slane %v4910_v30, %v8576_v9  ;;  %v5046_v17 = vcombine.low %v8737_v59, %v8774_v32  ;;  %v4879_v25 = vcombine.high %v8699_v7, %v8702_v18 }
 0x6e1   : > { %6485 = vrot.lane.b32.xlu1 %v6484_v6, %s7077_s25  ;;  %v8907_v41 = vrot.slane %v5014_v10, %v8576_v9  ;;  %v4911_v57 = vcombine.high %v8705_v45, %v8724_v23  ;;  %v5015_v26 = vcombine.high %v8731_v0, %v8734_v36  ;;  %v4808_v21 = vcombine.low %v4757_v11, %v4789_v14 }
 0x6e2   : > { %v4673_v39 = vcombine.high %v4621_v15, %v4653_v37  ;;  %v4809_v8 = vcombine.high %v4757_v11, %v4789_v14  ;;  %v8916_v53 = vrot.slane %v5046_v17, %v8576_v9  ;;  %v4893_v50 = vrot.slane %v4879_v25, %v8576_v9  ;;  %v3134_v15 = vpop.trf.xlu0 }
 0x6e3   : > { %v4925_v5 = vrot.slane %v4911_v57, %v8576_v9  ;;  %v5029_v7 = vrot.slane %v5015_v26, %v8576_v9  ;;  %v5047_v18 = vcombine.high %v8737_v59, %v8774_v32  ;;  %v6489_v45 = vpack.i.bf16 %v4808_v21, %v4672_v34 }
 0x6e4   : > { %v4943_v23 = vcombine.high %v8898_v40, %v8901_v46  ;;  %v5079_v0 = vcombine.high %v8907_v41, %v8916_v53  ;;  %v5150_v36 = vcombine.low %v8777_v52, %v8780_v56  ;;  %v6494_v37 = vpack.i.bf16 %v4809_v8, %v4673_v39  ;;  %v3166_v8 = vpop.trf.xlu1 }
 0x6e5   : > { %v4944_v11 = vcombine.low %v4893_v50, %v4925_v5  ;;  %v5061_v47 = vrot.slane %v5047_v18, %v8576_v9  ;;  %v5182_v30 = vcombine.low %v8783_v13, %v8806_v27  ;;  %6490 = vrot.lane.b32.xlu1 %v6489_v45, %s7079_s24  ;;  %v5286_v6 = vcombine.low %v8863_v3, %v8873_v48 }
 0x6e6   : > { %v6499_v59 = vpack.i.bf16 %v5079_v0, %v4943_v23  ;;  %v8936_v32 = vrot.slane %v5150_v36, %v8576_v9  ;;  %v5318_v34 = vcombine.low %v8876_v19, %v8892_v61  ;;  %v5151_v25 = vcombine.high %v8777_v52, %v8780_v56  ;;  %v6641_v36 = vld [vmem:[#allocation7] sm:$0xff]  }
 0x6e7   : > { %v5080_v10 = vcombine.low %v5029_v7, %v5061_v47  ;;  %v5081_v14 = vcombine.high %v5029_v7, %v5061_v47  ;;  %v8943_v17 = vrot.slane %v5182_v30, %v8576_v9  ;;  %v8949_v57 = vrot.slane %v5286_v6, %v8576_v9  ;;  %6358 = vmatprep.subr.bf16.mxu1 %v6641_v36 }
 0x6e8   : > { %9596 = vst [vmem:[#allocation23_spill] sm:$0xff] %v8936_v32  ;;  %6500 = vrot.lane.b32.xlu0 %v6499_v59, %s7077_s25  ;;  %v8952_v26 = vrot.slane %v5318_v34, %v8576_v9  ;;  %v5183_v21 = vcombine.high %v8783_v13, %v8806_v27  ;;  %v5287_v39 = vcombine.high %v8863_v3, %v8873_v48  ;;  %v3135_v3 = vpop.trf.xlu0 }
 0x6e9   : > { %9597 = vst [vmem:[#allocation44_spill] sm:$0xff] %v8943_v17  ;;  %9598 = vst [vmem:[#allocation12_spill] sm:$0xff] %v8949_v57  ;;  %v6504_v7 = vpack.i.bf16 %v5080_v10, %v4944_v11  ;;  %v4945_v18 = vcombine.high %v4893_v50, %v4925_v5  ;;  %v5215_v52 = vcombine.high %v8936_v32, %v8943_v17  ;;  %6495 = vrot.lane.b32.xlu1 %v6494_v37, %s7075_s30  ;;  %v3167_v10 = vpop.trf.xlu1 }
 0x6ea   : > { %9599 = vst [vmem:[#allocation40_spill] sm:$0xff] %v8952_v26  ;;  %v5165_v56 = vrot.slane %v5151_v25, %v8576_v9  ;;  %v5351_v45 = vcombine.high %v8949_v57, %v8952_v26  ;;  %v5197_v23 = vrot.slane %v5183_v21, %v8576_v9  ;;  %v5301_v13 = vrot.slane %v5287_v39, %v8576_v9 }
 0x6eb   : > { %v5319_v27 = vcombine.high %v8876_v19, %v8892_v61  ;;  %v3214_v48 = vcombine.low %v8691_v62, %v3134_v15  ;;  %v3215_v50 = vcombine.high %v8691_v62, %v3134_v15  ;;  %v3230_v5 = vcombine.low %v8693_v12, %v3166_v8  ;;  %v6642_v62 = vld [vmem:[#allocation7 + $0x8] sm:$0xff]   ;;  %6359 = vmatpush3.bf16.msra.mxu1 %v6641_v36 }
 0x6ec   : > { %v3231_v0 = vcombine.high %v8693_v12, %v3166_v8  ;;  %6505 = vrot.lane.b32.xlu0 %v6504_v7, %s7079_s24  ;;  %v6509_v37 = vpack.i.bf16 %v5081_v14, %v4945_v18  ;;  %v6514_v11 = vpack.i.bf16 %v5351_v45, %v5215_v52  ;;  %v5216_v12 = vcombine.low %v5165_v56, %v5197_v23  ;;  %v3136_v52 = vpop.trf.xlu0 }
 0x6ed   : > { %v5333_v47 = vrot.slane %v5319_v27, %v8576_v9  ;;  %v3222_v30 = vrot.slane %v3214_v48, %v8574_v44  ;;  %v3229_v19 = vrot.slane %v3215_v50, %v8574_v44  ;;  %v3238_v61 = vrot.slane %v3230_v5, %v8574_v44  ;;  %6360 = vmatprep.subr.bf16.mxu1 %v6642_v62 }
 0x6ee   : > { %v3245_v59 = vrot.slane %v3231_v0, %v8574_v44  ;;  %6515 = vrot.lane.b32.xlu1 %v6514_v11, %s7077_s25  ;;  %v3350_v6 = vcombine.low %v8711_v54, %v3135_v3  ;;  %v3351_v34 = vcombine.high %v8711_v54, %v3135_v3  ;;  %v5217_v7 = vcombine.high %v5165_v56, %v5197_v23  ;;  %v3168_v11 = vpop.trf.xlu1 }
 0x6ef   : > { %v5352_v15 = vcombine.low %v5301_v13, %v5333_v47  ;;  %v3278_v14 = vcombine.low %v3222_v30, %v3238_v61  ;;  %v3279_v25 = vcombine.high %v3222_v30, %v3238_v61  ;;  %v5353_v18 = vcombine.high %v5301_v13, %v5333_v47  ;;  %6361 = vmatpush3.bf16.msra.mxu1 %v6642_v62 }
 0x6f0   : > { %v3294_v21 = vcombine.low %v3229_v19, %v3245_v59  ;;  %v3295_v39 = vcombine.high %v3229_v19, %v3245_v59  ;;  %6510 = vrot.lane.b32.xlu0 %v6509_v37, %s7075_s30  ;;  %v3358_v3 = vrot.slane %v3350_v6, %v8574_v44  ;;  %v3365_v50 = vrot.slane %v3351_v34, %v8574_v44  ;;  %v3137_v6 = vpop.trf.xlu0 }
 0x6f1   : > { %v6519_v8 = vpack.i.bf16 %v5352_v15, %v5216_v12  ;;  %v3286_v45 = vrot.slane %v3278_v14, %v8576_v9  ;;  %v3293_v27 = vrot.slane %v3279_v25, %v8576_v9  ;;  %v3366_v5 = vcombine.low %v8713_v38, %v3167_v10 }
 0x6f2   : > { %v3302_v48 = vrot.slane %v3294_v21, %v8576_v9  ;;  %v3309_v54 = vrot.slane %v3295_v39, %v8576_v9  ;;  %v3367_v56 = vcombine.high %v8713_v38, %v3167_v10  ;;  %v3486_v23 = vcombine.low %v8739_v33, %v3136_v52 }
 0x6f3   : > { %6520 = vrot.lane.b32.xlu1 %v6519_v8, %s7079_s24  ;;  %v3487_v13 = vcombine.high %v8739_v33, %v3136_v52  ;;  %v6524_v0 = vpack.i.bf16 %v5353_v18, %v5217_v7  ;;  %v3374_v36 = vrot.slane %v3366_v5, %v8574_v44  ;;  %v5975_v47 = vcombine.low %v3286_v45, %v3293_v27 }
 0x6f4   : > { %v3381_v37 = vrot.slane %v3367_v56, %v8574_v44  ;;  %v5977_v30 = vcombine.high %v3286_v45, %v3293_v27  ;;  %v5979_v19 = vcombine.low %v3302_v48, %v3309_v54  ;;  %v5981_v61 = vcombine.high %v3302_v48, %v3309_v54  ;;  %v3169_v54 = vpop.trf.xlu1 }
 0x6f5   : > { %v3414_v59 = vcombine.low %v3358_v3, %v3374_v36  ;;  %v3415_v12 = vcombine.high %v3358_v3, %v3374_v36  ;;  %v3494_v33 = vrot.slane %v3486_v23, %v8574_v44  ;;  %v3501_v62 = vrot.slane %v3487_v13, %v8574_v44 }
 0x6f6   : > { %v3430_v38 = vcombine.low %v3365_v50, %v3381_v37  ;;  %v3431_v15 = vcombine.high %v3365_v50, %v3381_v37  ;;  %v3502_v34 = vcombine.low %v8741_v58, %v3168_v11  ;;  %v3503_v10 = vcombine.high %v8741_v58, %v3168_v11  ;;  %v3138_v37 = vpop.trf.xlu0 }
 0x6f7   : > { %6525 = vrot.lane.b32.xlu1 %v6524_v0, %s7075_s30  ;;  %v3422_v14 = vrot.slane %v3414_v59, %v8576_v9  ;;  %v3429_v25 = vrot.slane %v3415_v12, %v8576_v9  ;;  %v9005_v8 = vrot.slane %v5975_v47, %v8574_v44  ;;  %v9008_v7 = vrot.slane %v5977_v30, %v8574_v44 }
 0x6f8   : > { %v3438_v21 = vrot.slane %v3430_v38, %v8576_v9  ;;  %v3445_v39 = vrot.slane %v3431_v15, %v8576_v9  ;;  %v3510_v18 = vrot.slane %v3502_v34, %v8574_v44  ;;  %v3517_v52 = vrot.slane %v3503_v10, %v8574_v44 }
 0x6f9   : > { %v5983_v45 = vcombine.low %v3422_v14, %v3429_v25  ;;  %v5985_v58 = vcombine.high %v3422_v14, %v3429_v25  ;;  %v3622_v27 = vcombine.low %v8763_v2, %v3137_v6  ;;  %v3623_v48 = vcombine.high %v8763_v2, %v3137_v6  ;;  %v3170_v14 = vpop.trf.xlu1 }
 0x6fa   : > { %v3550_v3 = vcombine.low %v3494_v33, %v3510_v18  ;;  %v3551_v50 = vcombine.high %v3494_v33, %v3510_v18  ;;  %v3566_v5 = vcombine.low %v3501_v62, %v3517_v52  ;;  %v3567_v56 = vcombine.high %v3501_v62, %v3517_v52 }
 0x6fb   : > { %v9015_v23 = vrot.slane %v5979_v19, %v8574_v44  ;;  %v9018_v13 = vrot.slane %v5981_v61, %v8574_v44  ;;  %v5987_v0 = vcombine.low %v3438_v21, %v3445_v39  ;;  %v5989_v36 = vcombine.high %v3438_v21, %v3445_v39 }
 0x6fc   : > { %v3558_v11 = vrot.slane %v3550_v3, %v8576_v9  ;;  %v3565_v47 = vrot.slane %v3551_v50, %v8576_v9  ;;  %v3574_v2 = vrot.slane %v3566_v5, %v8576_v9  ;;  %v3581_v30 = vrot.slane %v3567_v56, %v8576_v9 }
 0x6fd   : > { %v3630_v59 = vrot.slane %v3622_v27, %v8574_v44  ;;  %v3637_v12 = vrot.slane %v3623_v48, %v8574_v44  ;;  %v3638_v19 = vcombine.low %v8765_v16, %v3169_v54  ;;  %v3639_v61 = vcombine.high %v8765_v16, %v3169_v54 }
 0x6fe   : > { %v9029_v38 = vrot.slane %v5983_v45, %v8574_v44  ;;  %v9032_v15 = vrot.slane %v5985_v58, %v8574_v44  ;;  %v3758_v6 = vcombine.low %v8793_v20, %v3138_v37  ;;  %v3759_v33 = vcombine.high %v8793_v20, %v3138_v37  ;;  %v3139_v20 = vpop.trf.xlu0 }
 0x6ff   : > { %v9037_v62 = vrot.slane %v5987_v0, %v8574_v44  ;;  %v9040_v34 = vrot.slane %v5989_v36, %v8574_v44  ;;  %v3646_v10 = vrot.slane %v3638_v19, %v8574_v44  ;;  %v3653_v16 = vrot.slane %v3639_v61, %v8574_v44  ;;  %v3171_v19 = vpop.trf.xlu1 }
 0x700   : > { %v5991_v25 = vcombine.low %v3558_v11, %v3565_v47  ;;  %v5993_v21 = vcombine.high %v3558_v11, %v3565_v47  ;;  %v5995_v39 = vcombine.low %v3574_v2, %v3581_v30  ;;  %v5997_v18 = vcombine.high %v3574_v2, %v3581_v30 }
 0x701   : > { %v3686_v52 = vcombine.low %v3630_v59, %v3646_v10  ;;  %v3687_v45 = vcombine.high %v3630_v59, %v3646_v10  ;;  %v3702_v58 = vcombine.low %v3637_v12, %v3653_v16  ;;  %v3703_v27 = vcombine.high %v3637_v12, %v3653_v16 }
 0x702   : > { %v3766_v48 = vrot.slane %v3758_v6, %v8574_v44  ;;  %v3773_v54 = vrot.slane %v3759_v33, %v8574_v44  ;;  %v3774_v3 = vcombine.low %v8795_v49, %v3170_v14  ;;  %v3775_v50 = vcombine.high %v8795_v49, %v3170_v14 }
 0x703   : > { %v3694_v5 = vrot.slane %v3686_v52, %v8576_v9  ;;  %v3701_v56 = vrot.slane %v3687_v45, %v8576_v9  ;;  %v3710_v0 = vrot.slane %v3702_v58, %v8576_v9  ;;  %v3717_v36 = vrot.slane %v3703_v27, %v8576_v9  ;;  %v3140_v52 = vpop.trf.xlu0 }
 0x704   : > { %v9053_v37 = vrot.slane %v5991_v25, %v8574_v44  ;;  %v9056_v11 = vrot.slane %v5993_v21, %v8574_v44  ;;  %v3782_v47 = vrot.slane %v3774_v3, %v8574_v44  ;;  %v3789_v2 = vrot.slane %v3775_v50, %v8574_v44 }
 0x705   : > { %v5999_v30 = vcombine.low %v3694_v5, %v3701_v56  ;;  %v6001_v49 = vcombine.high %v3694_v5, %v3701_v56  ;;  %v3894_v59 = vcombine.low %v8827_v1, %v3139_v20  ;;  %v3895_v12 = vcombine.high %v8827_v1, %v3139_v20 }
 0x706   : > { %v3822_v61 = vcombine.low %v3766_v48, %v3782_v47  ;;  %v3823_v6 = vcombine.high %v3766_v48, %v3782_v47  ;;  %v3838_v33 = vcombine.low %v3773_v54, %v3789_v2  ;;  %v3839_v10 = vcombine.high %v3773_v54, %v3789_v2  ;;  %v3172_v47 = vpop.trf.xlu1 }
 0x707   : > { %v9063_v16 = vrot.slane %v5995_v39, %v8574_v44  ;;  %v9066_v14 = vrot.slane %v5997_v18, %v8574_v44  ;;  %v6003_v25 = vcombine.low %v3710_v0, %v3717_v36  ;;  %v6005_v21 = vcombine.high %v3710_v0, %v3717_v36 }
 0x708   : > { %v3830_v45 = vrot.slane %v3822_v61, %v8576_v9  ;;  %v3837_v58 = vrot.slane %v3823_v6, %v8576_v9  ;;  %v3846_v1 = vrot.slane %v3838_v33, %v8576_v9  ;;  %v3853_v27 = vrot.slane %v3839_v10, %v8576_v9 }
 0x709   : > { %v3902_v20 = vrot.slane %v3894_v59, %v8574_v44  ;;  %v3909_v48 = vrot.slane %v3895_v12, %v8574_v44  ;;  %v3910_v39 = vcombine.low %v8833_v31, %v3171_v19  ;;  %v3911_v18 = vcombine.high %v8833_v31, %v3171_v19 }
 0x70a   : > { %v9077_v54 = vrot.slane %v5999_v30, %v8574_v44  ;;  %v9080_v3 = vrot.slane %v6001_v49, %v8574_v44  ;;  %v4030_v50 = vcombine.low %v8852_v55, %v3140_v52  ;;  %v4031_v5 = vcombine.high %v8852_v55, %v3140_v52 }
 0x70b   : > { %v9085_v56 = vrot.slane %v6003_v25, %v8574_v44  ;;  %v9088_v0 = vrot.slane %v6005_v21, %v8574_v44  ;;  %v3918_v36 = vrot.slane %v3910_v39, %v8574_v44  ;;  %v3925_v31 = vrot.slane %v3911_v18, %v8574_v44 }
 0x70c   : > { %v6007_v2 = vcombine.low %v3830_v45, %v3837_v58  ;;  %v6009_v30 = vcombine.high %v3830_v45, %v3837_v58  ;;  %v6011_v59 = vcombine.low %v3846_v1, %v3853_v27  ;;  %v6013_v49 = vcombine.high %v3846_v1, %v3853_v27 }
 0x70d   : > { %v3958_v12 = vcombine.low %v3902_v20, %v3918_v36  ;;  %v3959_v19 = vcombine.high %v3902_v20, %v3918_v36  ;;  %v3974_v61 = vcombine.low %v3909_v48, %v3925_v31  ;;  %v3975_v6 = vcombine.high %v3909_v48, %v3925_v31 }
 0x70e   : > { %v4038_v55 = vrot.slane %v4030_v50, %v8574_v44  ;;  %v4045_v33 = vrot.slane %v4031_v5, %v8574_v44  ;;  %v4046_v10 = vcombine.low %v8870_v63, %v3172_v47  ;;  %v4047_v25 = vcombine.high %v8870_v63, %v3172_v47 }
 0x70f   : > { %v3966_v21 = vrot.slane %v3958_v12, %v8576_v9  ;;  %v3973_v52 = vrot.slane %v3959_v19, %v8576_v9  ;;  %v3982_v45 = vrot.slane %v3974_v61, %v8576_v9  ;;  %v3989_v58 = vrot.slane %v3975_v6, %v8576_v9  ;;  %v3141_v12 = vpop.trf.xlu0  ;;  %v6643_v19 = vld [vmem:[#allocation7 + $0x10] sm:$0xff]  }
 0x710   : > { %v4054_v1 = vrot.slane %v4046_v10, %v8574_v44  ;;  %v4061_v27 = vrot.slane %v4047_v25, %v8574_v44  ;;  %v4350_v20 = vcombine.low %v9005_v8, %v9008_v7  ;;  %v4382_v48 = vcombine.low %v9015_v23, %v9018_v13  ;;  %6362 = vmatprep.subr.bf16.mxu1 %v6643_v19 }
 0x711   : > { %v9107_v63 = vrot.slane %v6007_v2, %v8574_v44  ;;  %v6015_v39 = vcombine.low %v3966_v21, %v3973_v52  ;;  %v6017_v18 = vcombine.high %v3966_v21, %v3973_v52  ;;  %v6019_v50 = vcombine.low %v3982_v45, %v3989_v58  ;;  %6363 = vmatpush3.bf16.msra.mxu1 %v6643_v19 }
 0x712   : > { %v4094_v5 = vcombine.low %v4038_v55, %v4054_v1  ;;  %v4095_v36 = vcombine.high %v4038_v55, %v4054_v1  ;;  %v4110_v31 = vcombine.low %v4045_v33, %v4061_v27  ;;  %v4111_v47 = vcombine.high %v4045_v33, %v4061_v27 }
 0x713   : > { %v9110_v61 = vrot.slane %v6009_v30, %v8574_v44  ;;  %v9113_v6 = vrot.slane %v6011_v59, %v8574_v44  ;;  %v9116_v10 = vrot.slane %v6013_v49, %v8574_v44  ;;  %v6021_v2 = vcombine.high %v3982_v45, %v3989_v58 }
 0x714   : > { %v4102_v25 = vrot.slane %v4094_v5, %v8576_v9  ;;  %v4109_v21 = vrot.slane %v4095_v36, %v8576_v9  ;;  %v4358_v55 = vrot.slane %v4350_v20, %v8576_v9  ;;  %v4390_v33 = vrot.slane %v4382_v48, %v8576_v9  ;;  %v3173_v20 = vpop.trf.xlu1  ;;  %v6644_v48 = vld [vmem:[#allocation7 + $0x18] sm:$0xff]  }
 0x715   : > { %v9123_v52 = vrot.slane %v6015_v39, %v8574_v44  ;;  %v4486_v30 = vcombine.low %v9029_v38, %v9032_v15  ;;  %v4518_v59 = vcombine.low %v9037_v62, %v9040_v34  ;;  %v4166_v49 = vcombine.low %v8889_v42, %v3141_v12  ;;  %6364 = vmatprep.subr.bf16.mxu1 %v6644_v48 }
 0x716   : > { %v9131_v45 = vrot.slane %v6017_v18, %v8574_v44  ;;  %v9134_v58 = vrot.slane %v6019_v50, %v8574_v44  ;;  %v4118_v1 = vrot.slane %v4110_v31, %v8576_v9  ;;  %v4125_v27 = vrot.slane %v4111_v47, %v8576_v9  ;;  %6365 = vmatpush3.bf16.msra.mxu1 %v6644_v48 }
 0x717   : > { %v9139_v39 = vrot.slane %v6021_v2, %v8574_v44  ;;  %v4494_v5 = vrot.slane %v4486_v30, %v8576_v9  ;;  %v4526_v36 = vrot.slane %v4518_v59, %v8576_v9  ;;  %v4167_v19 = vcombine.high %v8889_v42, %v3141_v12 }
 0x718   : > { %v6023_v18 = vcombine.low %v4102_v25, %v4109_v21  ;;  %v6025_v57 = vcombine.high %v4102_v25, %v4109_v21  ;;  %v4402_v26 = vcombine.low %v4358_v55, %v4390_v33  ;;  %v4174_v50 = vrot.slane %v4166_v49, %v8574_v44 }
 0x719   : > { %v4538_v31 = vcombine.low %v4494_v5, %v4526_v36  ;;  %v4181_v47 = vrot.slane %v4167_v19, %v8574_v44  ;;  %v4182_v32 = vcombine.low %v8918_v22, %v3173_v20  ;;  %v4183_v2 = vcombine.high %v8918_v22, %v3173_v20 }
 0x71a   : > { %v6027_v17 = vcombine.low %v4118_v1, %v4125_v27  ;;  %v4539_v30 = vcombine.high %v4494_v5, %v4526_v36  ;;  %v4351_v59 = vcombine.high %v9005_v8, %v9008_v7  ;;  %v4383_v42 = vcombine.high %v9015_v23, %v9018_v13 }
 0x71b   : > { %v6529_v12 = vpack.i.bf16 %v4538_v31, %v4402_v26  ;;  %v4190_v25 = vrot.slane %v4182_v32, %v8574_v44  ;;  %v4197_v21 = vrot.slane %v4183_v2, %v8574_v44  ;;  %v4487_v49 = vcombine.high %v9029_v38, %v9032_v15 }
 0x71c   : > { %v4403_v19 = vcombine.high %v4358_v55, %v4390_v33  ;;  %v4365_v22 = vrot.slane %v4351_v59, %v8576_v9  ;;  %v4397_v20 = vrot.slane %v4383_v42, %v8576_v9  ;;  %v4519_v48 = vcombine.high %v9037_v62, %v9040_v34  ;;  %v6645_v33 = vld [vmem:[#allocation7 + $0x20] sm:$0xff]  }
 0x71d   : > { %6530 = vrot.lane.b32.xlu0 %v6529_v12, %s7078_s7  ;;  %v4230_v8 = vcombine.low %v4174_v50, %v4190_v25  ;;  %v4231_v7 = vcombine.high %v4174_v50, %v4190_v25  ;;  %v4246_v26 = vcombine.low %v4181_v47, %v4197_v21  ;;  %v4247_v23 = vcombine.high %v4181_v47, %v4197_v21 }
 0x71e   : > { %v6029_v32 = vcombine.high %v4118_v1, %v4125_v27  ;;  %v4501_v13 = vrot.slane %v4487_v49, %v8576_v9  ;;  %v4533_v5 = vrot.slane %v4519_v48, %v8576_v9  ;;  %v4622_v38 = vcombine.low %v9053_v37, %v9056_v11  ;;  %6366 = vmatprep.subr.bf16.mxu1 %v6645_v33  ;;  %v6646_v49 = vld [vmem:[#allocation7 + $0x28] sm:$0xff]  }
 0x71f   : > { %v4238_v15 = vrot.slane %v4230_v8, %v8576_v9  ;;  %v4245_v55 = vrot.slane %v4231_v7, %v8576_v9  ;;  %v9168_v62 = vrot.slane %v4246_v26, %v8576_v9  ;;  %v6534_v34 = vpack.i.bf16 %v4539_v30, %v4403_v19  ;;  %6367 = vmatpush3.bf16.msra.mxu1 %v6645_v33 }
 0x720   : > { %v4261_v36 = vrot.slane %v4247_v23, %v8576_v9  ;;  %v4540_v50 = vcombine.low %v4501_v13, %v4533_v5  ;;  %v4654_v1 = vcombine.low %v9063_v16, %v9066_v14  ;;  %v4758_v27 = vcombine.low %v9077_v54, %v9080_v3  ;;  %6368 = vmatprep.subr.bf16.mxu1 %v6646_v49 }
 0x721   : > { %v9176_v31 = vrot.slane %v6023_v18, %v8574_v44  ;;  %v9179_v47 = vrot.slane %v6025_v57, %v8574_v44  ;;  %v9182_v2 = vrot.slane %v6027_v17, %v8574_v44  ;;  %6535 = vrot.lane.b32.xlu0 %v6534_v34, %s7073_s21  ;;  %v4404_v30 = vcombine.low %v4365_v22, %v4397_v20 }
 0x722   : > { %v4630_v59 = vrot.slane %v4622_v38, %v8576_v9  ;;  %v4662_v42 = vrot.slane %v4654_v1, %v8576_v9  ;;  %v4766_v12 = vrot.slane %v4758_v27, %v8576_v9  ;;  %v4790_v25 = vcombine.low %v9085_v56, %v9088_v0 }
 0x723   : > { %v9191_v18 = vrot.slane %v6029_v32, %v8574_v44  ;;  %v6031_v57 = vcombine.low %v4238_v15, %v4245_v55  ;;  %v6033_v21 = vcombine.high %v4238_v15, %v4245_v55  ;;  %v6539_v17 = vpack.i.bf16 %v4540_v50, %v4404_v30  ;;  %6369 = vmatpush3.bf16.msra.mxu1 %v6646_v49 }
 0x724   : > { %v6035_v19 = vcombine.low %v9168_v62, %v4261_v36  ;;  %v4798_v48 = vrot.slane %v4790_v25, %v8576_v9  ;;  %v4405_v8 = vcombine.high %v4365_v22, %v4397_v20  ;;  %v4541_v7 = vcombine.high %v4501_v13, %v4533_v5 }
 0x725   : > { %v6037_v26 = vcombine.high %v9168_v62, %v4261_v36  ;;  %6540 = vrot.lane.b32.xlu0 %v6539_v17, %s7076_s6  ;;  %v4623_v23 = vcombine.high %v9053_v37, %v9056_v11  ;;  %v4655_v32 = vcombine.high %v9063_v16, %v9066_v14  ;;  %v4759_v38 = vcombine.high %v9077_v54, %v9080_v3  ;;  %v6647_v11 = vld [vmem:[#allocation7 + $0x30] sm:$0xff]  }
 0x726   : > { %v4674_v15 = vcombine.low %v4630_v59, %v4662_v42  ;;  %v4810_v55 = vcombine.low %v4766_v12, %v4798_v48  ;;  %v6544_v34 = vpack.i.bf16 %v4541_v7, %v4405_v8  ;;  %v4791_v22 = vcombine.high %v9085_v56, %v9088_v0  ;;  %6370 = vmatprep.subr.bf16.mxu1 %v6647_v11 }
 0x727   : > { %v4637_v20 = vrot.slane %v4623_v23, %v8576_v9  ;;  %v4669_v13 = vrot.slane %v4655_v32, %v8576_v9  ;;  %v4773_v5 = vrot.slane %v4759_v38, %v8576_v9  ;;  %v4894_v37 = vcombine.low %v9107_v63, %v9110_v61  ;;  %6371 = vmatpush3.bf16.msra.mxu1 %v6647_v11 }
 0x728   : > { %v6549_v16 = vpack.i.bf16 %v4810_v55, %v4674_v15  ;;  %v4811_v14 = vcombine.high %v4766_v12, %v4798_v48  ;;  %v4805_v54 = vrot.slane %v4791_v22, %v8576_v9  ;;  %v4926_v3 = vcombine.low %v9113_v6, %v9116_v10 }
 0x729   : > { %v9214_v56 = vrot.slane %v6031_v57, %v8574_v44  ;;  %6545 = vrot.lane.b32.xlu0 %v6544_v34, %s7074_s23  ;;  %v4902_v0 = vrot.slane %v4894_v37, %v8576_v9  ;;  %v5030_v62 = vcombine.low %v9123_v52, %v9131_v45  ;;  %v5062_v33 = vcombine.low %v9134_v58, %v9139_v39 }
 0x72a   : > { %v5253_v36 = vrot.slane %v6033_v21, %v8574_v44  ;;  %6550 = vrot.lane.b32.xlu1 %v6549_v16, %s7078_s7  ;;  %v4675_v50 = vcombine.high %v4630_v59, %v4662_v42  ;;  %v4812_v1 = vcombine.low %v4773_v5, %v4805_v54  ;;  %v4934_v27 = vrot.slane %v4926_v3, %v8576_v9  ;;  %v6648_v42 = vld [vmem:[#allocation7 + $0x38] sm:$0xff]  }
 0x72b   : > { %v5269_v30 = vrot.slane %v6035_v19, %v8574_v44  ;;  %v4676_v12 = vcombine.low %v4637_v20, %v4669_v13  ;;  %v5038_v25 = vrot.slane %v5030_v62, %v8576_v9  ;;  %v5070_v57 = vrot.slane %v5062_v33, %v8576_v9  ;;  %6372 = vmatprep.subr.bf16.mxu1 %v6648_v42 }
 0x72c   : > { %v5285_v17 = vrot.slane %v6037_v26, %v8574_v44  ;;  %v6554_v49 = vpack.i.bf16 %v4811_v14, %v4675_v50  ;;  %v4895_v21 = vcombine.high %v9107_v63, %v9110_v61  ;;  %v4927_v59 = vcombine.high %v9113_v6, %v9116_v10  ;;  %6373 = vmatpush3.bf16.msra.mxu1 %v6648_v42 }
 0x72d   : > { %v6559_v48 = vpack.i.bf16 %v4812_v1, %v4676_v12  ;;  %v4946_v8 = vcombine.low %v4902_v0, %v4934_v27  ;;  %v5082_v19 = vcombine.low %v5038_v25, %v5070_v57  ;;  %v4813_v7 = vcombine.high %v4773_v5, %v4805_v54 }
 0x72e   : > { %6555 = vrot.lane.b32.xlu1 %v6554_v49, %s7073_s21  ;;  %v5031_v23 = vcombine.high %v9123_v52, %v9131_v45  ;;  %v5063_v44 = vcombine.high %v9134_v58, %v9139_v39  ;;  %v5166_v63 = vcombine.low %v9176_v31, %v9179_v47  ;;  %v5198_v61 = vcombine.low %v9182_v2, %v9191_v18 }
 0x72f   : > { %v6569_v6 = vpack.i.bf16 %v5082_v19, %v4946_v8  ;;  %v4947_v10 = vcombine.high %v4902_v0, %v4934_v27  ;;  %v5083_v26 = vcombine.high %v5038_v25, %v5070_v57  ;;  %v5302_v32 = vcombine.low %v9214_v56, %v5253_v36 }
 0x730   : > { %v4909_v38 = vrot.slane %v4895_v21, %v8576_v9  ;;  %v4941_v15 = vrot.slane %v4927_v59, %v8576_v9  ;;  %v5045_v52 = vrot.slane %v5031_v23, %v8576_v9  ;;  %v5077_v45 = vrot.slane %v5063_v44, %v8576_v9 }
 0x731   : > { %6570 = vrot.lane.b32.xlu0 %v6569_v6, %s7078_s7  ;;  %v5174_v58 = vrot.slane %v5166_v63, %v8576_v9  ;;  %v5206_v39 = vrot.slane %v5198_v61, %v8576_v9  ;;  %v5310_v55 = vrot.slane %v5302_v32, %v8576_v9  ;;  %v5334_v34 = vcombine.low %v5269_v30, %v5285_v17 }
 0x732   : > { %6560 = vrot.lane.b32.xlu1 %v6559_v48, %s7076_s6  ;;  %v4677_v22 = vcombine.high %v4637_v20, %v4669_v13  ;;  %v6574_v5 = vpack.i.bf16 %v5083_v26, %v4947_v10  ;;  %v5084_v37 = vcombine.low %v5045_v52, %v5077_v45  ;;  %v5303_v14 = vcombine.high %v9214_v56, %v5253_v36 }
 0x733   : > { %v5342_v11 = vrot.slane %v5334_v34, %v8576_v9  ;;  %v5335_v54 = vcombine.high %v5269_v30, %v5285_v17  ;;  %v4948_v3 = vcombine.low %v4909_v38, %v4941_v15  ;;  %v5218_v0 = vcombine.low %v5174_v58, %v5206_v39 }
 0x734   : > { %v6564_v16 = vpack.i.bf16 %v4813_v7, %v4677_v22  ;;  %v5167_v33 = vcombine.high %v9176_v31, %v9179_v47  ;;  %v5199_v20 = vcombine.high %v9182_v2, %v9191_v18  ;;  %v5085_v1 = vcombine.high %v5045_v52, %v5077_v45 }
 0x735   : > { %6575 = vrot.lane.b32.xlu0 %v6574_v5, %s7073_s21  ;;  %v5354_v62 = vcombine.low %v5310_v55, %v5342_v11  ;;  %v6579_v13 = vpack.i.bf16 %v5084_v37, %v4948_v3  ;;  %v5355_v27 = vcombine.high %v5310_v55, %v5342_v11  ;;  %v5317_v56 = vrot.slane %v5303_v14, %v8576_v9 }
 0x736   : > { %6565 = vrot.lane.b32.xlu1 %v6564_v16, %s7074_s23  ;;  %v5349_v36 = vrot.slane %v5335_v54, %v8576_v9  ;;  %v4949_v30 = vcombine.high %v4909_v38, %v4941_v15  ;;  %v5219_v12 = vcombine.high %v5174_v58, %v5206_v39  ;;  %v5181_v25 = vrot.slane %v5167_v33, %v8576_v9 }
 0x737   : > { %v6584_v50 = vpack.i.bf16 %v5354_v62, %v5218_v0  ;;  %v5213_v31 = vrot.slane %v5199_v20, %v8576_v9  ;;  %v4398_v15 = vcombine.low %v8786_v43, %v8789_v60  ;;  %v4534_v52 = vcombine.low %v8812_v24, %v8817_v4 }
 0x738   : > { %v6599_v47 = vpack.i.bf16 %v5085_v1, %v4949_v30  ;;  %v6589_v2 = vpack.i.bf16 %v5355_v27, %v5219_v12  ;;  %v5356_v18 = vcombine.low %v5317_v56, %v5349_v36  ;;  %v5357_v49 = vcombine.high %v5317_v56, %v5349_v36 }
 0x739   : > { %6580 = vrot.lane.b32.xlu0 %v6579_v13, %s7076_s6  ;;  %v5220_v57 = vcombine.low %v5181_v25, %v5213_v31  ;;  %v5221_v21 = vcombine.high %v5181_v25, %v5213_v31 }
 0x73a   : > { %6585 = vrot.lane.b32.xlu1 %v6584_v50, %s7078_s7 }
 0x73b   : > { %v6594_v17 = vpack.i.bf16 %v5356_v18, %v5220_v57  ;;  %v6604_v59 = vpack.i.bf16 %v5357_v49, %v5221_v21  ;;  %v4670_v57 = vcombine.low %v8838_v51, %v8843_v28  ;;  %v4806_v21 = vcombine.low %v8848_v29, %v8858_v35 }
 0x73c   : > { %v5078_v51 = vcombine.low %v8907_v41, %v8916_v53 }
 0x73d   : > { %6600 = vrot.lane.b32.xlu0 %v6599_v47, %s7074_s23 }
 0x73e   : > { %6590 = vrot.lane.b32.xlu1 %v6589_v2, %s7073_s21  ;;  %s7084_s21 = smov [#allocation8]  }
 0x742   : > { %6595 = vrot.lane.b32.xlu1 %v6594_v17, %s7076_s6 }
 0x745   : > { %v6476_v48 = vpop.permute.xlu1 %6475 }
 0x746   : > { %6605 = vrot.lane.b32.xlu1 %v6604_v59, %s7074_s23  ;;  %v6478_v45 = vunpack.i.h.bf16 %v6476_v48  ;;  %v6477_v58 = vunpack.i.l.bf16 %v6476_v48  ;;  %s6995_s23 = sshll.u32 %s7084_s21, 4  ;;  %s6996_s23 = int_to_ptr.vmem [resolvable:$false] %s6995_s23 }
 0x747   : > { %s6997_s30 = scalar_lea.vmem %s6996_s23, 2048  ;;  %p6998_p5 = scmp.lt.s32.totalorder %s9384_s29, %s6996_s23 }
 0x748   : > { %p6999_p9 = scmp.lt.s32.totalorder %s6997_s30, %s6991_s13 }
 0x74a   : > { %p7000_p12 = por %p6999_p9, %p6998_p5 }
 0x74b   : > { %v6471_v42 = vpop.permute.xlu0 %6470 }
 0x74c   : > { %v6473_v10 = vunpack.i.h.bf16 %v6471_v42  ;;  %v6472_v26 = vunpack.i.l.bf16 %v6471_v42  ;;  %p7001_p2 = pnand %p7000_p12, %p6994_p3 }
 0x74e   : > { %v5582_v39 = vsel %vm932_vm0, %v4398_v15, %v6472_v26  ;;  %v5583_v55 = vsel %vm932_vm0, %v4534_v52, %v6473_v10 }
 0x74f   : > { %v6481_v8 = vpop.permute.xlu0 %6480  ;;  %v5592_v24 = vsel %vm5590_vm3, %v5583_v55, %v6478_v45  ;;  %v5591_v4 = vsel %vm5590_vm3, %v5582_v39, %v6477_v58 }
 0x750   : > { %v6483_v34 = vunpack.i.h.bf16 %v6481_v8  ;;  %v6482_v22 = vunpack.i.l.bf16 %v6481_v8 }
 0x752   : > { %v5600_v3 = vsel %vm5599_vm4, %v5591_v4, %v6482_v22  ;;  %v5601_v0 = vsel %vm5599_vm4, %v5592_v24, %v6483_v34 }
 0x753   : > { %v9270_v9 = vpop.permute.xlu1 %6485 }
 0x754   : > { %v6488_v2 = vunpack.i.h.bf16 %v9270_v9  ;;  %v6487_v18 = vunpack.i.l.bf16 %v9270_v9  ;;  %v4942_v9 = vcombine.low %v8898_v40, %v8901_v46 }
 0x756   : > { %v5584_v29 = vsel %vm932_vm0, %v4670_v57, %v6487_v18 }
 0x757   : > { %v9274_v7 = vpop.permute.xlu1 %6490 }
 0x758   : > { %v6493_v17 = vunpack.i.h.bf16 %v9274_v7  ;;  %v6492_v49 = vunpack.i.l.bf16 %v9274_v7  ;;  %v5585_v7 = vsel %vm932_vm0, %v4806_v21, %v6488_v2 }
 0x75a   : > { %v9272_v19 = vpop.permute.xlu0 %6500 }
 0x75b   : > { %v9278_v44 = vpop.permute.xlu1 %6495  ;;  %v6502_v59 = vunpack.i.l.bf16 %v9272_v19  ;;  %v6503_v40 = vunpack.i.h.bf16 %v9272_v19 }
 0x75c   : > { %v6498_v42 = vunpack.i.h.bf16 %v9278_v44  ;;  %v6497_v48 = vunpack.i.l.bf16 %v9278_v44  ;;  %v5594_v44 = vsel %vm5590_vm3, %v5585_v7, %v6493_v17  ;;  %v9602_v7 = vld [vmem:[#allocation40_spill] sm:$0xff] }
 0x75d   : > { %v5586_v46 = vsel %vm932_vm0, %v4942_v9, %v6502_v59 }
 0x75e   : > { %v9276_v23 = vpop.permute.xlu0 %6505  ;;  %v5603_v53 = vsel %vm5599_vm4, %v5594_v44, %v6498_v42 }
 0x75f   : > { %v6508_v58 = vunpack.i.h.bf16 %v9276_v23  ;;  %v6507_v39 = vunpack.i.l.bf16 %v9276_v23 }
 0x760   : > { %v9282_v61 = vpop.permute.xlu1 %6515 }
 0x761   : > { %v6518_v42 = vunpack.i.h.bf16 %v9282_v61 }
 0x762   : > { %v9280_v63 = vpop.permute.xlu0 %6510 }
 0x765   : > { %v9284_v32 = vpop.permute.xlu1 %6520 }
 0x769   : > { %v9292_v16 = vpop.permute.xlu1 %6525 }
 0x78f   : > { %v6531_v6 = vpop.permute.xlu0 %6530 }
 0x790   : > { %v6533_v5 = vunpack.i.h.bf16 %v6531_v6  ;;  %v6532_v37 = vunpack.i.l.bf16 %v6531_v6 }
 0x792   : > { %v5608_v62 = vsel %vm1549_vm1, %v5600_v3, %v6532_v37  ;;  %v5609_v33 = vsel %vm1549_vm1, %v5601_v0, %v6533_v5 }
 0x793   : > { %v6536_v38 = vpop.permute.xlu0 %6535 }
 0x794   : > { %v6538_v43 = vunpack.i.h.bf16 %v6536_v38  ;;  %v6537_v60 = vunpack.i.l.bf16 %v6536_v38  ;;  %v5593_v38 = vsel %vm5590_vm3, %v5584_v29, %v6492_v49  ;;  %v9603_v29 = vld [vmem:[#allocation12_spill] sm:$0xff] }
 0x795   : > { %v5602_v41 = vsel %vm5599_vm4, %v5593_v38, %v6497_v48  ;;  %v6517_v48 = vunpack.i.l.bf16 %v9282_v61  ;;  %v6527_v38 = vunpack.i.l.bf16 %v9292_v16 }
 0x796   : > { %v5617_v13 = vsel %vm5616_vm5, %v5608_v62, %v6537_v60  ;;  %v5618_v50 = vsel %vm5616_vm5, %v5609_v33, %v6538_v43  ;;  %v6513_v43 = vunpack.i.h.bf16 %v9280_v63  ;;  %v6512_v60 = vunpack.i.l.bf16 %v9280_v63 }
 0x797   : > { %v6541_v11 = vpop.permute.xlu0 %6540  ;;  %v5587_v62 = vsel %vm932_vm0, %v5078_v51, %v6503_v40  ;;  %v6523_v51 = vunpack.i.h.bf16 %v9284_v32 }
 0x798   : > { %v6543_v14 = vunpack.i.h.bf16 %v6541_v11  ;;  %v6542_v54 = vunpack.i.l.bf16 %v6541_v11  ;;  %v5596_v63 = vsel %vm5590_vm3, %v5587_v62, %v6508_v58 }
 0x79a   : > { %v5626_v36 = vsel %vm5625_vm6, %v5617_v13, %v6542_v54  ;;  %v5627_v30 = vsel %vm5625_vm6, %v5618_v50, %v6543_v14 }
 0x79b   : > { %v6546_v20 = vpop.permute.xlu0 %6545 }
 0x79c   : > { %v6551_v1 = vpop.permute.xlu1 %6550  ;;  %v6548_v27 = vunpack.i.h.bf16 %v6546_v20  ;;  %v6547_v56 = vunpack.i.l.bf16 %v6546_v20 }
 0x79d   : > { %v6553_v28 = vunpack.i.h.bf16 %v6551_v1  ;;  %v6552_v6 = vunpack.i.l.bf16 %v6551_v1  ;;  %v5595_v1 = vsel %vm5590_vm3, %v5586_v46, %v6507_v39 }
 0x79e   : > { %v5635_v12 = vsel %vm5634_vm7, %v5626_v36, %v6547_v56  ;;  %v5636_v25 = vsel %vm5634_vm7, %v5627_v30, %v6548_v27  ;;  %v5604_v36 = vsel %vm5599_vm4, %v5595_v1, %v6512_v60  ;;  %v5605_v30 = vsel %vm5599_vm4, %v5596_v63, %v6513_v43 }
 0x79f   : > { %v5643_v31 = vpack.c.bf16 %v5636_v25, %v5635_v12  ;;  %v5610_v55 = vsel %vm1549_vm1, %v5602_v41, %v6552_v6  ;;  %v5611_v34 = vsel %vm1549_vm1, %v5603_v53, %v6553_v28  ;;  %v9600_v12 = vld [vmem:[#allocation44_spill] sm:$0xff]  ;;  %v9601_v25 = vld [vmem:[#allocation23_spill] sm:$0xff]  ;;  %v6522_v28 = vunpack.i.l.bf16 %v9284_v32 }
 0x7a0   : > { %v6556_v47 = vpop.permute.xlu1 %6555 }
 0x7a1   : > { %6374 = vmatprep.mubr.bf16.mxu1 %v5643_v31  ;;  %v6558_v35 = vunpack.i.h.bf16 %v6556_v47  ;;  %v6557_v26 = vunpack.i.l.bf16 %v6556_v47  ;;  %v5214_v31 = vcombine.low %v9601_v25, %v9600_v12 }
 0x7a3   : > { %v6571_v8 = vpop.permute.xlu0 %6570  ;;  %v5619_v5 = vsel %vm5616_vm5, %v5610_v55, %v6557_v26  ;;  %v5620_v19 = vsel %vm5616_vm5, %v5611_v34, %v6558_v35  ;;  %v5350_v35 = vcombine.low %v9603_v29, %v9602_v7  ;;  %v6528_v26 = vunpack.i.h.bf16 %v9292_v16 }
 0x7a4   : > { %v6561_v10 = vpop.permute.xlu1 %6560  ;;  %v6573_v23 = vunpack.i.h.bf16 %v6571_v8  ;;  %v6572_v14 = vunpack.i.l.bf16 %v6571_v8  ;;  %v5588_v46 = vsel %vm932_vm0, %v5214_v31, %v6517_v48 }
 0x7a5   : > { %v6563_v15 = vunpack.i.h.bf16 %v6561_v10  ;;  %v6562_v52 = vunpack.i.l.bf16 %v6561_v10  ;;  %v5589_v40 = vsel %vm932_vm0, %v5350_v35, %v6518_v42  ;;  %v5597_v53 = vsel %vm5590_vm3, %v5588_v46, %v6522_v28 }
 0x7a6   : > { %v5613_v47 = vsel %vm1549_vm1, %v5605_v30, %v6573_v23  ;;  %v5612_v2 = vsel %vm1549_vm1, %v5604_v36, %v6572_v14  ;;  %v5606_v55 = vsel %vm5599_vm4, %v5597_v53, %v6527_v38 }
 0x7a7   : > { %v6576_v45 = vpop.permute.xlu0 %6575  ;;  %v5628_v24 = vsel %vm5625_vm6, %v5619_v5, %v6562_v52  ;;  %v5629_v4 = vsel %vm5625_vm6, %v5620_v19, %v6563_v15 }
 0x7a8   : > { %v6566_v22 = vpop.permute.xlu1 %6565  ;;  %v6578_v33 = vunpack.i.h.bf16 %v6576_v45  ;;  %v6577_v20 = vunpack.i.l.bf16 %v6576_v45  ;;  %v5598_v45 = vsel %vm5590_vm3, %v5589_v40, %v6523_v51 }
 0x7a9   : > { %v6568_v37 = vunpack.i.h.bf16 %v6566_v22  ;;  %v6567_v11 = vunpack.i.l.bf16 %v6566_v22  ;;  %v5607_v16 = vsel %vm5599_vm4, %v5598_v45, %v6528_v26 }
 0x7aa   : > { %v5621_v57 = vsel %vm5616_vm5, %v5612_v2, %v6577_v20  ;;  %v5622_v17 = vsel %vm5616_vm5, %v5613_v47, %v6578_v33 }
 0x7ab   : > { %v5637_v54 = vsel %vm5634_vm7, %v5628_v24, %v6567_v11  ;;  %v5638_v3 = vsel %vm5634_vm7, %v5629_v4, %v6568_v37  ;;  %v6581_v0 = vpop.permute.xlu0 %6580 }
 0x7ac   : > { %v5644_v13 = vpack.c.bf16 %v5638_v3, %v5637_v54  ;;  %v6586_v50 = vpop.permute.xlu1 %6585  ;;  %v6583_v27 = vunpack.i.h.bf16 %v6581_v0  ;;  %v6582_v56 = vunpack.i.l.bf16 %v6581_v0  ;;  %v6038_v54 = vld [vmem:[%s9436_s3] ss:$0 sm:$0xff] }
 0x7ad   : > { %v6588_v44 = vunpack.i.h.bf16 %v6586_v50  ;;  %v6587_v15 = vunpack.i.l.bf16 %v6586_v50 }
 0x7ae   : > { %6375 = vmatmul.mubr.bf16.vlgmr.msra.gmra.mrb[56].mxu1 %v5644_v13  ;;  %v5630_v8 = vsel %vm5625_vm6, %v5621_v57, %v6582_v56  ;;  %v5631_v9 = vsel %vm5625_vm6, %v5622_v17, %v6583_v27 }
 0x7af   : > { %v6601_v18 = vpop.permute.xlu0 %6600  ;;  %v5614_v34 = vsel %vm1549_vm1, %v5606_v55, %v6587_v15  ;;  %v5615_v22 = vsel %vm1549_vm1, %v5607_v16, %v6588_v44 }
 0x7b0   : > { %v6603_v49 = vunpack.i.h.bf16 %v6601_v18  ;;  %v6602_v21 = vunpack.i.l.bf16 %v6601_v18  ;;  %v6591_v59 = vpop.permute.xlu1 %6590 }
 0x7b1   : > { %v6593_v32 = vunpack.i.h.bf16 %v6591_v59  ;;  %v6592_v41 = vunpack.i.l.bf16 %v6591_v59 }
 0x7b2   : > { %v5639_v6 = vsel %vm5634_vm7, %v5630_v8, %v6602_v21  ;;  %v5640_v10 = vsel %vm5634_vm7, %v5631_v9, %v6603_v49 }
 0x7b3   : > { %v5645_v61 = vpack.c.bf16 %v5640_v10, %v5639_v6  ;;  %v5623_v19 = vsel %vm5616_vm5, %v5614_v34, %v6592_v41  ;;  %v5624_v37 = vsel %vm5616_vm5, %v5615_v22, %v6593_v32 }
 0x7b4   : > { %v6596_v52 = vpop.permute.xlu1 %6595 }
 0x7b5   : > { %6378 = vmatprep.mubr.bf16.mxu1 %v5645_v61  ;;  %v6598_v58 = vunpack.i.h.bf16 %v6596_v52  ;;  %v6597_v39 = vunpack.i.l.bf16 %v6596_v52 }
 0x7b7   : > { %v5632_v60 = vsel %vm5625_vm6, %v5623_v19, %v6597_v39  ;;  %v5633_v24 = vsel %vm5625_vm6, %v5624_v37, %v6598_v58 }
 0x7b8   : > { %v6606_v5 = vpop.permute.xlu1 %6605 }
 0x7b9   : > { %v6608_v11 = vunpack.i.h.bf16 %v6606_v5  ;;  %v6607_v43 = vunpack.i.l.bf16 %v6606_v5 }
 0x7bb   : > { %v5641_v4 = vsel %vm5634_vm7, %v5632_v60, %v6607_v43  ;;  %v5642_v23 = vsel %vm5634_vm7, %v5633_v24, %v6608_v11 }
 0x7bc   : > { %v5646_v14 = vpack.c.bf16 %v5642_v23, %v5641_v4 }
 0x7be   : > { %6379 = vmatmul.mubr.bf16.gmra.mrb[60].mxu1 %v5646_v14 }
 0x881   : > { %v6376_v3 = vpop.f32.mrb[56].mxu1 }
 0x882   : > { %v5761_v0 = vadd.f32 %v6376_v3, %v6038_v54  ;;  %v5752_v62 = vpop.f32.mrb[57].mxu1 }
 0x883   : > { %v5753_v33 = vadd.f32 %v6038_v54, %v5752_v62  ;;  %v6377_v20 = vpop.f32.mrb[58].mxu1 }
 0x884   : > { %5785 = vst [vmem:[%s244_s27 + $0x10] sm:$0xff] %v5761_v0  ;;  %v5764_v13 = vadd.f32 %v6377_v20, %v6038_v54  ;;  %v5755_v50 = vpop.f32.mrb[59].mxu1 }
 0x885   : > { %5783 = vst [vmem:[%s244_s27] sm:$0xff] %v5753_v33  ;;  %v5756_v1 = vadd.f32 %v6038_v54, %v5755_v50 }
 0x886   : > { %5786 = vst [vmem:[%s244_s27 + $0x18] sm:$0xff] %v5764_v13 }
 0x887   : > { %5784 = vst [vmem:[%s244_s27 + $0x8] sm:$0xff] %v5756_v1 }
 0x891   : > { %v6380_v63 = vpop.f32.mrb[60].mxu1 }
 0x892   : > { %v5777_v27 = vadd.f32 %v6380_v63, %v6038_v54  ;;  %v5768_v56 = vpop.f32.mrb[61].mxu1 }
 0x893   : > { %v5769_v36 = vadd.f32 %v6038_v54, %v5768_v56  ;;  %v6381_v30 = vpop.f32.mrb[62].mxu1 }
 0x894   : > { %5789 = vst [vmem:[%s244_s27 + $0x30] sm:$0xff] %v5777_v27  ;;  %v5780_v12 = vadd.f32 %v6381_v30, %v6038_v54  ;;  %v5771_v25 = vpop.f32.mrb[63].mxu1 }
 0x895   : > { %5787 = vst [vmem:[%s244_s27 + $0x20] sm:$0xff] %v5769_v36  ;;  %v5772_v31 = vadd.f32 %v6038_v54, %v5771_v25 }
 0x896   : > { %5790 = vst [vmem:[%s244_s27 + $0x38] sm:$0xff] %v5780_v12 }
 0x897   : > { %5788 = vst [vmem:[%s244_s27 + $0x28] sm:$0xff] %v5772_v31 }
 0x898   : > { %7004 = shalt.err (!%p7001_p2)
}
 0x899   : > { %s7005_s6 = scalar_lea.hbm %s9389_s12, 1024  ;;  %s7009_s24 = scalar_lea.hbm %s9437_s4, 2048 }
 0x89a   : > { %p7006_p13 = scmp.ne.s32.totalorder %s9389_s12, %s7005_s6  ;;  %p7010_p4 = scmp.lt.u32.totalorder %s9389_s12, %s9437_s4 }
 0x89b   : > { %p7011_p7 = scmp.lt.u32.totalorder %s7009_s24, %s7005_s6  ;;  %p7013_p11 = scmp.lt.u32.totalorder %s7005_s6, %s9389_s12 }
 0x89c   : > { %p7007_p6 = pnand %p7006_p13, %p9604_p0 }
 0x89d   : > { %p7012_p8 = por %p7011_p7, %p7010_p4 }
 0x89e   : > { %p7008_p10 = pneg %p7007_p6 }
 0x89f   : > { %p7014_p1 = por %p7013_p11, %p7012_p8 }
 0x8a1   : > { %p7015_p3 = pnand %p7014_p1, %p7008_p10 }
 0x8a3   : > { %7018 = shalt.err (!%p7015_p3)
}
 0x8a4   : > { %s7085_s27 = smov 128   ;;  %s7086_s5 = smov 8  }
 0x8a5   : > { %6392 = dma.vmem_to_hbm [thread:$0]  (%p9604_p0), %s9384_s29, 1024, %s9389_s12, %s5792_s19, %s7085_s27, %s7085_s27, %s7086_s5  }
 0x8a6 PF: > { %s5820_s8 = sand.u32 1, %s7049_s15   ;;  %p9605_p5 = scmp.ne.s32.totalorder %s9481_s22, 0 }
 0x8a7   : > { %p9606_p9 = scmp.ge.s32.totalorder %s7061_s18, 2  ;;  %s5821_s10 = scalar_lea.sflag [#allocation4], %s5820_s8 }
 0x8a9   : > { %p6406_p12 = pnand %p9606_p9, %p9605_p5 }
 0x8ab   : > { %7044 = dma.done.wait (!%p6406_p12), %s5821_s10, 1024  }
 0x8ac   : > { %7046 = vsyncadd (!%p6406_p12), %s5821_s10, 4294966272  ;;  %p18_p2 = scmp.ge.s32.totalorder %s7222_s11, 4   ;;  %s9607_s15 = smov %s7053_s16 }
 0x8ad   : > { %s9608_s16 = smov %s7057_s17  ;;  %s9609_s17 = smov %s7231_s14 }
 0x8ae   : > { %s9610_s18 = smov %s7222_s11  ;;  %20 = sbr.rel (!%p18_p2) target bundleno = 6 (0x6), region = 89 }
 0x8b5   :  { %5826 = vsyncpa [#allocation3], 1 }
 0x8b6   :  { %5828 = vsyncpa [#allocation3 + $0x1], 1 }
 0x8b7   :  { %5829 = vsyncpa [#allocation6], 1 }
 0x8b8   :  { %5830 = vsyncpa [#allocation4], 1 }
 0x8b9   :  { %5832 = vsyncpa [#allocation4 + $0x1], 1 }

</bundles_post_ra>
